<compile_context>
chip_gen: v5e
topology: v5e:2x2
jax: 0.10.0
libtpu: 0.0.40
codegen_flags: <defaults>
</compile_context>

<pallas_src>
import jax
import jax.numpy as jnp
from jax.experimental import pallas as pl
from jax.experimental.pallas import tpu as pltpu

N_OUT = 12      # 3 eigenvalue-head outputs + 9 eigenvector-head outputs
N_PAD = 128     # lane-dense output width / MXU-native N


def _stable_softplus(x):
    # matches torch.nn.Softplus(beta=1, threshold=20)
    return jnp.where(x > 20.0, x, jnp.log1p(jnp.exp(jnp.minimum(x, 20.0))))


def _fused_head_kernel(x_ref, w_ref, b_ref, o_ref):
    """Pure DMA + MXU: (Bt, TK) @ (TK, 128), accumulated into o_ref across the
    K grid axis; bias + softplus on the first 3 lanes applied on the last step."""
    k = pl.program_id(1)

    @pl.when(k == 0)
    def _():
        o_ref[...] = jnp.zeros_like(o_ref)

    o_ref[...] += jnp.dot(x_ref[...], w_ref[...],
                          preferred_element_type=jnp.float32)

    @pl.when(k == pl.num_programs(1) - 1)
    def _():
        pooled = o_ref[...] + b_ref[...]
        lane = jax.lax.broadcasted_iota(jnp.int32, pooled.shape, 1)
        o_ref[...] = jnp.where(lane < 3, _stable_softplus(pooled), pooled)


def _round_up(v, m):
    return (v + m - 1) // m * m


def _tpu_budget_and_cores():
    """Per-TensorCore VMEM capacity + TC count (v7x has 2 TCs per chip)."""
    vmem_cap = 64 * 1024 * 1024
    cores = 1
    try:
        vmem_cap = int(pltpu.get_tpu_info().vmem_capacity_bytes)
    except Exception:
        pass
    try:
        if "v7" in jax.devices()[0].device_kind.lower():
            cores = 2
    except Exception:
        pass
    return vmem_cap, cores


def _pick_tiles(B, K, x_itemsize, w_itemsize, vmem_cap, cores):
    """Biggest-block-that-fits sizing.  Budget counts double-buffered x, weight,
    bias and output blocks.  1-TC parts: one big batch block per step when
    possible.  v7x: >=2 and even grid steps so both TCs stay busy."""
    budget = int(vmem_cap * 0.6)

    # --- K tiling: keep the full (K, N_PAD) weight resident when it fits,
    # otherwise split K into 128-aligned chunks that exactly divide K.
    if 2 * K * N_PAD * w_itemsize <= budget // 2 or K % 128 != 0:
        tk = K
    else:
        units = K // 128
        cap_units = max(1, (budget // 2) // (2 * 128 * N_PAD * w_itemsize))
        tk = 128
        for cand in range(min(units, cap_units), 0, -1):
            if units % cand == 0:
                tk = 128 * cand
                break
    nk = K // tk

    # --- batch tiling against what is left (weight double-buffer accounted for).
    w_buf = 2 * tk * N_PAD * w_itemsize
    misc = 2 * N_PAD * 4                                  # bias block
    per_row = 2 * (tk * x_itemsize + N_PAD * 4)           # x row + out row, double-buffered
    left = max(budget - w_buf - misc, per_row * 8)
    bt_cap = max(8, (left // per_row) // 8 * 8)

    B8 = _round_up(B, 8)
    if cores >= 2:
        nb = _round_up(max(2, pl.cdiv(B8, bt_cap)), 2)    # even step count for 2 TCs
        bt = _round_up(pl.cdiv(B8, nb), 8)
    else:
        bt = min(bt_cap, B8)                              # single big block when it fits
        nb = pl.cdiv(B8, bt)
    return bt, nb, tk, nk, bt * nb


def conv_pool_heads(x_nchw, w_conv, b_conv, *, compute_dtype=jnp.float32):
    """Fused Conv2d(3x3, pad=1) -> mean-pool for both heads.
    x_nchw: (B, C, H, W); w_conv: (12, C, 3, 3) OIHW; b_conv: (12,) -> (B, 12) f32."""
    B, C, H, W = x_nchw.shape
    K = C * H * W

    # Wrapper-side weight folding (tiny, O(C*9*12)):
    #   Wbig[c,h,w,o] = (1/HW) * sum_{taps (a,b) whose sliding window covers (h,w)}
    #                   w_conv[o,c,a,b]
    # The conv's zero border is handled by the row/col validity masks, so no
    # jnp.pad pass over x is ever needed.
    h_idx = jnp.arange(H)
    w_idx = jnp.arange(W)
    row_mask = jnp.stack([h_idx <= H - 2, jnp.ones((H,), bool), h_idx >= 1],
                         axis=1).astype(jnp.float32)                  # (H, 3)
    col_mask = jnp.stack([w_idx <= W - 2, jnp.ones((W,), bool), w_idx >= 1],
                         axis=1).astype(jnp.float32)                  # (W, 3)
    w_t = jnp.transpose(w_conv.astype(jnp.float32), (1, 2, 3, 0))     # (C, 3, 3, 12)
    w_big = jnp.einsum("cabo,ha,wb->chwo", w_t, row_mask, col_mask) / float(H * W)
    w_big = w_big.reshape(K, N_OUT)
    w_big = jnp.pad(w_big, ((0, 0), (0, N_PAD - N_OUT))).astype(compute_dtype)
    b_k = jnp.pad(b_conv.astype(jnp.float32).reshape(1, N_OUT),
                  ((0, 0), (0, N_PAD - N_OUT)))

    # x: NCHW -> (B, C*H*W) is a free row-major reshape (no transpose HBM pass).
    x2 = x_nchw.reshape(B, K).astype(compute_dtype)

    vmem_cap, cores = _tpu_budget_and_cores()
    x_isz = jnp.dtype(compute_dtype).itemsize
    bt, nb, tk, nk, B_pad = _pick_tiles(B, K, x_isz, x_isz, vmem_cap, cores)
    if B_pad != B:
        x2 = jnp.pad(x2, ((0, B_pad - B), (0, 0)))        # keeps Bt VMEM-optimal for any B

    needed = (2 * bt * tk * x_isz + 2 * tk * N_PAD * x_isz
              + 2 * bt * N_PAD * 4 + 2 * N_PAD * 4)
    vmem_limit = min(int(vmem_cap * 0.9), max(needed + (8 << 20), 32 << 20))

    out = pl.pallas_call(
        _fused_head_kernel,
        out_shape=jax.ShapeDtypeStruct((B_pad, N_PAD), jnp.float32),
        grid=(nb, nk),
        in_specs=[
            pl.BlockSpec((bt, tk), lambda i, k: (i, k)),
            pl.BlockSpec((tk, N_PAD), lambda i, k: (k, 0)),
            pl.BlockSpec((1, N_PAD), lambda i, k: (0, 0)),
        ],
        out_specs=pl.BlockSpec((bt, N_PAD), lambda i, k: (i, 0)),
        compiler_params=pltpu.CompilerParams(
            dimension_semantics=("parallel", "arbitrary"),
            vmem_limit_bytes=vmem_limit),
    )(x2, w_big, b_k)
    return out[:B, :N_OUT]                                # (B, 12)


def full_cov_conv_predictor(x, params, cov_add_eps=1e-8, compute_dtype=jnp.float32):
    """Replicates FullCovConvPredictor.forward. x: (B, dim, H, W) -> (B, 1, 3, 3)."""
    B = x.shape[0]
    pooled = conv_pool_heads(x, params["w"], params["b"],
                             compute_dtype=compute_dtype)   # (B, 12), Pallas hot path
    eigvals = pooled[:, :3]                                 # softplus applied in kernel
    A = pooled[:, 3:].reshape(B, 3, 3)
    # TODO(synk): the 3x3 batched QR + Q @ diag @ Q^T recomposition stays in plain
    # JAX (no Pallas-worthy equivalent at 3x3 scale; cov is invariant to QR signs).
    Q, _ = jnp.linalg.qr(A)
    cov = jnp.einsum("bij,bj,bkj->bik", Q, eigvals, Q)      # Q @ diag @ Q^T
    cov = 0.5 * (cov + jnp.swapaxes(cov, -2, -1))
    cov = cov + cov_add_eps * jnp.eye(3, dtype=cov.dtype)
    return cov.reshape(B, 1, 3, 3)


def init_params(key, dim):
    """Deterministic synthetic init (PyTorch Conv2d-like uniform(-1/sqrt(fan_in), ...))."""
    k1, k2, k3, k4 = jax.random.split(key, 4)
    bound = float(1.0 / (dim * 9) ** 0.5)
    w_val = jax.random.uniform(k1, (3, dim, 3, 3), jnp.float32, -bound, bound)
    b_val = jax.random.uniform(k2, (3,), jnp.float32, -bound, bound)
    w_vec = jax.random.uniform(k3, (9, dim, 3, 3), jnp.float32, -bound, bound)
    b_vec = jax.random.uniform(k4, (9,), jnp.float32, -bound, bound)
    return {"w": jnp.concatenate([w_val, w_vec], axis=0),
            "b": jnp.concatenate([b_val, b_vec], axis=0)}


if __name__ == "__main__":
    key = jax.random.PRNGKey(0)
    kx, kp = jax.random.split(key)
    B, dim, H, W = 2, 32, 16, 16                            # small shapes
    x = jax.random.normal(kx, (B, dim, H, W), jnp.float32)  # NCHW, like the PyTorch module
    params = init_params(kp, dim)

    cov = jax.jit(full_cov_conv_predictor)(x, params)
    cov = jax.block_until_ready(cov)
    assert cov.shape == (B, 1, 3, 3)
    # covariance must be symmetric
    assert jnp.allclose(cov, jnp.swapaxes(cov, -2, -1), atol=1e-6)

    # Check the Pallas hot path against an XLA conv + mean-pool reference.
    y = jax.lax.conv_general_dilated(x, params["w"], (1, 1), "SAME",
                                     dimension_numbers=("NCHW", "OIHW", "NCHW"))
    y = jnp.mean(y, axis=(2, 3)) + params["b"][None, :]
    ref = jnp.concatenate([_stable_softplus(y[:, :3]), y[:, 3:]], axis=-1)

    got = jax.block_until_ready(conv_pool_heads(x, params["w"], params["b"]))
    assert jnp.allclose(got, ref, atol=1e-3, rtol=1e-3), "f32 Pallas conv+pool mismatch"

    # bf16 HBM/DMA path (halved bytes moved, f32 MXU accumulation).
    got_bf16 = jax.block_until_ready(
        conv_pool_heads(x, params["w"], params["b"], compute_dtype=jnp.bfloat16))
    assert jnp.allclose(got_bf16, ref, atol=5e-3, rtol=5e-3), "bf16 Pallas conv+pool mismatch"

    print("KERNEL_OK")
</pallas_src>

<mosaic_0001>
module attributes {stable_mosaic.version = 11 : i64} {
  func.func @_fused_head_kernel(%arg0: i32, %arg1: i32, %arg2: memref<8x8192xf32, #tpu.memory_space<vmem>>, %arg3: memref<8192x128xf32, #tpu.memory_space<vmem>>, %arg4: memref<1x128xf32, #tpu.memory_space<vmem>>, %arg5: memref<8x128xf32, #tpu.memory_space<vmem>>) attributes {dimension_semantics = [#tpu.dimension_semantics<parallel>, #tpu.dimension_semantics<arbitrary>], iteration_bounds = array<i64: 1, 1>, scalar_prefetch = 0 : i64, scratch_operands = 0 : i64, tpu.core_type = #tpu.core_type<tc>, window_params = [{transform_indices = @transform_0, window_bounds = array<i64: 8, 8192>}, {transform_indices = @transform_1, window_bounds = array<i64: 8192, 128>}, {pipeline_mode = #tpu.pipeline_mode<synchronous>, transform_indices = @transform_2, window_bounds = array<i64: 1, 128>}, {transform_indices = @transform_3, window_bounds = array<i64: 8, 128>}]} {
    %c0_i32 = arith.constant 0 : i32
    %0 = arith.cmpi eq, %arg1, %c0_i32 : i32
    %1 = arith.extui %0 : i1 to i32
    %c0_i32_0 = arith.constant 0 : i32
    %2 = arith.cmpi ne, %1, %c0_i32_0 : i32
    scf.if %2 {
      %cst_10 = arith.constant 0.000000e+00 : f32
      %12 = vector.broadcast %cst_10 : f32 to vector<8x128xf32>
      %c0_11 = arith.constant 0 : index
      %c0_12 = arith.constant 0 : index
      %13 = vector.load %arg5[%c0_11, %c0_12] : memref<8x128xf32, #tpu.memory_space<vmem>>, vector<8x128xf32>
      tpu.vector_store %arg5[%c0_11, %c0_12], %12 {strides = array<i32>} : memref<8x128xf32, #tpu.memory_space<vmem>>, vector<8x128xf32>,
    } else {
    }
    %c0 = arith.constant 0 : index
    %c0_1 = arith.constant 0 : index
    %3 = vector.load %arg5[%c0, %c0_1] : memref<8x128xf32, #tpu.memory_space<vmem>>, vector<8x128xf32>
    %c0_2 = arith.constant 0 : index
    %c0_3 = arith.constant 0 : index
    %4 = vector.load %arg2[%c0_2, %c0_3] : memref<8x8192xf32, #tpu.memory_space<vmem>>, vector<8x8192xf32>
    %c0_4 = arith.constant 0 : index
    %c0_5 = arith.constant 0 : index
    %5 = vector.load %arg3[%c0_4, %c0_5] : memref<8192x128xf32, #tpu.memory_space<vmem>>, vector<8192x128xf32>
    %cst = arith.constant dense<0.000000e+00> : vector<8x128xf32>
    %6 = tpu.matmul %4, %5, %cst {dimension_numbers = #tpu.dot_dimension_numbers<[1], [0], [0], [1], [0, 0, 1, 1], [], []>} : vector<8x8192xf32>, vector<8192x128xf32>, vector<8x128xf32> -> vector<8x128xf32>
    %7 = arith.addf %3, %6 : vector<8x128xf32>
    %c0_6 = arith.constant 0 : index
    %c0_7 = arith.constant 0 : index
    %8 = vector.load %arg5[%c0_6, %c0_7] : memref<8x128xf32, #tpu.memory_space<vmem>>, vector<8x128xf32>
    tpu.vector_store %arg5[%c0_6, %c0_7], %7 {strides = array<i32>} : memref<8x128xf32, #tpu.memory_space<vmem>>, vector<8x128xf32>,
    %c0_i32_8 = arith.constant 0 : i32
    %9 = arith.cmpi eq, %arg1, %c0_i32_8 : i32
    %10 = arith.extui %9 : i1 to i32
    %c0_i32_9 = arith.constant 0 : i32
    %11 = arith.cmpi ne, %10, %c0_i32_9 : i32
    scf.if %11 {
      %c0_10 = arith.constant 0 : index
      %c0_11 = arith.constant 0 : index
      %12 = vector.load %arg5[%c0_10, %c0_11] : memref<8x128xf32, #tpu.memory_space<vmem>>, vector<8x128xf32>
      %c0_12 = arith.constant 0 : index
      %c0_13 = arith.constant 0 : index
      %13 = vector.load %arg4[%c0_12, %c0_13] : memref<1x128xf32, #tpu.memory_space<vmem>>, vector<1x128xf32>
      %14 = vector.broadcast %13 : vector<1x128xf32> to vector<8x128xf32>
      %15 = arith.addf %12, %14 : vector<8x128xf32>
      %16 = tpu.iota {dimensions = array<i32: 1>} : vector<8x128xi32>
      %c3_i32 = arith.constant 3 : i32
      %17 = vector.broadcast %c3_i32 : i32 to vector<8x128xi32>
      %18 = arith.cmpi slt, %16, %17 : vector<8x128xi32>
      %cst_14 = arith.constant 2.000000e+01 : f32
      %19 = vector.broadcast %cst_14 : f32 to vector<8x128xf32>
      %20 = arith.cmpf ogt, %15, %19 : vector<8x128xf32>
      %cst_15 = arith.constant 2.000000e+01 : f32
      %21 = vector.broadcast %cst_15 : f32 to vector<8x128xf32>
      %22 = arith.minimumf %15, %21 : vector<8x128xf32>
      %23 = math.exp %22 : vector<8x128xf32>
      %24 = math.log1p %23 : vector<8x128xf32>
      %25 = arith.select %20, %15, %24 : vector<8x128xi1>, vector<8x128xf32>
      %26 = arith.select %18, %25, %15 : vector<8x128xi1>, vector<8x128xf32>
      %c0_16 = arith.constant 0 : index
      %c0_17 = arith.constant 0 : index
      %27 = vector.load %arg5[%c0_16, %c0_17] : memref<8x128xf32, #tpu.memory_space<vmem>>, vector<8x128xf32>
      tpu.vector_store %arg5[%c0_16, %c0_17], %26 {strides = array<i32>} : memref<8x128xf32, #tpu.memory_space<vmem>>, vector<8x128xf32>,
    } else {
    }
    return
  }
  func.func @transform_0(%arg0: i32, %arg1: i32) -> (i32, i32) {
    %c0_i32 = arith.constant 0 : i32
    return %arg0, %arg1 : i32, i32
  }
  func.func @transform_1(%arg0: i32, %arg1: i32) -> (i32, i32) {
    %c0_i32 = arith.constant 0 : i32
    %c0_i32_0 = arith.constant 0 : i32
    return %arg1, %c0_i32 : i32, i32
  }
  func.func @transform_2(%arg0: i32, %arg1: i32) -> (i32, i32) {
    %c0_i32 = arith.constant 0 : i32
    %c0_i32_0 = arith.constant 0 : i32
    %c0_i32_1 = arith.constant 0 : i32
    return %c0_i32, %c0_i32_0 : i32, i32
  }
  func.func @transform_3(%arg0: i32, %arg1: i32) -> (i32, i32) {
    %c0_i32 = arith.constant 0 : i32
    %c0_i32_0 = arith.constant 0 : i32
    return %arg0, %c0_i32 : i32, i32
  }
}

</mosaic_0001>

<bundles_post_ra>
// kernel: custom-call.6
= control target key start
LH: loop header
LB: loop body
LE: loop exit
PB: predicated region body
PF: predicated region fallthrough
CT: control target
= control target key end

     0   :  { %s734_s9 = smov 0   ;;  %s736_s10 = smov 0   ;;  %s909_s0 = inlined_call_operand.vmem [shape: f32[2,3,3], index: 0, kind: input, shape index: {}]   ;;  %s910_s1 = inlined_call_operand.vmem [shape: f32[2,3,3], index: 1, kind: output, shape index: {0}]   ;;  %s911_s2 = inlined_call_operand.vmem [shape: f32[2,3], index: 2, kind: output, shape index: {1}]  }
   0x1   :  { %s738_s11 = smov 0   ;;  %s740_s12 = smov 0  }
   0x2   :  { %s742_s13 = smov 0  }
   0x3 LB: > { %s28_s14 = sadd.s32 1, %s707_s12  ;;  %s589_s15 = sadd.s32 4294967295, %s711_s13   ;;  %s711_s13 = sphi %s742_s13, %s9_s13   ;;  %s707_s12 = sphi %s740_s12, %s920_s12   ;;  %s703_s11 = sphi %s738_s11, %s919_s11   ;;  %s699_s10 = sphi %s736_s10, %s918_s10   ;;  %s695_s9 = sphi %s734_s9, %s917_s9  }
   0x4   : > { %p30_p0 = scmp.ge.s32.totalorder %s28_s14, 2  ;;  %s33_s16 = ssub.s32 0, %s707_s12 }
   0x5   : > { %s591_s17 = smin.u32 %s707_s12, %s33_s16  ;;  %p57_p1 = scmp.ne.s32.totalorder %s699_s10, %s695_s9 }
   0x6   : > { %s922_s14 = smov (%p30_p0, %s28_s14), 0  ;;  %s35_s18 = sshrl.u32 %s591_s17, 3 }
   0x7   : > { %s39_s19 = ssub.s32 0, %s922_s14  ;;  %p58_p2 = scmp.eq.s32.totalorder %s589_s15, 1 }
   0x8   : > { %s592_s20 = smin.u32 %s39_s19, %s922_s14  ;;  %s47_s24 = sadd.s32 1, %s699_s10 }
   0x9   : > { %s41_s21 = sshrl.u32 %s592_s20, 3  ;;  %p769_p3 = por %p58_p2, %p57_p1 }
   0xa   : > { %s44_s23 = ssub.s32 %s35_s18, %s41_s21  ;;  %p594_p5 = scmp.ge.s32.totalorder %s711_s13, 2 }
   0xb   : > { %p45_p4 = scmp.eq.s32.totalorder %s44_s23, 0  ;;  %s82_s26 = sand.u32 (!%p594_p5), 1, %s711_s13  }
   0xc   : > { %80 = sbr.rel (%p594_p5) target bundleno = 19 (0x13), region = 16  ;;  %s596_s27 = sshll.u32 (!%p594_p5), %s707_s12, 2 }
   0xd   : > { %s775_s25 = scalar_select %p45_p4, %s699_s10, %s47_s24  }
   0xe   : > { %s595_s28 = sshll.u32 (!%p594_p5), %s82_s26, 2  ;;  %s88_s3 = scalar_lea.vmem (!%p594_p5), %s909_s0, %s596_s27 }
   0xf   : > { %s84_s4 = scalar_lea.vmem (!%p594_p5), [#allocation1], %s595_s28 }
  0x11   : > { %v105_v0 = vld [vmem:[%s88_s3] sm:$0xf] }
  0x12   : > { %106 = vst [vmem:[%s84_s4] sm:$0xf] %v105_v0 }
  0x13 PF: > { %p597_p6 = scmp.ge.s32.totalorder %s711_s13, 1  ;;  %p123_p7 = scmp.lt.s32.totalorder %s711_s13, 3 }
  0x15   : > { %p124_p8 = pnand %p597_p6, %p123_p7 }
  0x17   : > { %127 = sbr.rel (%p124_p8) target bundleno = 342 (0x156), region = 50 }
  0x1c   : > { %s134_s5 = sand.u32 1, %s589_s15   ;;  %s144_s6 = sand.u32 1, %s695_s9   ;;  %v717_v2 = vmov 0.0  }
  0x1d   : > { %s598_s7 = sshll.u32 %s134_s5, 2  ;;  %s786_s8 = sshll.u32 %s144_s6, 1 }
  0x1e   : > { %s136_s16 = scalar_lea.vmem [#allocation1], %s598_s7  ;;  %s157_s17 = sand.u32 7, %s703_s11  }
  0x1f   : > { %v149_v1 = vld [vmem:[%s136_s16] sm:$0xf]  ;;  %s789_s18 = scalar_lea.vmem [#allocation4], %s157_s17  ;;  %s792_s19 = scalar_lea.vmem [#allocation3], %s598_s7 }
  0x20   : > { %150 = vst [vmem:[#allocation0] sm:$0xf] %v149_v1  ;;  %s146_s15 = scalar_lea.vmem [#allocation5], %s786_s8  ;;  %s795_s20 = smov 0  }
  0x21   : > { %161 = vst [vmem:[%s789_s18] sm:$0x1] %v717_v2 }
  0x27   : > { %v159_v3 = vld [vmem:[#allocation0] sm:$0xff] }
  0x28   : > { %160 = vst [vmem:[#allocation2] sm:$0xff] %v159_v3 }
  0x29 LB: >> { %v169_v4 = vlaneseq  ;;  %v804_v6 = vstv %s715_s20  ;;  %s201_s9 = scalar_lea.vmem [#allocation2], %s715_s20  ;;  %s294_s21 = smov [#allocation2]  ;;  %s715_s20 = sphi %s795_s20, %s167_s20  }
  0x2a   : >> { %s329_s23 = scalar_lea.vmem [#allocation6], %s715_s20  ;;  %s345_s24 = smov [#allocation2] }
  0x2b   : >> { %v801_v5 = vshrl.u32 %v169_v4, 7  ;;  %s346_s26 = smov [#allocation6] }
  0x2d   : >> { %vm173_vm0 = vcmp.gt.s32.totalorder %v801_v5, %v804_v6  ;;  %vm174_vm1 = vcmp.lt.s32.totalorder %v801_v5, 3  ;;  %v297_v5 = vmov %v801_v5 }
  0x2e   : >> { %vm175_vm2 = vmand %vm173_vm0, %vm174_vm1  ;;  %vm301_vm13 = vcmp.gt.s32.totalorder %v297_v5, %v804_v6  ;;  %vm302_vm14 = vcmp.lt.s32.totalorder %v297_v5, 3  ;;  %v349_v5 = vmov %v801_v5 }
  0x2f   : >> { %v168_v7 = vld [vmem:[#allocation2] sm:$0xff]  ;;  %v814_v20 = vld [vmem:[%s201_s9] ss:$0 sm:$0xff] }
  0x30   : >> { %v176_v8 = vsel %vm175_vm2, %v168_v7, 0.0  ;;  %v203_v23 = vand.u32 2147483647, %v814_v20  ;;  %vm272_vm12 = vcmp.lt.f32.partialorder %v814_v20, 0.0 }
  0x31   : >> { %v177_v9 = vmul.f32 %v176_v8, %v176_v8 }
  0x32   : >> { %v204_v27 = vmax.f32 %v203_v23, 0.0 }
  0x33   : >> { %v178_v10 = vrot.slane %v177_v9, 4 }
  0x35   : >> { %v179_v11 = vadd.f32 %v178_v10, %v177_v9 }
  0x37   : >> { %v180_v12 = vrot.slane %v179_v11, 2 }
  0x39   : >> { %v181_v13 = vadd.f32 %v180_v12, %v179_v11 }
  0x3b   : >> { %v182_v14 = vrot.slane %v181_v13, 1 }
  0x3d   : >> { %v809_v15 = vadd.f32 %v182_v14, %v181_v13 }
  0x3f   : >> { %659 = vrsqrt.f32 %v809_v15  ;;  %vm191_vm3 = vcmp.eq.f32.partialorder %v809_v15, inf  ;;  %v194_v24 = vand.u32 2147483648, %v809_v15  ;;  %vm193_vm4 = vcmp.eq.f32.partialorder %v809_v15, 0.0 }
  0x45   : >> { %v660_v16 = vpop.eup %659 }
  0x46   : >> { %v185_v17 = vmul.f32 %v660_v16, %v809_v15 }
  0x48   : >> { %v186_v18 = vmul.f32 %v660_v16, %v185_v17 }
  0x4a   : >> { %v187_v19 = vmul.f32 0.5, %v186_v18  ;;  %v298_v18 = vld [vmem:[%s294_s21] sm:$0xff] }
  0x4c   : >> { %v188_v21 = vsub.f32 1.5, %v187_v19 }
  0x4e   : >> { %v189_v22 = vmul.f32 %v660_v16, %v188_v21 }
  0x50   : >> { %v190_v25 = vmul.f32 %v189_v22, %v809_v15  ;;  %v323_v22 = vand.u32 127, %v169_v4 }
  0x52   : >> { %v192_v26 = vsel %vm191_vm3, %v809_v15, %v190_v25 }
  0x53   : >> { %v195_v28 = vsel %vm193_vm4, %v194_v24, %v192_v26 }
  0x54   : >> { %v205_v29 = vand.u32 2147483647, %v195_v28 }
  0x56   : >> { %v206_v30 = vmax.f32 %v204_v27, %v205_v29 }
  0x58   : >> { %661 = vrcp.f32 %v206_v30  ;;  %v218_v33 = vand.u32 2147483648, %v206_v30  ;;  %vm212_vm5 = vweird.f32 %v206_v30  ;;  %v216_v35 = vand.u32 2147483647, %v206_v30 }
  0x59   : >> { %vm257_vm11 = vcmp.eq.f32.partialorder %v206_v30, 0.0 }
  0x5a   : >> { %v219_v37 = vor.u32 1.1754944e-38, %v218_v33  ;;  %vm217_vm8 = vcmp.eq.f32.partialorder %v216_v35, 8.507059e+37 }
  0x5e   : >> { %v662_v31 = vpop.eup %661 }
  0x5f   : >> { %v208_v32 = vmul.f32 %v662_v31, %v206_v30  ;;  %vm213_vm6 = vweird.f32 %v662_v31 }
  0x60   : >> { %vm214_vm7 = vmor %vm212_vm5, %vm213_vm6 }
  0x61   : >> { %v209_v34 = vsub.f32 1.0, %v208_v32  ;;  %vm303_vm5 = vmand %vm301_vm13, %vm302_vm14 }
  0x62   : >> { %v304_v26 = vsel %vm303_vm5, %v298_v18, 0.0 }
  0x63   : >> { %v210_v36 = vmul.f32 %v662_v31, %v209_v34 }
  0x65   : >> { %v211_v38 = vadd.f32 %v662_v31, %v210_v36 }
  0x67   : >> { %v215_v39 = vsel %vm214_vm7, %v662_v31, %v211_v38  ;;  %v342_v38 = vld [vmem:[%s789_s18] ss:$0 sm:$0xff] }
  0x68   : >> { %v220_v40 = vsel %vm217_vm8, %v219_v37, %v215_v39  ;;  %v718_v37 = vmov 1.0   ;;  %v352_v39 = vld [vmem:[%s345_s24] sm:$0xff]  ;;  %s362_s24 = smov %s345_s24 }
  0x69   : >> { %v221_v41 = vmul.f32 %v220_v40, %v203_v23  ;;  %v237_v42 = vmul.f32 0.0, %v220_v40  ;;  %v254_v43 = vmul.f32 %v220_v40, %v205_v29  ;;  %s387_s27 = scalar_lea.vmem %s362_s24, %s715_s20  ;;  %s167_s20 = sadd.s32 1, %s715_s20  }
  0x6a   : >> { %p164_p9 = scmp.ge.s32.totalorder %s167_s20, 3  }
  0x6b   : >> { %v222_v44 = vmul.f32 %v221_v41, %v221_v41  ;;  %v238_v45 = vmul.f32 %v237_v42, %v237_v42  ;;  %v255_v46 = vmul.f32 %v254_v43, %v254_v43  ;;  %s604_s28 = sshll.u32 (%p164_p9), %s703_s11, 2 }
  0x6c   : > { %s418_s3 = scalar_lea.vmem (%p164_p9), %s910_s1, %s604_s28 }
  0x6d   : >> { %v239_v47 = vadd.f32 %v238_v45, %v222_v44 }
  0x6f   : >> { %v256_v48 = vadd.f32 %v255_v46, %v239_v47 }
  0x71   : >> { %663 = vrsqrt.f32 %v256_v48  ;;  %vm265_vm9 = vcmp.eq.f32.partialorder %v256_v48, inf  ;;  %v268_v55 = vand.u32 2147483648, %v256_v48  ;;  %vm267_vm10 = vcmp.eq.f32.partialorder %v256_v48, 0.0 }
  0x77   : >> { %v664_v49 = vpop.eup %663 }
  0x78   : >> { %v259_v50 = vmul.f32 %v664_v49, %v256_v48 }
  0x7a   : >> { %v260_v51 = vmul.f32 %v664_v49, %v259_v50 }
  0x7c   : >> { %v261_v52 = vmul.f32 0.5, %v260_v51 }
  0x7e   : >> { %v262_v53 = vsub.f32 1.5, %v261_v52  ;;  %v373_v52 = vld [vmem:[%s362_s24] sm:$0xff] }
  0x80   : >> { %v263_v54 = vmul.f32 %v664_v49, %v262_v53 }
  0x82   : >> { %v264_v56 = vmul.f32 %v263_v54, %v256_v48 }
  0x84   : >> { %v266_v57 = vsel %vm265_vm9, %v256_v48, %v264_v56  ;;  %vm846_vm9 = vcmp.eq.s32.totalorder %v323_v22, %v804_v6 }
  0x85   : >> { %v269_v58 = vsel %vm267_vm10, %v268_v55, %v266_v57  ;;  %vm354_vm10 = vcmp.lt.s32.totalorder %v349_v5, 3  ;;  %v366_v5 = vmov %v801_v5 }
  0x86   : >> { %v270_v59 = vmul.f32 %v269_v58, %v206_v30 }
  0x88   : >> { %v271_v60 = vsel %vm257_vm11, 0.0, %v270_v59  ;;  %vm375_vm11 = vcmp.gt.s32.totalorder %v323_v22, %v804_v6 }
  0x89   : >> { %v273_v61 = vxor.u32 2147483648, %v271_v60 }
  0x8b   : >> { %v274_v62 = vsel %vm272_vm12, %v271_v60, %v273_v61 }
  0x8c   : >> { %v828_v63 = vsel %vm193_vm4, %v814_v20, %v274_v62  ;;  %665 = vrcp.f32 %v274_v62  ;;  %vm281_vm15 = vweird.f32 %v274_v62  ;;  %v285_v11 = vand.u32 2147483647, %v274_v62 }
  0x8d   : >> { %v293_v0 = vsub.f32 %v814_v20, %v828_v63  ;;  %v287_v12 = vand.u32 2147483648, %v274_v62  ;;  %v275_v28 = vsub.f32 %v274_v62, %v814_v20 }
  0x8e   : >> { %vm286_vm8 = vcmp.eq.f32.partialorder %v285_v11, 8.507059e+37 }
  0x8f   : >> { %667 = vrcp.f32 %v293_v0  ;;  %v316_v9 = vand.u32 2147483648, %v293_v0  ;;  %vm310_vm1 = vweird.f32 %v293_v0  ;;  %v314_v14 = vand.u32 2147483647, %v293_v0 }
  0x90   : >> { %v288_v23 = vor.u32 1.1754944e-38, %v287_v12 }
  0x91   : >> { %v317_v21 = vor.u32 1.1754944e-38, %v316_v9  ;;  %vm315_vm7 = vcmp.eq.f32.partialorder %v314_v14, 8.507059e+37 }
  0x92   : >> { %v666_v1 = vpop.eup %665 }
  0x93   : >> { %v277_v2 = vmul.f32 %v666_v1, %v274_v62  ;;  %vm282_vm0 = vweird.f32 %v666_v1 }
  0x94   : >> { %vm834_vm3 = vmor %vm281_vm15, %vm282_vm0 }
  0x95   : >> { %v668_v3 = vpop.eup %667  ;;  %v278_v7 = vsub.f32 1.0, %v277_v2 }
  0x96   : >> { %v306_v8 = vmul.f32 %v668_v3, %v293_v0  ;;  %vm311_vm2 = vweird.f32 %v668_v3 }
  0x97   : >> { %v279_v10 = vmul.f32 %v666_v1, %v278_v7  ;;  %vm312_vm6 = vmor %vm310_vm1, %vm311_vm2 }
  0x98   : >> { %v307_v13 = vsub.f32 1.0, %v306_v8 }
  0x99   : >> { %v280_v16 = vadd.f32 %v666_v1, %v279_v10 }
  0x9a   : >> { %v308_v19 = vmul.f32 %v668_v3, %v307_v13 }
  0x9b   : >> { %v284_v25 = vsel %vm834_vm3, %v666_v1, %v280_v16 }
  0x9c   : >> { %v309_v24 = vadd.f32 %v668_v3, %v308_v19  ;;  %v289_v30 = vsel %vm286_vm8, %v288_v23, %v284_v25 }
  0x9d   : >> { %v290_v33 = vmul.f32 %v289_v30, %v275_v28 }
  0x9e   : >> { %v313_v27 = vsel %vm312_vm6, %v668_v3, %v309_v24 }
  0x9f   : >> { %v318_v29 = vsel %vm315_vm7, %v317_v21, %v313_v27  ;;  %v292_v20 = vsel %vm193_vm4, 0.0, %v290_v33 }
  0xa0   : >> { %v319_v31 = vmul.f32 %v318_v29, %v304_v26  ;;  %v335_v35 = vsel %vm846_vm9, %v292_v20, 0.0 }
  0xa2   : >> { %v320_v4 = vsel %vm193_vm4, 0.0, %v319_v31  ;;  %vm383_vm4 = vcmp.ge.s32.totalorder %v366_v5, %v804_v6 }
  0xa3   : >> { %v325_v34 = vsel %vm846_vm9, %v320_v4, 0.0  ;;  %vm384_vm12 = vmand %vm846_vm9, %vm383_vm4 }
  0xa4   : >> { %326 = vadd.xlane.f32.xlu0 %v325_v34 }
  0xac   : >> { %336 = vadd.xlane.f32.xlu0 %v335_v35 }
 0x117   : >> { %v327_v36 = vpop.xlane.xlu0 %326 }
 0x118   : >> { %328 = vst [vmem:[#allocation6] sm:$0xff] %v327_v36 }
 0x119   : >> { %330 = vst [vmem:[%s329_s23] sm:$0x1] %v718_v37 }
 0x11f   : >> { %v337_v40 = vpop.xlane.xlu0 %336 }
 0x120   : >> { %v351_v41 = vld [vmem:[%s346_s26] sm:$0xff]  ;;  %v343_v15 = vsel %vm846_vm9, %v337_v40, %v342_v38  ;;  %s363_s26 = smov %s346_s26 }
 0x121   : >> { %v353_v42 = vmul.f32 %v352_v39, %v351_v41  ;;  %344 = vst [vmem:[%s789_s18] sm:$0x1] %v343_v15  ;;  %v371_v51 = vld [vmem:[%s363_s26] sm:$0xff] }
 0x123   : >> { %v355_v43 = vsel %vm354_vm10, %v353_v42, 0.0 }
 0x124   : >> { %v356_v44 = vrot.slane %v355_v43, 4 }
 0x126   : >> { %v357_v45 = vadd.f32 %v356_v44, %v355_v43 }
 0x128   : >> { %v358_v46 = vrot.slane %v357_v45, 2  ;;  %v403_v6 = vld [vmem:[#allocation4] sm:$0x3] (%p164_p9) }
 0x129   : > { %406 = vst [vmem:[%s146_s15] sm:$0x3] (%p164_p9), %v403_v6 }
 0x12a   : >> { %v359_v47 = vadd.f32 %v358_v46, %v357_v45 }
 0x12c   : >> { %v360_v48 = vrot.slane %v359_v47, 1 }
 0x12e   : >> { %v361_v49 = vadd.f32 %v360_v48, %v359_v47 }
 0x130   : >> { %v367_v50 = vmul.f32 %v361_v49, %v337_v40 }
 0x132   : >> { %v372_v53 = vmul.f32 %v371_v51, %v367_v50 }
 0x134   : >> { %v376_v54 = vsub.f32 %v373_v52, %v372_v53 }
 0x136   : >> { %v377_v55 = vsel %vm375_vm11, %v376_v54, %v373_v52 }
 0x137   : >> { %v385_v56 = vsel %vm384_vm12, %v371_v51, %v377_v55 }
 0x138   : >> { %386 = vst [vmem:[%s362_s24] sm:$0xff] %v385_v56 }
 0x13d   : > { %166 = sbr.rel (!%p164_p9) target bundleno = 41 (0x29), region = 167 }
 0x13f   : >> { %v388_v57 = vld [vmem:[%s387_s27] ss:$0 sm:$0xff] }
 0x140   : >> { %v393_v58 = vsel %vm846_vm9, %v828_v63, %v388_v57 }
 0x141   : >> { %394 = vst [vmem:[%s387_s27] sm:$0x1] %v393_v58 }
 0x142   : > { %p455_p10 = scmp.lt.s32.totalorder (%p769_p3), %s703_s11, 0  ;;  %s456_s4 = ssub.s32 (%p769_p3), 0, %s703_s11  ;;  %v479_v60 = vld [vmem:[%s146_s15] sm:$0x3] (%p769_p3) }
 0x143   : > { %s605_s5 = smin.u32 (%p769_p3), %s703_s11, %s456_s4 }
 0x144   : > { %s458_s6 = sshrl.u32 (%p769_p3), %s605_s5, 3 }
 0x145   : > { %s459_s7 = ssub.s32 (%p769_p3), 0, %s458_s6 }
 0x148   : > { %v397_v5 = vld [vmem:[#allocation2] sm:$0xf] }
 0x149   : > { %400 = vst [vmem:[%s792_s19] sm:$0xf] %v397_v5 }
 0x14d   : > { %454 = sbr.rel (!%p769_p3) target bundleno = 342 (0x156), region = 91 }
 0x150   : > { %v435_v59 = vld [vmem:[%s792_s19] sm:$0xf] }
 0x151   : > { %436 = vst [vmem:[%s418_s3] sm:$0xf] %v435_v59 }
 0x152   : > { %s924_s7 = smov (!%p455_p10, %s459_s7), %s458_s6 }
 0x153   : > { %s606_s16 = sshll.u32 %s924_s7, 1 }
 0x154   : > { %s462_s19 = scalar_lea.vmem %s911_s2, %s606_s16 }
 0x155   : > { %480 = vst [vmem:[%s462_s19] sm:$0x3] %v479_v60 }
 0x156 PF: > { %s9_s13 = sadd.s32 1, %s711_s13   ;;  %s917_s9 = smov %s699_s10 }
 0x157   : > { %p6_p11 = scmp.ge.s32.totalorder %s9_s13, 4   ;;  %s918_s10 = smov %s775_s25 }
 0x158   : > { %s919_s11 = smov %s707_s12  ;;  %s920_s12 = smov %s922_s14 }
 0x159   :  { %8 = sbr.rel (!%p6_p11) target bundleno = 3 (0x3), region = 178 }

// kernel: custom-call.8
= control target key start
LH: loop header
LB: loop body
LE: loop exit
PB: predicated region body
PF: predicated region fallthrough
CT: control target
= control target key end

     0   :  { %s240_s6 = smov 0   ;;  %s267_s0 = inlined_call_operand.vmem [shape: f32[2,3,3], index: 0, kind: input, shape index: {}]   ;;  %s268_s1 = inlined_call_operand.vmem [shape: f32[2,3,3], index: 1, kind: output, shape index: {}]  }
   0x1 LB: > { %s202_s7 = sadd.s32 4294967295, %s228_s6   ;;  %p204_p0 = scmp.ge.s32.totalorder %s228_s6, 2  ;;  %s228_s6 = sphi %s240_s6, %s7_s6  }
   0x2   : > { %s23_s8 = sand.u32 (!%p204_p0), 1, %s228_s6   ;;  %s206_s9 = sshll.u32 (!%p204_p0), %s228_s6, 2 }
   0x3   : > { %21 = sbr.rel (%p204_p0) target bundleno = 10 (0xa), region = 16  ;;  %s205_s10 = sshll.u32 (!%p204_p0), %s23_s8, 2 }
   0x4   : > { %s27_s13 = scalar_lea.vmem (!%p204_p0), %s267_s0, %s206_s9  ;;  %s25_s14 = scalar_lea.vmem (!%p204_p0), [#allocation1], %s205_s10 }
   0x8   : > { %v44_v0 = vld [vmem:[%s27_s13] sm:$0xf] }
   0x9   : > { %45 = vst [vmem:[%s25_s14] sm:$0xf] %v44_v0 }
   0xa PF: > { %p207_p1 = scmp.ge.s32.totalorder %s228_s6, 1  ;;  %p62_p2 = scmp.lt.s32.totalorder %s228_s6, 3 }
   0xc   : > { %p63_p3 = pnand %p207_p1, %p62_p2 }
   0xd   : > { %s256_s15 = sand.u32 (!%p63_p3), 1, %s202_s7   ;;  %s211_s19 = sshll.u32 (!%p63_p3), %s202_s7, 2 }
   0xe   : > { %66 = sbr.rel (%p63_p3) target bundleno = 285 (0x11d), region = 50  ;;  %s208_s16 = sshll.u32 (!%p63_p3), %s256_s15, 2 }
   0xf   : > { %s75_s17 = scalar_lea.vmem (!%p63_p3), [#allocation1], %s208_s16  ;;  %s79_s18 = scalar_lea.vmem (!%p63_p3), [#allocation3], %s208_s16 }
  0x10   : > { %s130_s22 = scalar_lea.vmem (!%p63_p3), %s268_s1, %s211_s19 }
  0x13   : > { %v84_v1 = vlaneseq  ;;  %v82_v2 = vld [vmem:[%s75_s17] sm:$0xf]  ;;  %vm98_vm1 = vcmask 23552  }
  0x14   : > { %83 = vst [vmem:[#allocation0] sm:$0xf] %v82_v2 }
  0x15   : > { %v85_v3 = vand.u32 127, %v84_v1  ;;  %v87_v4 = vshrl.u32 %v84_v1, 7 }
  0x17   : > { %vm93_vm0 = vcmp.eq.s32.totalorder %v85_v3, 0  ;;  %vm89_vm2 = vcmp.eq.s32.totalorder %v85_v3, %v87_v4  ;;  %vm102_vm3 = vcmp.eq.s32.totalorder %v85_v3, 1  ;;  %vm113_vm4 = vcmp.eq.s32.totalorder %v85_v3, 2 }
  0x1b   : > { %v90_v5 = vld [vmem:[#allocation0] sm:$0xff] }
  0x1c   : > { %v97_v6 = vld [vmem:[#allocation0 + $0x1] ss:$0 sm:$0xff]  ;;  %v94_v7 = vsel %vm93_vm0, %v90_v5, 1.0  ;;  %v108_v11 = vld [vmem:[#allocation0 + $0x2] ss:$0 sm:$0xff] }
  0x1d   : > { %v99_v8 = vsel %vm98_vm1, %v97_v6, 0.0  ;;  %v95_v9 = vsel %vm89_vm2, %v94_v7, 0.0  ;;  %v110_v12 = vsel %vm98_vm1, %v108_v11, 0.0 }
  0x1e   : > { %v103_v10 = vmul.f32 %v99_v8, %v95_v9 }
  0x20   : > { %104 = vadd.xlane.f32.xlu0 %v103_v10 }
  0x93   : > { %v105_v13 = vpop.xlane.xlu0 %104 }
  0x94   : > { %v106_v14 = vsel %vm102_vm3, %v105_v13, %v95_v9 }
  0x95   : > { %v114_v15 = vmul.f32 %v110_v12, %v106_v14 }
  0x97   : > { %115 = vadd.xlane.f32.xlu0 %v114_v15 }
 0x10a   : > { %v116_v16 = vpop.xlane.xlu0 %115 }
 0x10b   : > { %v117_v17 = vsel %vm113_vm4, %v116_v16, %v106_v14 }
 0x10c   : > { %118 = vst [vmem:[#allocation2] sm:$0xff] %v117_v17 }
 0x113   : > { %v121_v18 = vld [vmem:[#allocation2] sm:$0xf] }
 0x114   : > { %124 = vst [vmem:[%s79_s18] sm:$0xf] %v121_v18 }
 0x11b   : > { %v147_v19 = vld [vmem:[%s79_s18] sm:$0xf] }
 0x11c   : > { %148 = vst [vmem:[%s130_s22] sm:$0xf] %v147_v19 }
 0x11d PF: > { %s7_s6 = sadd.s32 1, %s228_s6  }
 0x11e   : > { %p4_p4 = scmp.ge.s32.totalorder %s7_s6, 4  }
 0x120   :  { %6 = sbr.rel (!%p4_p4) target bundleno = 1 (0x1), region = 112 }

// kernel: full_cov_conv_predictor.1
= control target key start
LH: loop header
LB: loop body
LE: loop exit
PB: predicated region body
PF: predicated region fallthrough
CT: control target
= control target key end

     0   :  { %s5718_s1 = inlined_call_operand.vmem [shape: f32[8192,128], index: 1, kind: input, shape index: {}]   ;;  %s5719_s0 = inlined_call_operand.vmem [shape: f32[8,8192], index: 0, kind: input, shape index: {}]   ;;  %s5720_s2 = inlined_call_operand.vmem [shape: f32[1,128], index: 2, kind: input, shape index: {}]   ;;  %s5721_s3 = inlined_call_operand.vmem [shape: f32[8,128], index: 3, kind: output, shape index: {}]  }
   0x1   :  { %v99_v0 = vld [vmem:[%s5718_s1 + $0x78] sm:$0xff]  ;;  %v98_v2 = vld [vmem:[%s5718_s1 + $0x70] sm:$0xff]  ;;  %v97_v6 = vld [vmem:[%s5718_s1 + $0x68] sm:$0xff] }
   0x2   :  { %v131_v1 = vld [vmem:[%s5718_s1 + $0x178] sm:$0xff]  ;;  %1108 = vmatpush.msra.mxu0 %v99_v0  ;;  %v130_v4 = vld [vmem:[%s5718_s1 + $0x170] sm:$0xff]  ;;  %v129_v8 = vld [vmem:[%s5718_s1 + $0x168] sm:$0xff] }
   0x3   :  { %1148 = vmatpush.msra.mxu2 %v131_v1  ;;  %v115_v3 = vld [vmem:[%s5718_s1 + $0xf8] sm:$0xff]  ;;  %v114_v7 = vld [vmem:[%s5718_s1 + $0xf0] sm:$0xff]  ;;  %v113_v10 = vld [vmem:[%s5718_s1 + $0xe8] sm:$0xff] }
   0x4   :  { %v147_v5 = vld [vmem:[%s5718_s1 + $0x1f8] sm:$0xff]  ;;  %1128 = vmatpush.msra.mxu1 %v115_v3  ;;  %1109 = vmatpush.msra.mxu0 %v98_v2  ;;  %v146_v9 = vld [vmem:[%s5718_s1 + $0x1f0] sm:$0xff]  ;;  %v96_v11 = vld [vmem:[%s5718_s1 + $0x60] sm:$0xff] }
   0x5   :  { %1168 = vmatpush.msra.mxu3 %v147_v5  ;;  %1149 = vmatpush.msra.mxu2 %v130_v4  ;;  %v128_v12 = vld [vmem:[%s5718_s1 + $0x160] sm:$0xff]  ;;  %v145_v13 = vld [vmem:[%s5718_s1 + $0x1e8] sm:$0xff]  ;;  %v95_v16 = vld [vmem:[%s5718_s1 + $0x58] sm:$0xff] }
   0x6   :  { %1129 = vmatpush.msra.mxu1 %v114_v7  ;;  %1110 = vmatpush.msra.mxu0 %v97_v6  ;;  %v112_v14 = vld [vmem:[%s5718_s1 + $0xe0] sm:$0xff]  ;;  %v127_v17 = vld [vmem:[%s5718_s1 + $0x158] sm:$0xff]  ;;  %v94_v20 = vld [vmem:[%s5718_s1 + $0x50] sm:$0xff] }
   0x7   :  { %1169 = vmatpush.msra.mxu3 %v146_v9  ;;  %1150 = vmatpush.msra.mxu2 %v129_v8  ;;  %v144_v15 = vld [vmem:[%s5718_s1 + $0x1e0] sm:$0xff]  ;;  %v111_v18 = vld [vmem:[%s5718_s1 + $0xd8] sm:$0xff]  ;;  %v126_v21 = vld [vmem:[%s5718_s1 + $0x150] sm:$0xff] }
   0x8   :  { %1130 = vmatpush.msra.mxu1 %v113_v10  ;;  %1111 = vmatpush.msra.mxu0 %v96_v11  ;;  %v143_v19 = vld [vmem:[%s5718_s1 + $0x1d8] sm:$0xff]  ;;  %v110_v22 = vld [vmem:[%s5718_s1 + $0xd0] sm:$0xff]  ;;  %v93_v24 = vld [vmem:[%s5718_s1 + $0x48] sm:$0xff] }
   0x9   :  { %1170 = vmatpush.msra.mxu3 %v145_v13  ;;  %1151 = vmatpush.msra.mxu2 %v128_v12  ;;  %v142_v23 = vld [vmem:[%s5718_s1 + $0x1d0] sm:$0xff]  ;;  %v125_v25 = vld [vmem:[%s5718_s1 + $0x148] sm:$0xff]  ;;  %v92_v28 = vld [vmem:[%s5718_s1 + $0x40] sm:$0xff] }
   0xa   :  { %1131 = vmatpush.msra.mxu1 %v112_v14  ;;  %1112 = vmatpush.msra.mxu0 %v95_v16  ;;  %v109_v26 = vld [vmem:[%s5718_s1 + $0xc8] sm:$0xff]  ;;  %v124_v29 = vld [vmem:[%s5718_s1 + $0x140] sm:$0xff]  ;;  %v91_v32 = vld [vmem:[%s5718_s1 + $0x38] sm:$0xff] }
   0xb   :  { %1171 = vmatpush.msra.mxu3 %v144_v15  ;;  %1152 = vmatpush.msra.mxu2 %v127_v17  ;;  %v141_v27 = vld [vmem:[%s5718_s1 + $0x1c8] sm:$0xff]  ;;  %v108_v30 = vld [vmem:[%s5718_s1 + $0xc0] sm:$0xff]  ;;  %v123_v33 = vld [vmem:[%s5718_s1 + $0x138] sm:$0xff] }
   0xc   :  { %1132 = vmatpush.msra.mxu1 %v111_v18  ;;  %1113 = vmatpush.msra.mxu0 %v94_v20  ;;  %v140_v31 = vld [vmem:[%s5718_s1 + $0x1c0] sm:$0xff]  ;;  %v107_v34 = vld [vmem:[%s5718_s1 + $0xb8] sm:$0xff]  ;;  %v90_v36 = vld [vmem:[%s5718_s1 + $0x30] sm:$0xff] }
   0xd   :  { %1172 = vmatpush.msra.mxu3 %v143_v19  ;;  %1153 = vmatpush.msra.mxu2 %v126_v21  ;;  %v139_v35 = vld [vmem:[%s5718_s1 + $0x1b8] sm:$0xff]  ;;  %v122_v37 = vld [vmem:[%s5718_s1 + $0x130] sm:$0xff]  ;;  %v89_v40 = vld [vmem:[%s5718_s1 + $0x28] sm:$0xff] }
   0xe   :  { %1133 = vmatpush.msra.mxu1 %v110_v22  ;;  %1114 = vmatpush.msra.mxu0 %v93_v24  ;;  %v106_v38 = vld [vmem:[%s5718_s1 + $0xb0] sm:$0xff]  ;;  %v121_v41 = vld [vmem:[%s5718_s1 + $0x128] sm:$0xff]  ;;  %v88_v44 = vld [vmem:[%s5718_s1 + $0x20] sm:$0xff] }
   0xf   :  { %1173 = vmatpush.msra.mxu3 %v142_v23  ;;  %1154 = vmatpush.msra.mxu2 %v125_v25  ;;  %v138_v39 = vld [vmem:[%s5718_s1 + $0x1b0] sm:$0xff]  ;;  %v105_v42 = vld [vmem:[%s5718_s1 + $0xa8] sm:$0xff]  ;;  %v120_v45 = vld [vmem:[%s5718_s1 + $0x120] sm:$0xff] }
  0x10   :  { %1134 = vmatpush.msra.mxu1 %v109_v26  ;;  %1115 = vmatpush.msra.mxu0 %v92_v28  ;;  %v137_v43 = vld [vmem:[%s5718_s1 + $0x1a8] sm:$0xff]  ;;  %v104_v46 = vld [vmem:[%s5718_s1 + $0xa0] sm:$0xff]  ;;  %v87_v48 = vld [vmem:[%s5718_s1 + $0x18] sm:$0xff] }
  0x11   :  { %1174 = vmatpush.msra.mxu3 %v141_v27  ;;  %1155 = vmatpush.msra.mxu2 %v124_v29  ;;  %v136_v47 = vld [vmem:[%s5718_s1 + $0x1a0] sm:$0xff]  ;;  %v119_v49 = vld [vmem:[%s5718_s1 + $0x118] sm:$0xff]  ;;  %v86_v52 = vld [vmem:[%s5718_s1 + $0x10] sm:$0xff] }
  0x12   :  { %1135 = vmatpush.msra.mxu1 %v108_v30  ;;  %1116 = vmatpush.msra.mxu0 %v91_v32  ;;  %v103_v50 = vld [vmem:[%s5718_s1 + $0x98] sm:$0xff]  ;;  %v118_v53 = vld [vmem:[%s5718_s1 + $0x110] sm:$0xff]  ;;  %v85_v56 = vld [vmem:[%s5718_s1 + $0x8] sm:$0xff] }
  0x13   :  { %1175 = vmatpush.msra.mxu3 %v140_v31  ;;  %1156 = vmatpush.msra.mxu2 %v123_v33  ;;  %v135_v51 = vld [vmem:[%s5718_s1 + $0x198] sm:$0xff]  ;;  %v102_v54 = vld [vmem:[%s5718_s1 + $0x90] sm:$0xff]  ;;  %v117_v57 = vld [vmem:[%s5718_s1 + $0x108] sm:$0xff] }
  0x14   :  { %1136 = vmatpush.msra.mxu1 %v107_v34  ;;  %1117 = vmatpush.msra.mxu0 %v90_v36  ;;  %v134_v55 = vld [vmem:[%s5718_s1 + $0x190] sm:$0xff]  ;;  %v101_v58 = vld [vmem:[%s5718_s1 + $0x88] sm:$0xff]  ;;  %v84_v60 = vld [vmem:[%s5718_s1] sm:$0xff] }
  0x15   :  { %1176 = vmatpush.msra.mxu3 %v139_v35  ;;  %1157 = vmatpush.msra.mxu2 %v122_v37  ;;  %v133_v59 = vld [vmem:[%s5718_s1 + $0x188] sm:$0xff]  ;;  %v116_v61 = vld [vmem:[%s5718_s1 + $0x100] sm:$0xff]  ;;  %v163_v62 = vld [vmem:[%s5718_s1 + $0x278] sm:$0xff] }
  0x16   :  { %1137 = vmatpush.msra.mxu1 %v106_v38  ;;  %1118 = vmatpush.msra.mxu0 %v89_v40  ;;  %v195_v63 = vld [vmem:[%s5718_s1 + $0x378] sm:$0xff]  ;;  %v100_v0 = vld [vmem:[%s5718_s1 + $0x80] sm:$0xff]  ;;  %v162_v2 = vld [vmem:[%s5718_s1 + $0x270] sm:$0xff] }
  0x17   :  { %1177 = vmatpush.msra.mxu3 %v138_v39  ;;  %1158 = vmatpush.msra.mxu2 %v121_v41  ;;  %v132_v1 = vld [vmem:[%s5718_s1 + $0x180] sm:$0xff]  ;;  %v179_v3 = vld [vmem:[%s5718_s1 + $0x2f8] sm:$0xff]  ;;  %v194_v4 = vld [vmem:[%s5718_s1 + $0x370] sm:$0xff] }
  0x18   :  { %1138 = vmatpush.msra.mxu1 %v105_v42  ;;  %1119 = vmatpush.msra.mxu0 %v88_v44  ;;  %v211_v5 = vld [vmem:[%s5718_s1 + $0x3f8] sm:$0xff]  ;;  %v161_v6 = vld [vmem:[%s5718_s1 + $0x268] sm:$0xff]  ;;  %v178_v7 = vld [vmem:[%s5718_s1 + $0x2f0] sm:$0xff] }
  0x19   :  { %1178 = vmatpush.msra.mxu3 %v137_v43  ;;  %1159 = vmatpush.msra.mxu2 %v120_v45  ;;  %v193_v8 = vld [vmem:[%s5718_s1 + $0x368] sm:$0xff]  ;;  %v210_v9 = vld [vmem:[%s5718_s1 + $0x3f0] sm:$0xff]  ;;  %v160_v10 = vld [vmem:[%s5718_s1 + $0x260] sm:$0xff] }
  0x1a   :  { %1139 = vmatpush.msra.mxu1 %v104_v46  ;;  %1120 = vmatpush.msra.mxu0 %v87_v48  ;;  %v177_v11 = vld [vmem:[%s5718_s1 + $0x2e8] sm:$0xff]  ;;  %v192_v12 = vld [vmem:[%s5718_s1 + $0x360] sm:$0xff]  ;;  %v159_v14 = vld [vmem:[%s5718_s1 + $0x258] sm:$0xff] }
  0x1b   :  { %1179 = vmatpush.msra.mxu3 %v136_v47  ;;  %1160 = vmatpush.msra.mxu2 %v119_v49  ;;  %v209_v13 = vld [vmem:[%s5718_s1 + $0x3e8] sm:$0xff]  ;;  %v176_v15 = vld [vmem:[%s5718_s1 + $0x2e0] sm:$0xff]  ;;  %v191_v16 = vld [vmem:[%s5718_s1 + $0x358] sm:$0xff] }
  0x1c   :  { %1140 = vmatpush.msra.mxu1 %v103_v50  ;;  %1121 = vmatpush.msra.mxu0 %v86_v52  ;;  %v208_v17 = vld [vmem:[%s5718_s1 + $0x3e0] sm:$0xff]  ;;  %v158_v18 = vld [vmem:[%s5718_s1 + $0x250] sm:$0xff]  ;;  %v175_v19 = vld [vmem:[%s5718_s1 + $0x2d8] sm:$0xff] }
  0x1d   :  { %1180 = vmatpush.msra.mxu3 %v135_v51  ;;  %1161 = vmatpush.msra.mxu2 %v118_v53  ;;  %v190_v20 = vld [vmem:[%s5718_s1 + $0x350] sm:$0xff]  ;;  %v207_v21 = vld [vmem:[%s5718_s1 + $0x3d8] sm:$0xff]  ;;  %v157_v22 = vld [vmem:[%s5718_s1 + $0x248] sm:$0xff] }
  0x1e   :  { %1141 = vmatpush.msra.mxu1 %v102_v54  ;;  %1122 = vmatpush.msra.mxu0 %v85_v56  ;;  %v174_v23 = vld [vmem:[%s5718_s1 + $0x2d0] sm:$0xff]  ;;  %v189_v24 = vld [vmem:[%s5718_s1 + $0x348] sm:$0xff]  ;;  %v156_v26 = vld [vmem:[%s5718_s1 + $0x240] sm:$0xff] }
  0x1f   :  { %1181 = vmatpush.msra.mxu3 %v134_v55  ;;  %1162 = vmatpush.msra.mxu2 %v117_v57  ;;  %v206_v25 = vld [vmem:[%s5718_s1 + $0x3d0] sm:$0xff]  ;;  %v173_v27 = vld [vmem:[%s5718_s1 + $0x2c8] sm:$0xff]  ;;  %v188_v28 = vld [vmem:[%s5718_s1 + $0x340] sm:$0xff] }
  0x20   :  { %1142 = vmatpush.msra.mxu1 %v101_v58  ;;  %1123 = vmatpush.msra.mxu0 %v84_v60  ;;  %v205_v29 = vld [vmem:[%s5718_s1 + $0x3c8] sm:$0xff]  ;;  %v155_v30 = vld [vmem:[%s5718_s1 + $0x238] sm:$0xff]  ;;  %v172_v31 = vld [vmem:[%s5718_s1 + $0x2c0] sm:$0xff] }
  0x21   :  { %1182 = vmatpush.msra.mxu3 %v133_v59  ;;  %1163 = vmatpush.msra.mxu2 %v116_v61  ;;  %v187_v32 = vld [vmem:[%s5718_s1 + $0x338] sm:$0xff]  ;;  %v204_v33 = vld [vmem:[%s5718_s1 + $0x3c0] sm:$0xff]  ;;  %v154_v34 = vld [vmem:[%s5718_s1 + $0x230] sm:$0xff] }
  0x22   :  { %1188 = vmatpush.msrb.mxu0 %v163_v62  ;;  %1143 = vmatpush.msra.mxu1 %v100_v0  ;;  %v171_v35 = vld [vmem:[%s5718_s1 + $0x2b8] sm:$0xff]  ;;  %v186_v36 = vld [vmem:[%s5718_s1 + $0x330] sm:$0xff]  ;;  %v153_v38 = vld [vmem:[%s5718_s1 + $0x228] sm:$0xff] }
  0x23   :  { %1228 = vmatpush.msrb.mxu2 %v195_v63  ;;  %1183 = vmatpush.msra.mxu3 %v132_v1  ;;  %v203_v37 = vld [vmem:[%s5718_s1 + $0x3b8] sm:$0xff]  ;;  %v170_v39 = vld [vmem:[%s5718_s1 + $0x2b0] sm:$0xff]  ;;  %v185_v40 = vld [vmem:[%s5718_s1 + $0x328] sm:$0xff] }
  0x24   :  { %1189 = vmatpush.msrb.mxu0 %v162_v2  ;;  %1208 = vmatpush.msrb.mxu1 %v179_v3  ;;  %v202_v41 = vld [vmem:[%s5718_s1 + $0x3b0] sm:$0xff]  ;;  %v152_v42 = vld [vmem:[%s5718_s1 + $0x220] sm:$0xff]  ;;  %v169_v43 = vld [vmem:[%s5718_s1 + $0x2a8] sm:$0xff] }
  0x25   :  { %1229 = vmatpush.msrb.mxu2 %v194_v4  ;;  %1248 = vmatpush.msrb.mxu3 %v211_v5  ;;  %v184_v44 = vld [vmem:[%s5718_s1 + $0x320] sm:$0xff]  ;;  %v201_v45 = vld [vmem:[%s5718_s1 + $0x3a8] sm:$0xff]  ;;  %v151_v46 = vld [vmem:[%s5718_s1 + $0x218] sm:$0xff] }
  0x26   :  { %1190 = vmatpush.msrb.mxu0 %v161_v6  ;;  %1209 = vmatpush.msrb.mxu1 %v178_v7  ;;  %v168_v47 = vld [vmem:[%s5718_s1 + $0x2a0] sm:$0xff]  ;;  %v183_v48 = vld [vmem:[%s5718_s1 + $0x318] sm:$0xff]  ;;  %v150_v50 = vld [vmem:[%s5718_s1 + $0x210] sm:$0xff] }
  0x27   :  { %1230 = vmatpush.msrb.mxu2 %v193_v8  ;;  %1249 = vmatpush.msrb.mxu3 %v210_v9  ;;  %v200_v49 = vld [vmem:[%s5718_s1 + $0x3a0] sm:$0xff]  ;;  %v167_v51 = vld [vmem:[%s5718_s1 + $0x298] sm:$0xff]  ;;  %v182_v52 = vld [vmem:[%s5718_s1 + $0x310] sm:$0xff] }
  0x28   :  { %1191 = vmatpush.msrb.mxu0 %v160_v10  ;;  %1210 = vmatpush.msrb.mxu1 %v177_v11  ;;  %v199_v53 = vld [vmem:[%s5718_s1 + $0x398] sm:$0xff]  ;;  %v149_v54 = vld [vmem:[%s5718_s1 + $0x208] sm:$0xff]  ;;  %v166_v55 = vld [vmem:[%s5718_s1 + $0x290] sm:$0xff] }
  0x29   :  { %1231 = vmatpush.msrb.mxu2 %v192_v12  ;;  %1250 = vmatpush.msrb.mxu3 %v209_v13  ;;  %v181_v56 = vld [vmem:[%s5718_s1 + $0x308] sm:$0xff]  ;;  %v198_v57 = vld [vmem:[%s5718_s1 + $0x390] sm:$0xff]  ;;  %v148_v59 = vld [vmem:[%s5718_s1 + $0x200] sm:$0xff] }
  0x2a   :  { %1192 = vmatpush.msrb.mxu0 %v159_v14  ;;  %1211 = vmatpush.msrb.mxu1 %v176_v15  ;;  %v22_v58 = vld [vmem:[%s5719_s0 + $0x10] sm:$0xff]  ;;  %v165_v60 = vld [vmem:[%s5718_s1 + $0x288] sm:$0xff]  ;;  %v180_v61 = vld [vmem:[%s5718_s1 + $0x300] sm:$0xff] }
  0x2b   :  { %1232 = vmatpush.msrb.mxu2 %v191_v16  ;;  %1251 = vmatpush.msrb.mxu3 %v208_v17  ;;  %v197_v62 = vld [vmem:[%s5718_s1 + $0x388] sm:$0xff]  ;;  %v20_v63 = vld [vmem:[%s5719_s0] sm:$0xff]  ;;  %v23_v0 = vld [vmem:[%s5719_s0 + $0x18] sm:$0xff] }
  0x2c   :  { %1193 = vmatpush.msrb.mxu0 %v158_v18  ;;  %1212 = vmatpush.msrb.mxu1 %v175_v19  ;;  %v227_v1 = vld [vmem:[%s5718_s1 + $0x478] sm:$0xff]  ;;  %v164_v3 = vld [vmem:[%s5718_s1 + $0x280] sm:$0xff]  ;;  %v21_v5 = vld [vmem:[%s5719_s0 + $0x8] sm:$0xff] }
  0x2d   :  { %1233 = vmatpush.msrb.mxu2 %v190_v20  ;;  %1252 = vmatpush.msrb.mxu3 %v207_v21  ;;  %v259_v2 = vld [vmem:[%s5718_s1 + $0x578] sm:$0xff]  ;;  %v196_v4 = vld [vmem:[%s5718_s1 + $0x380] sm:$0xff]  ;;  %v226_v6 = vld [vmem:[%s5718_s1 + $0x470] sm:$0xff] }
  0x2e   :  { %1194 = vmatpush.msrb.mxu0 %v157_v22  ;;  %1213 = vmatpush.msrb.mxu1 %v174_v23  ;;  %v243_v7 = vld [vmem:[%s5718_s1 + $0x4f8] sm:$0xff]  ;;  %v258_v8 = vld [vmem:[%s5718_s1 + $0x570] sm:$0xff]  ;;  %v225_v10 = vld [vmem:[%s5718_s1 + $0x468] sm:$0xff] }
  0x2f   :  { %1234 = vmatpush.msrb.mxu2 %v189_v24  ;;  %1253 = vmatpush.msrb.mxu3 %v206_v25  ;;  %v275_v9 = vld [vmem:[%s5718_s1 + $0x5f8] sm:$0xff]  ;;  %v242_v11 = vld [vmem:[%s5718_s1 + $0x4f0] sm:$0xff]  ;;  %v257_v12 = vld [vmem:[%s5718_s1 + $0x568] sm:$0xff] }
  0x30   :  { %1195 = vmatpush.msrb.mxu0 %v156_v26  ;;  %1214 = vmatpush.msrb.mxu1 %v173_v27  ;;  %v274_v13 = vld [vmem:[%s5718_s1 + $0x5f0] sm:$0xff]  ;;  %v224_v15 = vld [vmem:[%s5718_s1 + $0x460] sm:$0xff]  ;;  %v241_v16 = vld [vmem:[%s5718_s1 + $0x4e8] sm:$0xff] }
  0x31   :  { %1235 = vmatpush.msrb.mxu2 %v188_v28  ;;  %1254 = vmatpush.msrb.mxu3 %v205_v29  ;;  %v26_v14 = vld [vmem:[%s5719_s0 + $0x30] sm:$0xff]  ;;  %v256_v17 = vld [vmem:[%s5718_s1 + $0x560] sm:$0xff]  ;;  %v273_v18 = vld [vmem:[%s5718_s1 + $0x5e8] sm:$0xff] }
  0x32   :  { %1196 = vmatpush.msrb.mxu0 %v155_v30  ;;  %1215 = vmatpush.msrb.mxu1 %v172_v31  ;;  %v24_v19 = vld [vmem:[%s5719_s0 + $0x20] sm:$0xff]  ;;  %v27_v20 = vld [vmem:[%s5719_s0 + $0x38] sm:$0xff]  ;;  %v25_v25 = vld [vmem:[%s5719_s0 + $0x28] sm:$0xff] }
  0x33   :  { %1236 = vmatpush.msrb.mxu2 %v187_v32  ;;  %1255 = vmatpush.msrb.mxu3 %v204_v33  ;;  %v223_v21 = vld [vmem:[%s5718_s1 + $0x458] sm:$0xff]  ;;  %v240_v22 = vld [vmem:[%s5718_s1 + $0x4e0] sm:$0xff]  ;;  %v222_v26 = vld [vmem:[%s5718_s1 + $0x450] sm:$0xff] }
  0x34   :  { %1197 = vmatpush.msrb.mxu0 %v154_v34  ;;  %1216 = vmatpush.msrb.mxu1 %v171_v35  ;;  %v255_v23 = vld [vmem:[%s5718_s1 + $0x558] sm:$0xff]  ;;  %v272_v24 = vld [vmem:[%s5718_s1 + $0x5e0] sm:$0xff]  ;;  %v254_v28 = vld [vmem:[%s5718_s1 + $0x550] sm:$0xff] }
  0x35   :  { %1237 = vmatpush.msrb.mxu2 %v186_v36  ;;  %1256 = vmatpush.msrb.mxu3 %v203_v37  ;;  %v239_v27 = vld [vmem:[%s5718_s1 + $0x4d8] sm:$0xff]  ;;  %v221_v30 = vld [vmem:[%s5718_s1 + $0x448] sm:$0xff]  ;;  %v238_v31 = vld [vmem:[%s5718_s1 + $0x4d0] sm:$0xff] }
  0x36   :  { %1198 = vmatpush.msrb.mxu0 %v153_v38  ;;  %1217 = vmatpush.msrb.mxu1 %v170_v39  ;;  %v271_v29 = vld [vmem:[%s5718_s1 + $0x5d8] sm:$0xff]  ;;  %v253_v32 = vld [vmem:[%s5718_s1 + $0x548] sm:$0xff]  ;;  %v270_v33 = vld [vmem:[%s5718_s1 + $0x5d0] sm:$0xff] }
  0x37   :  { %1238 = vmatpush.msrb.mxu2 %v185_v40  ;;  %1257 = vmatpush.msrb.mxu3 %v202_v41  ;;  %v220_v34 = vld [vmem:[%s5718_s1 + $0x440] sm:$0xff]  ;;  %v237_v35 = vld [vmem:[%s5718_s1 + $0x4c8] sm:$0xff]  ;;  %v219_v38 = vld [vmem:[%s5718_s1 + $0x438] sm:$0xff] }
  0x38   :  { %1199 = vmatpush.msrb.mxu0 %v152_v42  ;;  %1218 = vmatpush.msrb.mxu1 %v169_v43  ;;  %v252_v36 = vld [vmem:[%s5718_s1 + $0x540] sm:$0xff]  ;;  %v269_v37 = vld [vmem:[%s5718_s1 + $0x5c8] sm:$0xff]  ;;  %v251_v40 = vld [vmem:[%s5718_s1 + $0x538] sm:$0xff] }
  0x39   :  { %1239 = vmatpush.msrb.mxu2 %v184_v44  ;;  %1258 = vmatpush.msrb.mxu3 %v201_v45  ;;  %v236_v39 = vld [vmem:[%s5718_s1 + $0x4c0] sm:$0xff]  ;;  %v218_v42 = vld [vmem:[%s5718_s1 + $0x430] sm:$0xff]  ;;  %v235_v43 = vld [vmem:[%s5718_s1 + $0x4b8] sm:$0xff] }
  0x3a   :  { %1200 = vmatpush.msrb.mxu0 %v151_v46  ;;  %1219 = vmatpush.msrb.mxu1 %v168_v47  ;;  %v268_v41 = vld [vmem:[%s5718_s1 + $0x5c0] sm:$0xff]  ;;  %v250_v44 = vld [vmem:[%s5718_s1 + $0x530] sm:$0xff]  ;;  %v267_v45 = vld [vmem:[%s5718_s1 + $0x5b8] sm:$0xff] }
  0x3b   :  { %1240 = vmatpush.msrb.mxu2 %v183_v48  ;;  %1259 = vmatpush.msrb.mxu3 %v200_v49  ;;  %v217_v46 = vld [vmem:[%s5718_s1 + $0x428] sm:$0xff]  ;;  %v234_v47 = vld [vmem:[%s5718_s1 + $0x4b0] sm:$0xff] }
  0x3c   :  { %1201 = vmatpush.msrb.mxu0 %v150_v50  ;;  %1220 = vmatpush.msrb.mxu1 %v167_v51  ;;  %v249_v48 = vld [vmem:[%s5718_s1 + $0x528] sm:$0xff]  ;;  %v266_v49 = vld [vmem:[%s5718_s1 + $0x5b0] sm:$0xff]  ;;  %v216_v50 = vld [vmem:[%s5718_s1 + $0x420] sm:$0xff] }
  0x3d   :  { %1241 = vmatpush.msrb.mxu2 %v182_v52  ;;  %1260 = vmatpush.msrb.mxu3 %v199_v53  ;;  %v233_v51 = vld [vmem:[%s5718_s1 + $0x4a8] sm:$0xff]  ;;  %v248_v52 = vld [vmem:[%s5718_s1 + $0x520] sm:$0xff] }
  0x3e   :  { %1202 = vmatpush.msrb.mxu0 %v149_v54  ;;  %1221 = vmatpush.msrb.mxu1 %v166_v55  ;;  %v265_v53 = vld [vmem:[%s5718_s1 + $0x5a8] sm:$0xff]  ;;  %v215_v54 = vld [vmem:[%s5718_s1 + $0x418] sm:$0xff]  ;;  %v232_v55 = vld [vmem:[%s5718_s1 + $0x4a0] sm:$0xff] }
  0x3f   :  { %1242 = vmatpush.msrb.mxu2 %v181_v56  ;;  %1261 = vmatpush.msrb.mxu3 %v198_v57  ;;  %v247_v56 = vld [vmem:[%s5718_s1 + $0x518] sm:$0xff]  ;;  %v264_v57 = vld [vmem:[%s5718_s1 + $0x5a0] sm:$0xff] }
  0x40   :  { %1164 = vmatmul.f32.vlgmr.msra.gmra.mxu2 %v22_v58  ;;  %1203 = vmatpush.msrb.mxu0 %v148_v59  ;;  %v214_v58 = vld [vmem:[%s5718_s1 + $0x410] sm:$0xff]  ;;  %v231_v59 = vld [vmem:[%s5718_s1 + $0x498] sm:$0xff] }
  0x41   :  { %1222 = vmatpush.msrb.mxu1 %v165_v60  ;;  %1243 = vmatpush.msrb.mxu2 %v180_v61  ;;  %v246_v60 = vld [vmem:[%s5718_s1 + $0x510] sm:$0xff]  ;;  %v263_v61 = vld [vmem:[%s5718_s1 + $0x598] sm:$0xff] }
  0x42   :  { %1262 = vmatpush.msrb.mxu3 %v197_v62  ;;  %1124 = vmatmul.f32.vlgmr.msra.gmra.mxu0 %v20_v63  ;;  %v213_v62 = vld [vmem:[%s5718_s1 + $0x408] sm:$0xff]  ;;  %v230_v63 = vld [vmem:[%s5718_s1 + $0x490] sm:$0xff] }
  0x43   :  { %1184 = vmatmul.f32.vlgmr.msra.gmra.mxu3 %v23_v0  ;;  %1268 = vmatpush.msra.mxu0 %v227_v1  ;;  %v245_v0 = vld [vmem:[%s5718_s1 + $0x508] sm:$0xff]  ;;  %v262_v1 = vld [vmem:[%s5718_s1 + $0x590] sm:$0xff] }
  0x44   :  { %1308 = vmatpush.msra.mxu2 %v259_v2  ;;  %1223 = vmatpush.msrb.mxu1 %v164_v3  ;;  %v212_v2 = vld [vmem:[%s5718_s1 + $0x400] sm:$0xff]  ;;  %v229_v3 = vld [vmem:[%s5718_s1 + $0x488] sm:$0xff] }
  0x45   :  { %1263 = vmatpush.msrb.mxu3 %v196_v4  ;;  %1144 = vmatmul.f32.vlgmr.msra.gmra.mxu1 %v21_v5  ;;  %v244_v4 = vld [vmem:[%s5718_s1 + $0x500] sm:$0xff]  ;;  %v261_v5 = vld [vmem:[%s5718_s1 + $0x588] sm:$0xff] }
  0x46   :  { %1269 = vmatpush.msra.mxu0 %v226_v6  ;;  %1288 = vmatpush.msra.mxu1 %v243_v7  ;;  %v28_v6 = vld [vmem:[%s5719_s0 + $0x40] sm:$0xff]  ;;  %v30_v7 = vld [vmem:[%s5719_s0 + $0x50] sm:$0xff] }
  0x47   :  { %1309 = vmatpush.msra.mxu2 %v258_v8  ;;  %1328 = vmatpush.msra.mxu3 %v275_v9  ;;  %v291_v8 = vld [vmem:[%s5718_s1 + $0x678] sm:$0xff] }
  0x48   :  { %1270 = vmatpush.msra.mxu0 %v225_v10  ;;  %1289 = vmatpush.msra.mxu1 %v242_v11  ;;  %v323_v9 = vld [vmem:[%s5718_s1 + $0x778] sm:$0xff]  ;;  %v228_v10 = vld [vmem:[%s5718_s1 + $0x480] sm:$0xff] }
  0x49   :  { %1310 = vmatpush.msra.mxu2 %v257_v12  ;;  %1329 = vmatpush.msra.mxu3 %v274_v13  ;;  %v260_v11 = vld [vmem:[%s5718_s1 + $0x580] sm:$0xff]  ;;  %v29_v12 = vld [vmem:[%s5719_s0 + $0x48] sm:$0xff]  ;;  %v31_v13 = vld [vmem:[%s5719_s0 + $0x58] sm:$0xff] }
  0x4a   :  { %1244 = vmatmul.f32.vlgmr.msrb.gmra.mxu2 %v26_v14  ;;  %1271 = vmatpush.msra.mxu0 %v224_v15  ;;  %v290_v14 = vld [vmem:[%s5718_s1 + $0x670] sm:$0xff]  ;;  %v307_v15 = vld [vmem:[%s5718_s1 + $0x6f8] sm:$0xff] }
  0x4b   :  { %1290 = vmatpush.msra.mxu1 %v241_v16  ;;  %1311 = vmatpush.msra.mxu2 %v256_v17  ;;  %v322_v16 = vld [vmem:[%s5718_s1 + $0x770] sm:$0xff]  ;;  %v339_v17 = vld [vmem:[%s5718_s1 + $0x7f8] sm:$0xff] }
  0x4c   :  { %1330 = vmatpush.msra.mxu3 %v273_v18  ;;  %1204 = vmatmul.f32.vlgmr.msrb.gmra.mxu0 %v24_v19  ;;  %v289_v18 = vld [vmem:[%s5718_s1 + $0x668] sm:$0xff]  ;;  %v306_v19 = vld [vmem:[%s5718_s1 + $0x6f0] sm:$0xff] }
  0x4d   :  { %1264 = vmatmul.f32.vlgmr.msrb.gmra.mxu3 %v27_v20  ;;  %1272 = vmatpush.msra.mxu0 %v223_v21  ;;  %v321_v20 = vld [vmem:[%s5718_s1 + $0x768] sm:$0xff]  ;;  %v338_v21 = vld [vmem:[%s5718_s1 + $0x7f0] sm:$0xff] }
  0x4e   :  { %1291 = vmatpush.msra.mxu1 %v240_v22  ;;  %1312 = vmatpush.msra.mxu2 %v255_v23  ;;  %v288_v22 = vld [vmem:[%s5718_s1 + $0x660] sm:$0xff]  ;;  %v305_v23 = vld [vmem:[%s5718_s1 + $0x6e8] sm:$0xff] }
  0x4f   :  { %1331 = vmatpush.msra.mxu3 %v272_v24  ;;  %1224 = vmatmul.f32.vlgmr.msrb.gmra.mxu1 %v25_v25  ;;  %v320_v24 = vld [vmem:[%s5718_s1 + $0x760] sm:$0xff]  ;;  %v337_v25 = vld [vmem:[%s5718_s1 + $0x7e8] sm:$0xff] }
  0x50   :  { %1273 = vmatpush.msra.mxu0 %v222_v26  ;;  %1292 = vmatpush.msra.mxu1 %v239_v27  ;;  %v287_v26 = vld [vmem:[%s5718_s1 + $0x658] sm:$0xff]  ;;  %v304_v27 = vld [vmem:[%s5718_s1 + $0x6e0] sm:$0xff] }
  0x51   :  { %1313 = vmatpush.msra.mxu2 %v254_v28  ;;  %1332 = vmatpush.msra.mxu3 %v271_v29  ;;  %v319_v28 = vld [vmem:[%s5718_s1 + $0x758] sm:$0xff]  ;;  %v336_v29 = vld [vmem:[%s5718_s1 + $0x7e0] sm:$0xff] }
  0x52   :  { %1274 = vmatpush.msra.mxu0 %v221_v30  ;;  %1293 = vmatpush.msra.mxu1 %v238_v31  ;;  %v286_v30 = vld [vmem:[%s5718_s1 + $0x650] sm:$0xff]  ;;  %v303_v31 = vld [vmem:[%s5718_s1 + $0x6d8] sm:$0xff] }
  0x53   :  { %1314 = vmatpush.msra.mxu2 %v253_v32  ;;  %1333 = vmatpush.msra.mxu3 %v270_v33  ;;  %v318_v32 = vld [vmem:[%s5718_s1 + $0x750] sm:$0xff]  ;;  %v335_v33 = vld [vmem:[%s5718_s1 + $0x7d8] sm:$0xff] }
  0x54   :  { %1275 = vmatpush.msra.mxu0 %v220_v34  ;;  %1294 = vmatpush.msra.mxu1 %v237_v35  ;;  %v285_v34 = vld [vmem:[%s5718_s1 + $0x648] sm:$0xff]  ;;  %v302_v35 = vld [vmem:[%s5718_s1 + $0x6d0] sm:$0xff] }
  0x55   :  { %1315 = vmatpush.msra.mxu2 %v252_v36  ;;  %1334 = vmatpush.msra.mxu3 %v269_v37  ;;  %v317_v36 = vld [vmem:[%s5718_s1 + $0x748] sm:$0xff]  ;;  %v334_v37 = vld [vmem:[%s5718_s1 + $0x7d0] sm:$0xff] }
  0x56   :  { %1276 = vmatpush.msra.mxu0 %v219_v38  ;;  %1295 = vmatpush.msra.mxu1 %v236_v39  ;;  %v284_v38 = vld [vmem:[%s5718_s1 + $0x640] sm:$0xff]  ;;  %v301_v39 = vld [vmem:[%s5718_s1 + $0x6c8] sm:$0xff] }
  0x57   :  { %1316 = vmatpush.msra.mxu2 %v251_v40  ;;  %1335 = vmatpush.msra.mxu3 %v268_v41  ;;  %v316_v40 = vld [vmem:[%s5718_s1 + $0x740] sm:$0xff]  ;;  %v333_v41 = vld [vmem:[%s5718_s1 + $0x7c8] sm:$0xff] }
  0x58   :  { %1277 = vmatpush.msra.mxu0 %v218_v42  ;;  %1296 = vmatpush.msra.mxu1 %v235_v43  ;;  %v283_v42 = vld [vmem:[%s5718_s1 + $0x638] sm:$0xff]  ;;  %v300_v43 = vld [vmem:[%s5718_s1 + $0x6c0] sm:$0xff] }
  0x59   :  { %1317 = vmatpush.msra.mxu2 %v250_v44  ;;  %1336 = vmatpush.msra.mxu3 %v267_v45  ;;  %v315_v44 = vld [vmem:[%s5718_s1 + $0x738] sm:$0xff]  ;;  %v332_v45 = vld [vmem:[%s5718_s1 + $0x7c0] sm:$0xff] }
  0x5a   :  { %1278 = vmatpush.msra.mxu0 %v217_v46  ;;  %1297 = vmatpush.msra.mxu1 %v234_v47  ;;  %v282_v46 = vld [vmem:[%s5718_s1 + $0x630] sm:$0xff]  ;;  %v299_v47 = vld [vmem:[%s5718_s1 + $0x6b8] sm:$0xff] }
  0x5b   :  { %1318 = vmatpush.msra.mxu2 %v249_v48  ;;  %1337 = vmatpush.msra.mxu3 %v266_v49  ;;  %v314_v48 = vld [vmem:[%s5718_s1 + $0x730] sm:$0xff]  ;;  %v331_v49 = vld [vmem:[%s5718_s1 + $0x7b8] sm:$0xff] }
  0x5c   :  { %1279 = vmatpush.msra.mxu0 %v216_v50  ;;  %1298 = vmatpush.msra.mxu1 %v233_v51  ;;  %v281_v50 = vld [vmem:[%s5718_s1 + $0x628] sm:$0xff]  ;;  %v298_v51 = vld [vmem:[%s5718_s1 + $0x6b0] sm:$0xff] }
  0x5d   :  { %1319 = vmatpush.msra.mxu2 %v248_v52  ;;  %1338 = vmatpush.msra.mxu3 %v265_v53  ;;  %v313_v52 = vld [vmem:[%s5718_s1 + $0x728] sm:$0xff]  ;;  %v330_v53 = vld [vmem:[%s5718_s1 + $0x7b0] sm:$0xff] }
  0x5e   :  { %1280 = vmatpush.msra.mxu0 %v215_v54  ;;  %1299 = vmatpush.msra.mxu1 %v232_v55  ;;  %v280_v54 = vld [vmem:[%s5718_s1 + $0x620] sm:$0xff]  ;;  %v297_v55 = vld [vmem:[%s5718_s1 + $0x6a8] sm:$0xff] }
  0x5f   :  { %1320 = vmatpush.msra.mxu2 %v247_v56  ;;  %1339 = vmatpush.msra.mxu3 %v264_v57  ;;  %v312_v56 = vld [vmem:[%s5718_s1 + $0x720] sm:$0xff]  ;;  %v329_v57 = vld [vmem:[%s5718_s1 + $0x7a8] sm:$0xff] }
  0x60   :  { %1281 = vmatpush.msra.mxu0 %v214_v58  ;;  %1300 = vmatpush.msra.mxu1 %v231_v59  ;;  %v279_v58 = vld [vmem:[%s5718_s1 + $0x618] sm:$0xff]  ;;  %v296_v59 = vld [vmem:[%s5718_s1 + $0x6a0] sm:$0xff] }
  0x61   :  { %1321 = vmatpush.msra.mxu2 %v246_v60  ;;  %1340 = vmatpush.msra.mxu3 %v263_v61  ;;  %v311_v60 = vld [vmem:[%s5718_s1 + $0x718] sm:$0xff]  ;;  %v328_v61 = vld [vmem:[%s5718_s1 + $0x7a0] sm:$0xff] }
  0x62   :  { %1282 = vmatpush.msra.mxu0 %v213_v62  ;;  %1301 = vmatpush.msra.mxu1 %v230_v63  ;;  %v278_v62 = vld [vmem:[%s5718_s1 + $0x610] sm:$0xff]  ;;  %v295_v63 = vld [vmem:[%s5718_s1 + $0x698] sm:$0xff] }
  0x63   :  { %1322 = vmatpush.msra.mxu2 %v245_v0  ;;  %1341 = vmatpush.msra.mxu3 %v262_v1  ;;  %v310_v0 = vld [vmem:[%s5718_s1 + $0x710] sm:$0xff]  ;;  %v327_v1 = vld [vmem:[%s5718_s1 + $0x798] sm:$0xff] }
  0x64   :  { %1283 = vmatpush.msra.mxu0 %v212_v2  ;;  %1302 = vmatpush.msra.mxu1 %v229_v3  ;;  %v277_v2 = vld [vmem:[%s5718_s1 + $0x608] sm:$0xff]  ;;  %v294_v3 = vld [vmem:[%s5718_s1 + $0x690] sm:$0xff] }
  0x65   :  { %1323 = vmatpush.msra.mxu2 %v244_v4  ;;  %1342 = vmatpush.msra.mxu3 %v261_v5  ;;  %v309_v4 = vld [vmem:[%s5718_s1 + $0x708] sm:$0xff]  ;;  %v326_v5 = vld [vmem:[%s5718_s1 + $0x790] sm:$0xff] }
  0x66   :  { %1284 = vmatmul.f32.vlgmr.msra.gmra.mxu0 %v28_v6  ;;  %1324 = vmatmul.f32.vlgmr.msra.gmra.mxu2 %v30_v7  ;;  %v276_v6 = vld [vmem:[%s5718_s1 + $0x600] sm:$0xff]  ;;  %v293_v7 = vld [vmem:[%s5718_s1 + $0x688] sm:$0xff] }
  0x67   :  { %1348 = vmatpush.msrb.mxu0 %v291_v8  ;;  %1388 = vmatpush.msrb.mxu2 %v323_v9  ;;  %v308_v8 = vld [vmem:[%s5718_s1 + $0x700] sm:$0xff]  ;;  %v325_v9 = vld [vmem:[%s5718_s1 + $0x788] sm:$0xff] }
  0x68   :  { %1303 = vmatpush.msra.mxu1 %v228_v10  ;;  %1343 = vmatpush.msra.mxu3 %v260_v11  ;;  %v32_v10 = vld [vmem:[%s5719_s0 + $0x60] sm:$0xff]  ;;  %v34_v11 = vld [vmem:[%s5719_s0 + $0x70] sm:$0xff] }
  0x69   :  { %1304 = vmatmul.f32.vlgmr.msra.gmra.mxu1 %v29_v12  ;;  %1344 = vmatmul.f32.vlgmr.msra.gmra.mxu3 %v31_v13  ;;  %v355_v12 = vld [vmem:[%s5718_s1 + $0x878] sm:$0xff] }
  0x6a   :  { %1349 = vmatpush.msrb.mxu0 %v290_v14  ;;  %1368 = vmatpush.msrb.mxu1 %v307_v15  ;;  %v387_v13 = vld [vmem:[%s5718_s1 + $0x978] sm:$0xff]  ;;  %v292_v14 = vld [vmem:[%s5718_s1 + $0x680] sm:$0xff] }
  0x6b   :  { %1389 = vmatpush.msrb.mxu2 %v322_v16  ;;  %1408 = vmatpush.msrb.mxu3 %v339_v17  ;;  %v324_v15 = vld [vmem:[%s5718_s1 + $0x780] sm:$0xff]  ;;  %v33_v16 = vld [vmem:[%s5719_s0 + $0x68] sm:$0xff]  ;;  %v35_v17 = vld [vmem:[%s5719_s0 + $0x78] sm:$0xff] }
  0x6c   :  { %1350 = vmatpush.msrb.mxu0 %v289_v18  ;;  %1369 = vmatpush.msrb.mxu1 %v306_v19  ;;  %v354_v18 = vld [vmem:[%s5718_s1 + $0x870] sm:$0xff]  ;;  %v371_v19 = vld [vmem:[%s5718_s1 + $0x8f8] sm:$0xff] }
  0x6d   :  { %1390 = vmatpush.msrb.mxu2 %v321_v20  ;;  %1409 = vmatpush.msrb.mxu3 %v338_v21  ;;  %v386_v20 = vld [vmem:[%s5718_s1 + $0x970] sm:$0xff]  ;;  %v403_v21 = vld [vmem:[%s5718_s1 + $0x9f8] sm:$0xff] }
  0x6e   :  { %1351 = vmatpush.msrb.mxu0 %v288_v22  ;;  %1370 = vmatpush.msrb.mxu1 %v305_v23  ;;  %v353_v22 = vld [vmem:[%s5718_s1 + $0x868] sm:$0xff]  ;;  %v370_v23 = vld [vmem:[%s5718_s1 + $0x8f0] sm:$0xff] }
  0x6f   :  { %1391 = vmatpush.msrb.mxu2 %v320_v24  ;;  %1410 = vmatpush.msrb.mxu3 %v337_v25  ;;  %v385_v24 = vld [vmem:[%s5718_s1 + $0x968] sm:$0xff]  ;;  %v402_v25 = vld [vmem:[%s5718_s1 + $0x9f0] sm:$0xff] }
  0x70   :  { %1352 = vmatpush.msrb.mxu0 %v287_v26  ;;  %1371 = vmatpush.msrb.mxu1 %v304_v27  ;;  %v352_v26 = vld [vmem:[%s5718_s1 + $0x860] sm:$0xff]  ;;  %v369_v27 = vld [vmem:[%s5718_s1 + $0x8e8] sm:$0xff] }
  0x71   :  { %1392 = vmatpush.msrb.mxu2 %v319_v28  ;;  %1411 = vmatpush.msrb.mxu3 %v336_v29  ;;  %v384_v28 = vld [vmem:[%s5718_s1 + $0x960] sm:$0xff]  ;;  %v401_v29 = vld [vmem:[%s5718_s1 + $0x9e8] sm:$0xff] }
  0x72   :  { %1353 = vmatpush.msrb.mxu0 %v286_v30  ;;  %1372 = vmatpush.msrb.mxu1 %v303_v31  ;;  %v351_v30 = vld [vmem:[%s5718_s1 + $0x858] sm:$0xff]  ;;  %v368_v31 = vld [vmem:[%s5718_s1 + $0x8e0] sm:$0xff] }
  0x73   :  { %1393 = vmatpush.msrb.mxu2 %v318_v32  ;;  %1412 = vmatpush.msrb.mxu3 %v335_v33  ;;  %v383_v32 = vld [vmem:[%s5718_s1 + $0x958] sm:$0xff]  ;;  %v400_v33 = vld [vmem:[%s5718_s1 + $0x9e0] sm:$0xff] }
  0x74   :  { %1354 = vmatpush.msrb.mxu0 %v285_v34  ;;  %1373 = vmatpush.msrb.mxu1 %v302_v35  ;;  %v350_v34 = vld [vmem:[%s5718_s1 + $0x850] sm:$0xff]  ;;  %v367_v35 = vld [vmem:[%s5718_s1 + $0x8d8] sm:$0xff] }
  0x75   :  { %1394 = vmatpush.msrb.mxu2 %v317_v36  ;;  %1413 = vmatpush.msrb.mxu3 %v334_v37  ;;  %v382_v36 = vld [vmem:[%s5718_s1 + $0x950] sm:$0xff]  ;;  %v399_v37 = vld [vmem:[%s5718_s1 + $0x9d8] sm:$0xff] }
  0x76   :  { %1355 = vmatpush.msrb.mxu0 %v284_v38  ;;  %1374 = vmatpush.msrb.mxu1 %v301_v39  ;;  %v349_v38 = vld [vmem:[%s5718_s1 + $0x848] sm:$0xff]  ;;  %v366_v39 = vld [vmem:[%s5718_s1 + $0x8d0] sm:$0xff] }
  0x77   :  { %1395 = vmatpush.msrb.mxu2 %v316_v40  ;;  %1414 = vmatpush.msrb.mxu3 %v333_v41  ;;  %v381_v40 = vld [vmem:[%s5718_s1 + $0x948] sm:$0xff]  ;;  %v398_v41 = vld [vmem:[%s5718_s1 + $0x9d0] sm:$0xff] }
  0x78   :  { %1356 = vmatpush.msrb.mxu0 %v283_v42  ;;  %1375 = vmatpush.msrb.mxu1 %v300_v43  ;;  %v348_v42 = vld [vmem:[%s5718_s1 + $0x840] sm:$0xff]  ;;  %v365_v43 = vld [vmem:[%s5718_s1 + $0x8c8] sm:$0xff] }
  0x79   :  { %1396 = vmatpush.msrb.mxu2 %v315_v44  ;;  %1415 = vmatpush.msrb.mxu3 %v332_v45  ;;  %v380_v44 = vld [vmem:[%s5718_s1 + $0x940] sm:$0xff]  ;;  %v397_v45 = vld [vmem:[%s5718_s1 + $0x9c8] sm:$0xff] }
  0x7a   :  { %1357 = vmatpush.msrb.mxu0 %v282_v46  ;;  %1376 = vmatpush.msrb.mxu1 %v299_v47  ;;  %v347_v46 = vld [vmem:[%s5718_s1 + $0x838] sm:$0xff]  ;;  %v364_v47 = vld [vmem:[%s5718_s1 + $0x8c0] sm:$0xff] }
  0x7b   :  { %1397 = vmatpush.msrb.mxu2 %v314_v48  ;;  %1416 = vmatpush.msrb.mxu3 %v331_v49  ;;  %v379_v48 = vld [vmem:[%s5718_s1 + $0x938] sm:$0xff]  ;;  %v396_v49 = vld [vmem:[%s5718_s1 + $0x9c0] sm:$0xff] }
  0x7c   :  { %1358 = vmatpush.msrb.mxu0 %v281_v50  ;;  %1377 = vmatpush.msrb.mxu1 %v298_v51  ;;  %v346_v50 = vld [vmem:[%s5718_s1 + $0x830] sm:$0xff]  ;;  %v363_v51 = vld [vmem:[%s5718_s1 + $0x8b8] sm:$0xff] }
  0x7d   :  { %1398 = vmatpush.msrb.mxu2 %v313_v52  ;;  %1417 = vmatpush.msrb.mxu3 %v330_v53  ;;  %v378_v52 = vld [vmem:[%s5718_s1 + $0x930] sm:$0xff]  ;;  %v395_v53 = vld [vmem:[%s5718_s1 + $0x9b8] sm:$0xff] }
  0x7e   :  { %1359 = vmatpush.msrb.mxu0 %v280_v54  ;;  %1378 = vmatpush.msrb.mxu1 %v297_v55  ;;  %v345_v54 = vld [vmem:[%s5718_s1 + $0x828] sm:$0xff]  ;;  %v362_v55 = vld [vmem:[%s5718_s1 + $0x8b0] sm:$0xff] }
  0x7f   :  { %1399 = vmatpush.msrb.mxu2 %v312_v56  ;;  %1418 = vmatpush.msrb.mxu3 %v329_v57  ;;  %v377_v56 = vld [vmem:[%s5718_s1 + $0x928] sm:$0xff]  ;;  %v394_v57 = vld [vmem:[%s5718_s1 + $0x9b0] sm:$0xff] }
  0x80   :  { %1360 = vmatpush.msrb.mxu0 %v279_v58  ;;  %1379 = vmatpush.msrb.mxu1 %v296_v59  ;;  %v344_v58 = vld [vmem:[%s5718_s1 + $0x820] sm:$0xff]  ;;  %v361_v59 = vld [vmem:[%s5718_s1 + $0x8a8] sm:$0xff] }
  0x81   :  { %1400 = vmatpush.msrb.mxu2 %v311_v60  ;;  %1419 = vmatpush.msrb.mxu3 %v328_v61  ;;  %v376_v60 = vld [vmem:[%s5718_s1 + $0x920] sm:$0xff]  ;;  %v393_v61 = vld [vmem:[%s5718_s1 + $0x9a8] sm:$0xff] }
  0x82   :  { %1361 = vmatpush.msrb.mxu0 %v278_v62  ;;  %1380 = vmatpush.msrb.mxu1 %v295_v63  ;;  %v343_v62 = vld [vmem:[%s5718_s1 + $0x818] sm:$0xff]  ;;  %v360_v63 = vld [vmem:[%s5718_s1 + $0x8a0] sm:$0xff] }
  0x83   :  { %1401 = vmatpush.msrb.mxu2 %v310_v0  ;;  %1420 = vmatpush.msrb.mxu3 %v327_v1  ;;  %v375_v0 = vld [vmem:[%s5718_s1 + $0x918] sm:$0xff]  ;;  %v392_v1 = vld [vmem:[%s5718_s1 + $0x9a0] sm:$0xff] }
  0x84   :  { %1362 = vmatpush.msrb.mxu0 %v277_v2  ;;  %1381 = vmatpush.msrb.mxu1 %v294_v3  ;;  %v342_v2 = vld [vmem:[%s5718_s1 + $0x810] sm:$0xff]  ;;  %v359_v3 = vld [vmem:[%s5718_s1 + $0x898] sm:$0xff] }
  0x85   :  { %1402 = vmatpush.msrb.mxu2 %v309_v4  ;;  %1421 = vmatpush.msrb.mxu3 %v326_v5  ;;  %v374_v4 = vld [vmem:[%s5718_s1 + $0x910] sm:$0xff]  ;;  %v391_v5 = vld [vmem:[%s5718_s1 + $0x998] sm:$0xff] }
  0x86   :  { %1363 = vmatpush.msrb.mxu0 %v276_v6  ;;  %1382 = vmatpush.msrb.mxu1 %v293_v7  ;;  %v341_v6 = vld [vmem:[%s5718_s1 + $0x808] sm:$0xff]  ;;  %v358_v7 = vld [vmem:[%s5718_s1 + $0x890] sm:$0xff] }
  0x87   :  { %1403 = vmatpush.msrb.mxu2 %v308_v8  ;;  %1422 = vmatpush.msrb.mxu3 %v325_v9  ;;  %v373_v8 = vld [vmem:[%s5718_s1 + $0x908] sm:$0xff]  ;;  %v390_v9 = vld [vmem:[%s5718_s1 + $0x990] sm:$0xff] }
  0x88   :  { %1364 = vmatmul.f32.vlgmr.msrb.gmra.mxu0 %v32_v10  ;;  %1404 = vmatmul.f32.vlgmr.msrb.gmra.mxu2 %v34_v11  ;;  %v340_v10 = vld [vmem:[%s5718_s1 + $0x800] sm:$0xff]  ;;  %v357_v11 = vld [vmem:[%s5718_s1 + $0x888] sm:$0xff] }
  0x89   :  { %1428 = vmatpush.msra.mxu0 %v355_v12  ;;  %1468 = vmatpush.msra.mxu2 %v387_v13  ;;  %v372_v12 = vld [vmem:[%s5718_s1 + $0x900] sm:$0xff]  ;;  %v389_v13 = vld [vmem:[%s5718_s1 + $0x988] sm:$0xff] }
  0x8a   :  { %1383 = vmatpush.msrb.mxu1 %v292_v14  ;;  %1423 = vmatpush.msrb.mxu3 %v324_v15  ;;  %v36_v14 = vld [vmem:[%s5719_s0 + $0x80] sm:$0xff]  ;;  %v38_v15 = vld [vmem:[%s5719_s0 + $0x90] sm:$0xff] }
  0x8b   :  { %1384 = vmatmul.f32.vlgmr.msrb.gmra.mxu1 %v33_v16  ;;  %1424 = vmatmul.f32.vlgmr.msrb.gmra.mxu3 %v35_v17  ;;  %v419_v16 = vld [vmem:[%s5718_s1 + $0xa78] sm:$0xff] }
  0x8c   :  { %1429 = vmatpush.msra.mxu0 %v354_v18  ;;  %1448 = vmatpush.msra.mxu1 %v371_v19  ;;  %v451_v17 = vld [vmem:[%s5718_s1 + $0xb78] sm:$0xff]  ;;  %v356_v18 = vld [vmem:[%s5718_s1 + $0x880] sm:$0xff] }
  0x8d   :  { %1469 = vmatpush.msra.mxu2 %v386_v20  ;;  %1488 = vmatpush.msra.mxu3 %v403_v21  ;;  %v388_v19 = vld [vmem:[%s5718_s1 + $0x980] sm:$0xff]  ;;  %v37_v20 = vld [vmem:[%s5719_s0 + $0x88] sm:$0xff]  ;;  %v39_v21 = vld [vmem:[%s5719_s0 + $0x98] sm:$0xff] }
  0x8e   :  { %1430 = vmatpush.msra.mxu0 %v353_v22  ;;  %1449 = vmatpush.msra.mxu1 %v370_v23  ;;  %v418_v22 = vld [vmem:[%s5718_s1 + $0xa70] sm:$0xff]  ;;  %v435_v23 = vld [vmem:[%s5718_s1 + $0xaf8] sm:$0xff] }
  0x8f   :  { %1470 = vmatpush.msra.mxu2 %v385_v24  ;;  %1489 = vmatpush.msra.mxu3 %v402_v25  ;;  %v450_v24 = vld [vmem:[%s5718_s1 + $0xb70] sm:$0xff]  ;;  %v467_v25 = vld [vmem:[%s5718_s1 + $0xbf8] sm:$0xff] }
  0x90   :  { %1431 = vmatpush.msra.mxu0 %v352_v26  ;;  %1450 = vmatpush.msra.mxu1 %v369_v27  ;;  %v417_v26 = vld [vmem:[%s5718_s1 + $0xa68] sm:$0xff]  ;;  %v434_v27 = vld [vmem:[%s5718_s1 + $0xaf0] sm:$0xff] }
  0x91   :  { %1471 = vmatpush.msra.mxu2 %v384_v28  ;;  %1490 = vmatpush.msra.mxu3 %v401_v29  ;;  %v449_v28 = vld [vmem:[%s5718_s1 + $0xb68] sm:$0xff]  ;;  %v466_v29 = vld [vmem:[%s5718_s1 + $0xbf0] sm:$0xff] }
  0x92   :  { %1432 = vmatpush.msra.mxu0 %v351_v30  ;;  %1451 = vmatpush.msra.mxu1 %v368_v31  ;;  %v416_v30 = vld [vmem:[%s5718_s1 + $0xa60] sm:$0xff]  ;;  %v433_v31 = vld [vmem:[%s5718_s1 + $0xae8] sm:$0xff] }
  0x93   :  { %1472 = vmatpush.msra.mxu2 %v383_v32  ;;  %1491 = vmatpush.msra.mxu3 %v400_v33  ;;  %v448_v32 = vld [vmem:[%s5718_s1 + $0xb60] sm:$0xff]  ;;  %v465_v33 = vld [vmem:[%s5718_s1 + $0xbe8] sm:$0xff] }
  0x94   :  { %1433 = vmatpush.msra.mxu0 %v350_v34  ;;  %1452 = vmatpush.msra.mxu1 %v367_v35  ;;  %v415_v34 = vld [vmem:[%s5718_s1 + $0xa58] sm:$0xff]  ;;  %v432_v35 = vld [vmem:[%s5718_s1 + $0xae0] sm:$0xff] }
  0x95   :  { %1473 = vmatpush.msra.mxu2 %v382_v36  ;;  %1492 = vmatpush.msra.mxu3 %v399_v37  ;;  %v447_v36 = vld [vmem:[%s5718_s1 + $0xb58] sm:$0xff]  ;;  %v464_v37 = vld [vmem:[%s5718_s1 + $0xbe0] sm:$0xff] }
  0x96   :  { %1434 = vmatpush.msra.mxu0 %v349_v38  ;;  %1453 = vmatpush.msra.mxu1 %v366_v39  ;;  %v414_v38 = vld [vmem:[%s5718_s1 + $0xa50] sm:$0xff]  ;;  %v431_v39 = vld [vmem:[%s5718_s1 + $0xad8] sm:$0xff] }
  0x97   :  { %1474 = vmatpush.msra.mxu2 %v381_v40  ;;  %1493 = vmatpush.msra.mxu3 %v398_v41  ;;  %v446_v40 = vld [vmem:[%s5718_s1 + $0xb50] sm:$0xff]  ;;  %v463_v41 = vld [vmem:[%s5718_s1 + $0xbd8] sm:$0xff] }
  0x98   :  { %1435 = vmatpush.msra.mxu0 %v348_v42  ;;  %1454 = vmatpush.msra.mxu1 %v365_v43  ;;  %v413_v42 = vld [vmem:[%s5718_s1 + $0xa48] sm:$0xff]  ;;  %v430_v43 = vld [vmem:[%s5718_s1 + $0xad0] sm:$0xff] }
  0x99   :  { %1475 = vmatpush.msra.mxu2 %v380_v44  ;;  %1494 = vmatpush.msra.mxu3 %v397_v45  ;;  %v445_v44 = vld [vmem:[%s5718_s1 + $0xb48] sm:$0xff]  ;;  %v462_v45 = vld [vmem:[%s5718_s1 + $0xbd0] sm:$0xff] }
  0x9a   :  { %1436 = vmatpush.msra.mxu0 %v347_v46  ;;  %1455 = vmatpush.msra.mxu1 %v364_v47  ;;  %v412_v46 = vld [vmem:[%s5718_s1 + $0xa40] sm:$0xff]  ;;  %v429_v47 = vld [vmem:[%s5718_s1 + $0xac8] sm:$0xff] }
  0x9b   :  { %1476 = vmatpush.msra.mxu2 %v379_v48  ;;  %1495 = vmatpush.msra.mxu3 %v396_v49  ;;  %v444_v48 = vld [vmem:[%s5718_s1 + $0xb40] sm:$0xff]  ;;  %v461_v49 = vld [vmem:[%s5718_s1 + $0xbc8] sm:$0xff] }
  0x9c   :  { %1437 = vmatpush.msra.mxu0 %v346_v50  ;;  %1456 = vmatpush.msra.mxu1 %v363_v51  ;;  %v411_v50 = vld [vmem:[%s5718_s1 + $0xa38] sm:$0xff]  ;;  %v428_v51 = vld [vmem:[%s5718_s1 + $0xac0] sm:$0xff] }
  0x9d   :  { %1477 = vmatpush.msra.mxu2 %v378_v52  ;;  %1496 = vmatpush.msra.mxu3 %v395_v53  ;;  %v443_v52 = vld [vmem:[%s5718_s1 + $0xb38] sm:$0xff]  ;;  %v460_v53 = vld [vmem:[%s5718_s1 + $0xbc0] sm:$0xff] }
  0x9e   :  { %1438 = vmatpush.msra.mxu0 %v345_v54  ;;  %1457 = vmatpush.msra.mxu1 %v362_v55  ;;  %v410_v54 = vld [vmem:[%s5718_s1 + $0xa30] sm:$0xff]  ;;  %v427_v55 = vld [vmem:[%s5718_s1 + $0xab8] sm:$0xff] }
  0x9f   :  { %1478 = vmatpush.msra.mxu2 %v377_v56  ;;  %1497 = vmatpush.msra.mxu3 %v394_v57  ;;  %v442_v56 = vld [vmem:[%s5718_s1 + $0xb30] sm:$0xff]  ;;  %v459_v57 = vld [vmem:[%s5718_s1 + $0xbb8] sm:$0xff] }
  0xa0   :  { %1439 = vmatpush.msra.mxu0 %v344_v58  ;;  %1458 = vmatpush.msra.mxu1 %v361_v59  ;;  %v409_v58 = vld [vmem:[%s5718_s1 + $0xa28] sm:$0xff]  ;;  %v426_v59 = vld [vmem:[%s5718_s1 + $0xab0] sm:$0xff] }
  0xa1   :  { %1479 = vmatpush.msra.mxu2 %v376_v60  ;;  %1498 = vmatpush.msra.mxu3 %v393_v61  ;;  %v441_v60 = vld [vmem:[%s5718_s1 + $0xb28] sm:$0xff]  ;;  %v458_v61 = vld [vmem:[%s5718_s1 + $0xbb0] sm:$0xff] }
  0xa2   :  { %1440 = vmatpush.msra.mxu0 %v343_v62  ;;  %1459 = vmatpush.msra.mxu1 %v360_v63  ;;  %v408_v62 = vld [vmem:[%s5718_s1 + $0xa20] sm:$0xff]  ;;  %v425_v63 = vld [vmem:[%s5718_s1 + $0xaa8] sm:$0xff] }
  0xa3   :  { %1480 = vmatpush.msra.mxu2 %v375_v0  ;;  %1499 = vmatpush.msra.mxu3 %v392_v1  ;;  %v440_v0 = vld [vmem:[%s5718_s1 + $0xb20] sm:$0xff]  ;;  %v457_v1 = vld [vmem:[%s5718_s1 + $0xba8] sm:$0xff] }
  0xa4   :  { %1441 = vmatpush.msra.mxu0 %v342_v2  ;;  %1460 = vmatpush.msra.mxu1 %v359_v3  ;;  %v407_v2 = vld [vmem:[%s5718_s1 + $0xa18] sm:$0xff]  ;;  %v424_v3 = vld [vmem:[%s5718_s1 + $0xaa0] sm:$0xff] }
  0xa5   :  { %1481 = vmatpush.msra.mxu2 %v374_v4  ;;  %1500 = vmatpush.msra.mxu3 %v391_v5  ;;  %v439_v4 = vld [vmem:[%s5718_s1 + $0xb18] sm:$0xff]  ;;  %v456_v5 = vld [vmem:[%s5718_s1 + $0xba0] sm:$0xff] }
  0xa6   :  { %1442 = vmatpush.msra.mxu0 %v341_v6  ;;  %1461 = vmatpush.msra.mxu1 %v358_v7  ;;  %v406_v6 = vld [vmem:[%s5718_s1 + $0xa10] sm:$0xff]  ;;  %v423_v7 = vld [vmem:[%s5718_s1 + $0xa98] sm:$0xff] }
  0xa7   :  { %1482 = vmatpush.msra.mxu2 %v373_v8  ;;  %1501 = vmatpush.msra.mxu3 %v390_v9  ;;  %v438_v8 = vld [vmem:[%s5718_s1 + $0xb10] sm:$0xff]  ;;  %v455_v9 = vld [vmem:[%s5718_s1 + $0xb98] sm:$0xff] }
  0xa8   :  { %1443 = vmatpush.msra.mxu0 %v340_v10  ;;  %1462 = vmatpush.msra.mxu1 %v357_v11  ;;  %v405_v10 = vld [vmem:[%s5718_s1 + $0xa08] sm:$0xff]  ;;  %v422_v11 = vld [vmem:[%s5718_s1 + $0xa90] sm:$0xff] }
  0xa9   :  { %1483 = vmatpush.msra.mxu2 %v372_v12  ;;  %1502 = vmatpush.msra.mxu3 %v389_v13  ;;  %v437_v12 = vld [vmem:[%s5718_s1 + $0xb08] sm:$0xff]  ;;  %v454_v13 = vld [vmem:[%s5718_s1 + $0xb90] sm:$0xff] }
  0xaa   :  { %1444 = vmatmul.f32.vlgmr.msra.gmra.mxu0 %v36_v14  ;;  %1484 = vmatmul.f32.vlgmr.msra.gmra.mxu2 %v38_v15  ;;  %v404_v14 = vld [vmem:[%s5718_s1 + $0xa00] sm:$0xff]  ;;  %v421_v15 = vld [vmem:[%s5718_s1 + $0xa88] sm:$0xff] }
  0xab   :  { %1508 = vmatpush.msrb.mxu0 %v419_v16  ;;  %1548 = vmatpush.msrb.mxu2 %v451_v17  ;;  %v436_v16 = vld [vmem:[%s5718_s1 + $0xb00] sm:$0xff]  ;;  %v453_v17 = vld [vmem:[%s5718_s1 + $0xb88] sm:$0xff] }
  0xac   :  { %1463 = vmatpush.msra.mxu1 %v356_v18  ;;  %1503 = vmatpush.msra.mxu3 %v388_v19  ;;  %v40_v18 = vld [vmem:[%s5719_s0 + $0xa0] sm:$0xff]  ;;  %v42_v19 = vld [vmem:[%s5719_s0 + $0xb0] sm:$0xff] }
  0xad   :  { %1464 = vmatmul.f32.vlgmr.msra.gmra.mxu1 %v37_v20  ;;  %1504 = vmatmul.f32.vlgmr.msra.gmra.mxu3 %v39_v21  ;;  %v483_v20 = vld [vmem:[%s5718_s1 + $0xc78] sm:$0xff] }
  0xae   :  { %1509 = vmatpush.msrb.mxu0 %v418_v22  ;;  %1528 = vmatpush.msrb.mxu1 %v435_v23  ;;  %v515_v21 = vld [vmem:[%s5718_s1 + $0xd78] sm:$0xff]  ;;  %v420_v22 = vld [vmem:[%s5718_s1 + $0xa80] sm:$0xff] }
  0xaf   :  { %1549 = vmatpush.msrb.mxu2 %v450_v24  ;;  %1568 = vmatpush.msrb.mxu3 %v467_v25  ;;  %v452_v23 = vld [vmem:[%s5718_s1 + $0xb80] sm:$0xff]  ;;  %v41_v24 = vld [vmem:[%s5719_s0 + $0xa8] sm:$0xff]  ;;  %v43_v25 = vld [vmem:[%s5719_s0 + $0xb8] sm:$0xff] }
  0xb0   :  { %1510 = vmatpush.msrb.mxu0 %v417_v26  ;;  %1529 = vmatpush.msrb.mxu1 %v434_v27  ;;  %v482_v26 = vld [vmem:[%s5718_s1 + $0xc70] sm:$0xff]  ;;  %v499_v27 = vld [vmem:[%s5718_s1 + $0xcf8] sm:$0xff] }
  0xb1   :  { %1550 = vmatpush.msrb.mxu2 %v449_v28  ;;  %1569 = vmatpush.msrb.mxu3 %v466_v29  ;;  %v514_v28 = vld [vmem:[%s5718_s1 + $0xd70] sm:$0xff]  ;;  %v531_v29 = vld [vmem:[%s5718_s1 + $0xdf8] sm:$0xff] }
  0xb2   :  { %1511 = vmatpush.msrb.mxu0 %v416_v30  ;;  %1530 = vmatpush.msrb.mxu1 %v433_v31  ;;  %v481_v30 = vld [vmem:[%s5718_s1 + $0xc68] sm:$0xff]  ;;  %v498_v31 = vld [vmem:[%s5718_s1 + $0xcf0] sm:$0xff] }
  0xb3   :  { %1551 = vmatpush.msrb.mxu2 %v448_v32  ;;  %1570 = vmatpush.msrb.mxu3 %v465_v33  ;;  %v513_v32 = vld [vmem:[%s5718_s1 + $0xd68] sm:$0xff]  ;;  %v530_v33 = vld [vmem:[%s5718_s1 + $0xdf0] sm:$0xff] }
  0xb4   :  { %1512 = vmatpush.msrb.mxu0 %v415_v34  ;;  %1531 = vmatpush.msrb.mxu1 %v432_v35  ;;  %v480_v34 = vld [vmem:[%s5718_s1 + $0xc60] sm:$0xff]  ;;  %v497_v35 = vld [vmem:[%s5718_s1 + $0xce8] sm:$0xff] }
  0xb5   :  { %1552 = vmatpush.msrb.mxu2 %v447_v36  ;;  %1571 = vmatpush.msrb.mxu3 %v464_v37  ;;  %v512_v36 = vld [vmem:[%s5718_s1 + $0xd60] sm:$0xff]  ;;  %v529_v37 = vld [vmem:[%s5718_s1 + $0xde8] sm:$0xff] }
  0xb6   :  { %1513 = vmatpush.msrb.mxu0 %v414_v38  ;;  %1532 = vmatpush.msrb.mxu1 %v431_v39  ;;  %v479_v38 = vld [vmem:[%s5718_s1 + $0xc58] sm:$0xff]  ;;  %v496_v39 = vld [vmem:[%s5718_s1 + $0xce0] sm:$0xff] }
  0xb7   :  { %1553 = vmatpush.msrb.mxu2 %v446_v40  ;;  %1572 = vmatpush.msrb.mxu3 %v463_v41  ;;  %v511_v40 = vld [vmem:[%s5718_s1 + $0xd58] sm:$0xff]  ;;  %v528_v41 = vld [vmem:[%s5718_s1 + $0xde0] sm:$0xff] }
  0xb8   :  { %1514 = vmatpush.msrb.mxu0 %v413_v42  ;;  %1533 = vmatpush.msrb.mxu1 %v430_v43  ;;  %v478_v42 = vld [vmem:[%s5718_s1 + $0xc50] sm:$0xff]  ;;  %v495_v43 = vld [vmem:[%s5718_s1 + $0xcd8] sm:$0xff] }
  0xb9   :  { %1554 = vmatpush.msrb.mxu2 %v445_v44  ;;  %1573 = vmatpush.msrb.mxu3 %v462_v45  ;;  %v510_v44 = vld [vmem:[%s5718_s1 + $0xd50] sm:$0xff]  ;;  %v527_v45 = vld [vmem:[%s5718_s1 + $0xdd8] sm:$0xff] }
  0xba   :  { %1515 = vmatpush.msrb.mxu0 %v412_v46  ;;  %1534 = vmatpush.msrb.mxu1 %v429_v47  ;;  %v477_v46 = vld [vmem:[%s5718_s1 + $0xc48] sm:$0xff]  ;;  %v494_v47 = vld [vmem:[%s5718_s1 + $0xcd0] sm:$0xff] }
  0xbb   :  { %1555 = vmatpush.msrb.mxu2 %v444_v48  ;;  %1574 = vmatpush.msrb.mxu3 %v461_v49  ;;  %v509_v48 = vld [vmem:[%s5718_s1 + $0xd48] sm:$0xff]  ;;  %v526_v49 = vld [vmem:[%s5718_s1 + $0xdd0] sm:$0xff] }
  0xbc   :  { %1516 = vmatpush.msrb.mxu0 %v411_v50  ;;  %1535 = vmatpush.msrb.mxu1 %v428_v51  ;;  %v476_v50 = vld [vmem:[%s5718_s1 + $0xc40] sm:$0xff]  ;;  %v493_v51 = vld [vmem:[%s5718_s1 + $0xcc8] sm:$0xff] }
  0xbd   :  { %1556 = vmatpush.msrb.mxu2 %v443_v52  ;;  %1575 = vmatpush.msrb.mxu3 %v460_v53  ;;  %v508_v52 = vld [vmem:[%s5718_s1 + $0xd40] sm:$0xff]  ;;  %v525_v53 = vld [vmem:[%s5718_s1 + $0xdc8] sm:$0xff] }
  0xbe   :  { %1517 = vmatpush.msrb.mxu0 %v410_v54  ;;  %1536 = vmatpush.msrb.mxu1 %v427_v55  ;;  %v475_v54 = vld [vmem:[%s5718_s1 + $0xc38] sm:$0xff]  ;;  %v492_v55 = vld [vmem:[%s5718_s1 + $0xcc0] sm:$0xff] }
  0xbf   :  { %1557 = vmatpush.msrb.mxu2 %v442_v56  ;;  %1576 = vmatpush.msrb.mxu3 %v459_v57  ;;  %v507_v56 = vld [vmem:[%s5718_s1 + $0xd38] sm:$0xff]  ;;  %v524_v57 = vld [vmem:[%s5718_s1 + $0xdc0] sm:$0xff] }
  0xc0   :  { %1518 = vmatpush.msrb.mxu0 %v409_v58  ;;  %1537 = vmatpush.msrb.mxu1 %v426_v59  ;;  %v474_v58 = vld [vmem:[%s5718_s1 + $0xc30] sm:$0xff]  ;;  %v491_v59 = vld [vmem:[%s5718_s1 + $0xcb8] sm:$0xff] }
  0xc1   :  { %1558 = vmatpush.msrb.mxu2 %v441_v60  ;;  %1577 = vmatpush.msrb.mxu3 %v458_v61  ;;  %v506_v60 = vld [vmem:[%s5718_s1 + $0xd30] sm:$0xff]  ;;  %v523_v61 = vld [vmem:[%s5718_s1 + $0xdb8] sm:$0xff] }
  0xc2   :  { %1519 = vmatpush.msrb.mxu0 %v408_v62  ;;  %1538 = vmatpush.msrb.mxu1 %v425_v63  ;;  %v473_v62 = vld [vmem:[%s5718_s1 + $0xc28] sm:$0xff]  ;;  %v490_v63 = vld [vmem:[%s5718_s1 + $0xcb0] sm:$0xff] }
  0xc3   :  { %1559 = vmatpush.msrb.mxu2 %v440_v0  ;;  %1578 = vmatpush.msrb.mxu3 %v457_v1  ;;  %v505_v0 = vld [vmem:[%s5718_s1 + $0xd28] sm:$0xff]  ;;  %v522_v1 = vld [vmem:[%s5718_s1 + $0xdb0] sm:$0xff] }
  0xc4   :  { %1520 = vmatpush.msrb.mxu0 %v407_v2  ;;  %1539 = vmatpush.msrb.mxu1 %v424_v3  ;;  %v472_v2 = vld [vmem:[%s5718_s1 + $0xc20] sm:$0xff]  ;;  %v489_v3 = vld [vmem:[%s5718_s1 + $0xca8] sm:$0xff] }
  0xc5   :  { %1560 = vmatpush.msrb.mxu2 %v439_v4  ;;  %1579 = vmatpush.msrb.mxu3 %v456_v5  ;;  %v504_v4 = vld [vmem:[%s5718_s1 + $0xd20] sm:$0xff]  ;;  %v521_v5 = vld [vmem:[%s5718_s1 + $0xda8] sm:$0xff] }
  0xc6   :  { %1521 = vmatpush.msrb.mxu0 %v406_v6  ;;  %1540 = vmatpush.msrb.mxu1 %v423_v7  ;;  %v471_v6 = vld [vmem:[%s5718_s1 + $0xc18] sm:$0xff]  ;;  %v488_v7 = vld [vmem:[%s5718_s1 + $0xca0] sm:$0xff] }
  0xc7   :  { %1561 = vmatpush.msrb.mxu2 %v438_v8  ;;  %1580 = vmatpush.msrb.mxu3 %v455_v9  ;;  %v503_v8 = vld [vmem:[%s5718_s1 + $0xd18] sm:$0xff]  ;;  %v520_v9 = vld [vmem:[%s5718_s1 + $0xda0] sm:$0xff] }
  0xc8   :  { %1522 = vmatpush.msrb.mxu0 %v405_v10  ;;  %1541 = vmatpush.msrb.mxu1 %v422_v11  ;;  %v470_v10 = vld [vmem:[%s5718_s1 + $0xc10] sm:$0xff]  ;;  %v487_v11 = vld [vmem:[%s5718_s1 + $0xc98] sm:$0xff] }
  0xc9   :  { %1562 = vmatpush.msrb.mxu2 %v437_v12  ;;  %1581 = vmatpush.msrb.mxu3 %v454_v13  ;;  %v502_v12 = vld [vmem:[%s5718_s1 + $0xd10] sm:$0xff]  ;;  %v519_v13 = vld [vmem:[%s5718_s1 + $0xd98] sm:$0xff] }
  0xca   :  { %1523 = vmatpush.msrb.mxu0 %v404_v14  ;;  %1542 = vmatpush.msrb.mxu1 %v421_v15  ;;  %v469_v14 = vld [vmem:[%s5718_s1 + $0xc08] sm:$0xff]  ;;  %v486_v15 = vld [vmem:[%s5718_s1 + $0xc90] sm:$0xff] }
  0xcb   :  { %1563 = vmatpush.msrb.mxu2 %v436_v16  ;;  %1582 = vmatpush.msrb.mxu3 %v453_v17  ;;  %v501_v16 = vld [vmem:[%s5718_s1 + $0xd08] sm:$0xff]  ;;  %v518_v17 = vld [vmem:[%s5718_s1 + $0xd90] sm:$0xff] }
  0xcc   :  { %1524 = vmatmul.f32.vlgmr.msrb.gmra.mxu0 %v40_v18  ;;  %1564 = vmatmul.f32.vlgmr.msrb.gmra.mxu2 %v42_v19  ;;  %v468_v18 = vld [vmem:[%s5718_s1 + $0xc00] sm:$0xff]  ;;  %v485_v19 = vld [vmem:[%s5718_s1 + $0xc88] sm:$0xff] }
  0xcd   :  { %1588 = vmatpush.msra.mxu0 %v483_v20  ;;  %1628 = vmatpush.msra.mxu2 %v515_v21  ;;  %v500_v20 = vld [vmem:[%s5718_s1 + $0xd00] sm:$0xff]  ;;  %v517_v21 = vld [vmem:[%s5718_s1 + $0xd88] sm:$0xff] }
  0xce   :  { %1543 = vmatpush.msrb.mxu1 %v420_v22  ;;  %1583 = vmatpush.msrb.mxu3 %v452_v23  ;;  %v44_v22 = vld [vmem:[%s5719_s0 + $0xc0] sm:$0xff]  ;;  %v46_v23 = vld [vmem:[%s5719_s0 + $0xd0] sm:$0xff] }
  0xcf   :  { %1544 = vmatmul.f32.vlgmr.msrb.gmra.mxu1 %v41_v24  ;;  %1584 = vmatmul.f32.vlgmr.msrb.gmra.mxu3 %v43_v25  ;;  %v547_v24 = vld [vmem:[%s5718_s1 + $0xe78] sm:$0xff] }
  0xd0   :  { %1589 = vmatpush.msra.mxu0 %v482_v26  ;;  %1608 = vmatpush.msra.mxu1 %v499_v27  ;;  %v579_v25 = vld [vmem:[%s5718_s1 + $0xf78] sm:$0xff]  ;;  %v484_v26 = vld [vmem:[%s5718_s1 + $0xc80] sm:$0xff] }
  0xd1   :  { %1629 = vmatpush.msra.mxu2 %v514_v28  ;;  %1648 = vmatpush.msra.mxu3 %v531_v29  ;;  %v516_v27 = vld [vmem:[%s5718_s1 + $0xd80] sm:$0xff]  ;;  %v45_v28 = vld [vmem:[%s5719_s0 + $0xc8] sm:$0xff]  ;;  %v47_v29 = vld [vmem:[%s5719_s0 + $0xd8] sm:$0xff] }
  0xd2   :  { %1590 = vmatpush.msra.mxu0 %v481_v30  ;;  %1609 = vmatpush.msra.mxu1 %v498_v31  ;;  %v546_v30 = vld [vmem:[%s5718_s1 + $0xe70] sm:$0xff]  ;;  %v563_v31 = vld [vmem:[%s5718_s1 + $0xef8] sm:$0xff] }
  0xd3   :  { %1630 = vmatpush.msra.mxu2 %v513_v32  ;;  %1649 = vmatpush.msra.mxu3 %v530_v33  ;;  %v578_v32 = vld [vmem:[%s5718_s1 + $0xf70] sm:$0xff]  ;;  %v595_v33 = vld [vmem:[%s5718_s1 + $0xff8] sm:$0xff] }
  0xd4   :  { %1591 = vmatpush.msra.mxu0 %v480_v34  ;;  %1610 = vmatpush.msra.mxu1 %v497_v35  ;;  %v545_v34 = vld [vmem:[%s5718_s1 + $0xe68] sm:$0xff]  ;;  %v562_v35 = vld [vmem:[%s5718_s1 + $0xef0] sm:$0xff] }
  0xd5   :  { %1631 = vmatpush.msra.mxu2 %v512_v36  ;;  %1650 = vmatpush.msra.mxu3 %v529_v37  ;;  %v577_v36 = vld [vmem:[%s5718_s1 + $0xf68] sm:$0xff]  ;;  %v594_v37 = vld [vmem:[%s5718_s1 + $0xff0] sm:$0xff] }
  0xd6   :  { %1592 = vmatpush.msra.mxu0 %v479_v38  ;;  %1611 = vmatpush.msra.mxu1 %v496_v39  ;;  %v544_v38 = vld [vmem:[%s5718_s1 + $0xe60] sm:$0xff]  ;;  %v561_v39 = vld [vmem:[%s5718_s1 + $0xee8] sm:$0xff] }
  0xd7   :  { %1632 = vmatpush.msra.mxu2 %v511_v40  ;;  %1651 = vmatpush.msra.mxu3 %v528_v41  ;;  %v576_v40 = vld [vmem:[%s5718_s1 + $0xf60] sm:$0xff]  ;;  %v593_v41 = vld [vmem:[%s5718_s1 + $0xfe8] sm:$0xff] }
  0xd8   :  { %1593 = vmatpush.msra.mxu0 %v478_v42  ;;  %1612 = vmatpush.msra.mxu1 %v495_v43  ;;  %v543_v42 = vld [vmem:[%s5718_s1 + $0xe58] sm:$0xff]  ;;  %v560_v43 = vld [vmem:[%s5718_s1 + $0xee0] sm:$0xff] }
  0xd9   :  { %1633 = vmatpush.msra.mxu2 %v510_v44  ;;  %1652 = vmatpush.msra.mxu3 %v527_v45  ;;  %v575_v44 = vld [vmem:[%s5718_s1 + $0xf58] sm:$0xff]  ;;  %v592_v45 = vld [vmem:[%s5718_s1 + $0xfe0] sm:$0xff] }
  0xda   :  { %1594 = vmatpush.msra.mxu0 %v477_v46  ;;  %1613 = vmatpush.msra.mxu1 %v494_v47  ;;  %v542_v46 = vld [vmem:[%s5718_s1 + $0xe50] sm:$0xff]  ;;  %v559_v47 = vld [vmem:[%s5718_s1 + $0xed8] sm:$0xff] }
  0xdb   :  { %1634 = vmatpush.msra.mxu2 %v509_v48  ;;  %1653 = vmatpush.msra.mxu3 %v526_v49  ;;  %v574_v48 = vld [vmem:[%s5718_s1 + $0xf50] sm:$0xff]  ;;  %v591_v49 = vld [vmem:[%s5718_s1 + $0xfd8] sm:$0xff] }
  0xdc   :  { %1595 = vmatpush.msra.mxu0 %v476_v50  ;;  %1614 = vmatpush.msra.mxu1 %v493_v51  ;;  %v541_v50 = vld [vmem:[%s5718_s1 + $0xe48] sm:$0xff]  ;;  %v558_v51 = vld [vmem:[%s5718_s1 + $0xed0] sm:$0xff] }
  0xdd   :  { %1635 = vmatpush.msra.mxu2 %v508_v52  ;;  %1654 = vmatpush.msra.mxu3 %v525_v53  ;;  %v573_v52 = vld [vmem:[%s5718_s1 + $0xf48] sm:$0xff]  ;;  %v590_v53 = vld [vmem:[%s5718_s1 + $0xfd0] sm:$0xff] }
  0xde   :  { %1596 = vmatpush.msra.mxu0 %v475_v54  ;;  %1615 = vmatpush.msra.mxu1 %v492_v55  ;;  %v540_v54 = vld [vmem:[%s5718_s1 + $0xe40] sm:$0xff]  ;;  %v557_v55 = vld [vmem:[%s5718_s1 + $0xec8] sm:$0xff] }
  0xdf   :  { %1636 = vmatpush.msra.mxu2 %v507_v56  ;;  %1655 = vmatpush.msra.mxu3 %v524_v57  ;;  %v572_v56 = vld [vmem:[%s5718_s1 + $0xf40] sm:$0xff]  ;;  %v589_v57 = vld [vmem:[%s5718_s1 + $0xfc8] sm:$0xff] }
  0xe0   :  { %1597 = vmatpush.msra.mxu0 %v474_v58  ;;  %1616 = vmatpush.msra.mxu1 %v491_v59  ;;  %v539_v58 = vld [vmem:[%s5718_s1 + $0xe38] sm:$0xff]  ;;  %v556_v59 = vld [vmem:[%s5718_s1 + $0xec0] sm:$0xff] }
  0xe1   :  { %1637 = vmatpush.msra.mxu2 %v506_v60  ;;  %1656 = vmatpush.msra.mxu3 %v523_v61  ;;  %v571_v60 = vld [vmem:[%s5718_s1 + $0xf38] sm:$0xff]  ;;  %v588_v61 = vld [vmem:[%s5718_s1 + $0xfc0] sm:$0xff] }
  0xe2   :  { %1598 = vmatpush.msra.mxu0 %v473_v62  ;;  %1617 = vmatpush.msra.mxu1 %v490_v63  ;;  %v538_v62 = vld [vmem:[%s5718_s1 + $0xe30] sm:$0xff]  ;;  %v555_v63 = vld [vmem:[%s5718_s1 + $0xeb8] sm:$0xff] }
  0xe3   :  { %1638 = vmatpush.msra.mxu2 %v505_v0  ;;  %1657 = vmatpush.msra.mxu3 %v522_v1  ;;  %v570_v0 = vld [vmem:[%s5718_s1 + $0xf30] sm:$0xff]  ;;  %v587_v1 = vld [vmem:[%s5718_s1 + $0xfb8] sm:$0xff] }
  0xe4   :  { %1599 = vmatpush.msra.mxu0 %v472_v2  ;;  %1618 = vmatpush.msra.mxu1 %v489_v3  ;;  %v537_v2 = vld [vmem:[%s5718_s1 + $0xe28] sm:$0xff]  ;;  %v554_v3 = vld [vmem:[%s5718_s1 + $0xeb0] sm:$0xff] }
  0xe5   :  { %1639 = vmatpush.msra.mxu2 %v504_v4  ;;  %1658 = vmatpush.msra.mxu3 %v521_v5  ;;  %v569_v4 = vld [vmem:[%s5718_s1 + $0xf28] sm:$0xff]  ;;  %v586_v5 = vld [vmem:[%s5718_s1 + $0xfb0] sm:$0xff] }
  0xe6   :  { %1600 = vmatpush.msra.mxu0 %v471_v6  ;;  %1619 = vmatpush.msra.mxu1 %v488_v7  ;;  %v536_v6 = vld [vmem:[%s5718_s1 + $0xe20] sm:$0xff]  ;;  %v553_v7 = vld [vmem:[%s5718_s1 + $0xea8] sm:$0xff] }
  0xe7   :  { %1640 = vmatpush.msra.mxu2 %v503_v8  ;;  %1659 = vmatpush.msra.mxu3 %v520_v9  ;;  %v568_v8 = vld [vmem:[%s5718_s1 + $0xf20] sm:$0xff]  ;;  %v585_v9 = vld [vmem:[%s5718_s1 + $0xfa8] sm:$0xff] }
  0xe8   :  { %1601 = vmatpush.msra.mxu0 %v470_v10  ;;  %1620 = vmatpush.msra.mxu1 %v487_v11  ;;  %v535_v10 = vld [vmem:[%s5718_s1 + $0xe18] sm:$0xff]  ;;  %v552_v11 = vld [vmem:[%s5718_s1 + $0xea0] sm:$0xff] }
  0xe9   :  { %1641 = vmatpush.msra.mxu2 %v502_v12  ;;  %1660 = vmatpush.msra.mxu3 %v519_v13  ;;  %v567_v12 = vld [vmem:[%s5718_s1 + $0xf18] sm:$0xff]  ;;  %v584_v13 = vld [vmem:[%s5718_s1 + $0xfa0] sm:$0xff] }
  0xea   :  { %1602 = vmatpush.msra.mxu0 %v469_v14  ;;  %1621 = vmatpush.msra.mxu1 %v486_v15  ;;  %v534_v14 = vld [vmem:[%s5718_s1 + $0xe10] sm:$0xff]  ;;  %v551_v15 = vld [vmem:[%s5718_s1 + $0xe98] sm:$0xff] }
  0xeb   :  { %1642 = vmatpush.msra.mxu2 %v501_v16  ;;  %1661 = vmatpush.msra.mxu3 %v518_v17  ;;  %v566_v16 = vld [vmem:[%s5718_s1 + $0xf10] sm:$0xff]  ;;  %v583_v17 = vld [vmem:[%s5718_s1 + $0xf98] sm:$0xff] }
  0xec   :  { %1603 = vmatpush.msra.mxu0 %v468_v18  ;;  %1622 = vmatpush.msra.mxu1 %v485_v19  ;;  %v533_v18 = vld [vmem:[%s5718_s1 + $0xe08] sm:$0xff]  ;;  %v550_v19 = vld [vmem:[%s5718_s1 + $0xe90] sm:$0xff] }
  0xed   :  { %1643 = vmatpush.msra.mxu2 %v500_v20  ;;  %1662 = vmatpush.msra.mxu3 %v517_v21  ;;  %v565_v20 = vld [vmem:[%s5718_s1 + $0xf08] sm:$0xff]  ;;  %v582_v21 = vld [vmem:[%s5718_s1 + $0xf90] sm:$0xff] }
  0xee   :  { %1604 = vmatmul.f32.vlgmr.msra.gmra.mxu0 %v44_v22  ;;  %1644 = vmatmul.f32.vlgmr.msra.gmra.mxu2 %v46_v23  ;;  %v532_v22 = vld [vmem:[%s5718_s1 + $0xe00] sm:$0xff]  ;;  %v549_v23 = vld [vmem:[%s5718_s1 + $0xe88] sm:$0xff] }
  0xef   :  { %1668 = vmatpush.msrb.mxu0 %v547_v24  ;;  %1708 = vmatpush.msrb.mxu2 %v579_v25  ;;  %v564_v24 = vld [vmem:[%s5718_s1 + $0xf00] sm:$0xff]  ;;  %v581_v25 = vld [vmem:[%s5718_s1 + $0xf88] sm:$0xff] }
  0xf0   :  { %1623 = vmatpush.msra.mxu1 %v484_v26  ;;  %1663 = vmatpush.msra.mxu3 %v516_v27  ;;  %v48_v26 = vld [vmem:[%s5719_s0 + $0xe0] sm:$0xff]  ;;  %v50_v27 = vld [vmem:[%s5719_s0 + $0xf0] sm:$0xff] }
  0xf1   :  { %1624 = vmatmul.f32.vlgmr.msra.gmra.mxu1 %v45_v28  ;;  %1664 = vmatmul.f32.vlgmr.msra.gmra.mxu3 %v47_v29  ;;  %v611_v28 = vld [vmem:[%s5718_s1 + $0x1078] sm:$0xff] }
  0xf2   :  { %1669 = vmatpush.msrb.mxu0 %v546_v30  ;;  %1688 = vmatpush.msrb.mxu1 %v563_v31  ;;  %v643_v29 = vld [vmem:[%s5718_s1 + $0x1178] sm:$0xff]  ;;  %v548_v30 = vld [vmem:[%s5718_s1 + $0xe80] sm:$0xff] }
  0xf3   :  { %1709 = vmatpush.msrb.mxu2 %v578_v32  ;;  %1728 = vmatpush.msrb.mxu3 %v595_v33  ;;  %v580_v31 = vld [vmem:[%s5718_s1 + $0xf80] sm:$0xff]  ;;  %v49_v32 = vld [vmem:[%s5719_s0 + $0xe8] sm:$0xff]  ;;  %v51_v33 = vld [vmem:[%s5719_s0 + $0xf8] sm:$0xff] }
  0xf4   :  { %1670 = vmatpush.msrb.mxu0 %v545_v34  ;;  %1689 = vmatpush.msrb.mxu1 %v562_v35  ;;  %v610_v34 = vld [vmem:[%s5718_s1 + $0x1070] sm:$0xff]  ;;  %v627_v35 = vld [vmem:[%s5718_s1 + $0x10f8] sm:$0xff] }
  0xf5   :  { %1710 = vmatpush.msrb.mxu2 %v577_v36  ;;  %1729 = vmatpush.msrb.mxu3 %v594_v37  ;;  %v642_v36 = vld [vmem:[%s5718_s1 + $0x1170] sm:$0xff]  ;;  %v659_v37 = vld [vmem:[%s5718_s1 + $0x11f8] sm:$0xff] }
  0xf6   :  { %1671 = vmatpush.msrb.mxu0 %v544_v38  ;;  %1690 = vmatpush.msrb.mxu1 %v561_v39  ;;  %v609_v38 = vld [vmem:[%s5718_s1 + $0x1068] sm:$0xff]  ;;  %v626_v39 = vld [vmem:[%s5718_s1 + $0x10f0] sm:$0xff] }
  0xf7   :  { %1711 = vmatpush.msrb.mxu2 %v576_v40  ;;  %1730 = vmatpush.msrb.mxu3 %v593_v41  ;;  %v641_v40 = vld [vmem:[%s5718_s1 + $0x1168] sm:$0xff]  ;;  %v658_v41 = vld [vmem:[%s5718_s1 + $0x11f0] sm:$0xff] }
  0xf8   :  { %1672 = vmatpush.msrb.mxu0 %v543_v42  ;;  %1691 = vmatpush.msrb.mxu1 %v560_v43  ;;  %v608_v42 = vld [vmem:[%s5718_s1 + $0x1060] sm:$0xff]  ;;  %v625_v43 = vld [vmem:[%s5718_s1 + $0x10e8] sm:$0xff] }
  0xf9   :  { %1712 = vmatpush.msrb.mxu2 %v575_v44  ;;  %1731 = vmatpush.msrb.mxu3 %v592_v45  ;;  %v640_v44 = vld [vmem:[%s5718_s1 + $0x1160] sm:$0xff]  ;;  %v657_v45 = vld [vmem:[%s5718_s1 + $0x11e8] sm:$0xff] }
  0xfa   :  { %1673 = vmatpush.msrb.mxu0 %v542_v46  ;;  %1692 = vmatpush.msrb.mxu1 %v559_v47  ;;  %v607_v46 = vld [vmem:[%s5718_s1 + $0x1058] sm:$0xff]  ;;  %v624_v47 = vld [vmem:[%s5718_s1 + $0x10e0] sm:$0xff] }
  0xfb   :  { %1713 = vmatpush.msrb.mxu2 %v574_v48  ;;  %1732 = vmatpush.msrb.mxu3 %v591_v49  ;;  %v639_v48 = vld [vmem:[%s5718_s1 + $0x1158] sm:$0xff]  ;;  %v656_v49 = vld [vmem:[%s5718_s1 + $0x11e0] sm:$0xff] }
  0xfc   :  { %1674 = vmatpush.msrb.mxu0 %v541_v50  ;;  %1693 = vmatpush.msrb.mxu1 %v558_v51  ;;  %v606_v50 = vld [vmem:[%s5718_s1 + $0x1050] sm:$0xff]  ;;  %v623_v51 = vld [vmem:[%s5718_s1 + $0x10d8] sm:$0xff] }
  0xfd   :  { %1714 = vmatpush.msrb.mxu2 %v573_v52  ;;  %1733 = vmatpush.msrb.mxu3 %v590_v53  ;;  %v638_v52 = vld [vmem:[%s5718_s1 + $0x1150] sm:$0xff]  ;;  %v655_v53 = vld [vmem:[%s5718_s1 + $0x11d8] sm:$0xff] }
  0xfe   :  { %1675 = vmatpush.msrb.mxu0 %v540_v54  ;;  %1694 = vmatpush.msrb.mxu1 %v557_v55  ;;  %v605_v54 = vld [vmem:[%s5718_s1 + $0x1048] sm:$0xff]  ;;  %v622_v55 = vld [vmem:[%s5718_s1 + $0x10d0] sm:$0xff] }
  0xff   :  { %1715 = vmatpush.msrb.mxu2 %v572_v56  ;;  %1734 = vmatpush.msrb.mxu3 %v589_v57  ;;  %v637_v56 = vld [vmem:[%s5718_s1 + $0x1148] sm:$0xff]  ;;  %v654_v57 = vld [vmem:[%s5718_s1 + $0x11d0] sm:$0xff] }
 0x100   :  { %1676 = vmatpush.msrb.mxu0 %v539_v58  ;;  %1695 = vmatpush.msrb.mxu1 %v556_v59  ;;  %v604_v58 = vld [vmem:[%s5718_s1 + $0x1040] sm:$0xff]  ;;  %v621_v59 = vld [vmem:[%s5718_s1 + $0x10c8] sm:$0xff] }
 0x101   :  { %1716 = vmatpush.msrb.mxu2 %v571_v60  ;;  %1735 = vmatpush.msrb.mxu3 %v588_v61  ;;  %v636_v60 = vld [vmem:[%s5718_s1 + $0x1140] sm:$0xff]  ;;  %v653_v61 = vld [vmem:[%s5718_s1 + $0x11c8] sm:$0xff] }
 0x102   :  { %1677 = vmatpush.msrb.mxu0 %v538_v62  ;;  %1696 = vmatpush.msrb.mxu1 %v555_v63  ;;  %v603_v62 = vld [vmem:[%s5718_s1 + $0x1038] sm:$0xff]  ;;  %v620_v63 = vld [vmem:[%s5718_s1 + $0x10c0] sm:$0xff] }
 0x103   :  { %1717 = vmatpush.msrb.mxu2 %v570_v0  ;;  %1736 = vmatpush.msrb.mxu3 %v587_v1  ;;  %v635_v0 = vld [vmem:[%s5718_s1 + $0x1138] sm:$0xff]  ;;  %v652_v1 = vld [vmem:[%s5718_s1 + $0x11c0] sm:$0xff] }
 0x104   :  { %1678 = vmatpush.msrb.mxu0 %v537_v2  ;;  %1697 = vmatpush.msrb.mxu1 %v554_v3  ;;  %v602_v2 = vld [vmem:[%s5718_s1 + $0x1030] sm:$0xff]  ;;  %v619_v3 = vld [vmem:[%s5718_s1 + $0x10b8] sm:$0xff] }
 0x105   :  { %1718 = vmatpush.msrb.mxu2 %v569_v4  ;;  %1737 = vmatpush.msrb.mxu3 %v586_v5  ;;  %v634_v4 = vld [vmem:[%s5718_s1 + $0x1130] sm:$0xff]  ;;  %v651_v5 = vld [vmem:[%s5718_s1 + $0x11b8] sm:$0xff] }
 0x106   :  { %1679 = vmatpush.msrb.mxu0 %v536_v6  ;;  %1698 = vmatpush.msrb.mxu1 %v553_v7  ;;  %v601_v6 = vld [vmem:[%s5718_s1 + $0x1028] sm:$0xff]  ;;  %v618_v7 = vld [vmem:[%s5718_s1 + $0x10b0] sm:$0xff] }
 0x107   :  { %1719 = vmatpush.msrb.mxu2 %v568_v8  ;;  %1738 = vmatpush.msrb.mxu3 %v585_v9  ;;  %v633_v8 = vld [vmem:[%s5718_s1 + $0x1128] sm:$0xff]  ;;  %v650_v9 = vld [vmem:[%s5718_s1 + $0x11b0] sm:$0xff] }
 0x108   :  { %1680 = vmatpush.msrb.mxu0 %v535_v10  ;;  %1699 = vmatpush.msrb.mxu1 %v552_v11  ;;  %v600_v10 = vld [vmem:[%s5718_s1 + $0x1020] sm:$0xff]  ;;  %v617_v11 = vld [vmem:[%s5718_s1 + $0x10a8] sm:$0xff] }
 0x109   :  { %1720 = vmatpush.msrb.mxu2 %v567_v12  ;;  %1739 = vmatpush.msrb.mxu3 %v584_v13  ;;  %v632_v12 = vld [vmem:[%s5718_s1 + $0x1120] sm:$0xff]  ;;  %v649_v13 = vld [vmem:[%s5718_s1 + $0x11a8] sm:$0xff] }
 0x10a   :  { %1681 = vmatpush.msrb.mxu0 %v534_v14  ;;  %1700 = vmatpush.msrb.mxu1 %v551_v15  ;;  %v599_v14 = vld [vmem:[%s5718_s1 + $0x1018] sm:$0xff]  ;;  %v616_v15 = vld [vmem:[%s5718_s1 + $0x10a0] sm:$0xff] }
 0x10b   :  { %1721 = vmatpush.msrb.mxu2 %v566_v16  ;;  %1740 = vmatpush.msrb.mxu3 %v583_v17  ;;  %v631_v16 = vld [vmem:[%s5718_s1 + $0x1118] sm:$0xff]  ;;  %v648_v17 = vld [vmem:[%s5718_s1 + $0x11a0] sm:$0xff] }
 0x10c   :  { %1682 = vmatpush.msrb.mxu0 %v533_v18  ;;  %1701 = vmatpush.msrb.mxu1 %v550_v19  ;;  %v598_v18 = vld [vmem:[%s5718_s1 + $0x1010] sm:$0xff]  ;;  %v615_v19 = vld [vmem:[%s5718_s1 + $0x1098] sm:$0xff] }
 0x10d   :  { %1722 = vmatpush.msrb.mxu2 %v565_v20  ;;  %1741 = vmatpush.msrb.mxu3 %v582_v21  ;;  %v630_v20 = vld [vmem:[%s5718_s1 + $0x1110] sm:$0xff]  ;;  %v647_v21 = vld [vmem:[%s5718_s1 + $0x1198] sm:$0xff] }
 0x10e   :  { %1683 = vmatpush.msrb.mxu0 %v532_v22  ;;  %1702 = vmatpush.msrb.mxu1 %v549_v23  ;;  %v597_v22 = vld [vmem:[%s5718_s1 + $0x1008] sm:$0xff]  ;;  %v614_v23 = vld [vmem:[%s5718_s1 + $0x1090] sm:$0xff] }
 0x10f   :  { %1723 = vmatpush.msrb.mxu2 %v564_v24  ;;  %1742 = vmatpush.msrb.mxu3 %v581_v25  ;;  %v629_v24 = vld [vmem:[%s5718_s1 + $0x1108] sm:$0xff]  ;;  %v646_v25 = vld [vmem:[%s5718_s1 + $0x1190] sm:$0xff] }
 0x110   :  { %1684 = vmatmul.f32.vlgmr.msrb.gmra.mxu0 %v48_v26  ;;  %1724 = vmatmul.f32.vlgmr.msrb.gmra.mxu2 %v50_v27  ;;  %v596_v26 = vld [vmem:[%s5718_s1 + $0x1000] sm:$0xff]  ;;  %v613_v27 = vld [vmem:[%s5718_s1 + $0x1088] sm:$0xff] }
 0x111   :  { %1748 = vmatpush.msra.mxu0 %v611_v28  ;;  %1788 = vmatpush.msra.mxu2 %v643_v29  ;;  %v628_v28 = vld [vmem:[%s5718_s1 + $0x1100] sm:$0xff]  ;;  %v645_v29 = vld [vmem:[%s5718_s1 + $0x1188] sm:$0xff] }
 0x112   :  { %1703 = vmatpush.msrb.mxu1 %v548_v30  ;;  %1743 = vmatpush.msrb.mxu3 %v580_v31  ;;  %v52_v30 = vld [vmem:[%s5719_s0 + $0x100] sm:$0xff]  ;;  %v54_v31 = vld [vmem:[%s5719_s0 + $0x110] sm:$0xff] }
 0x113   :  { %1704 = vmatmul.f32.vlgmr.msrb.gmra.mxu1 %v49_v32  ;;  %1744 = vmatmul.f32.vlgmr.msrb.gmra.mxu3 %v51_v33  ;;  %v675_v32 = vld [vmem:[%s5718_s1 + $0x1278] sm:$0xff] }
 0x114   :  { %1749 = vmatpush.msra.mxu0 %v610_v34  ;;  %1768 = vmatpush.msra.mxu1 %v627_v35  ;;  %v707_v33 = vld [vmem:[%s5718_s1 + $0x1378] sm:$0xff]  ;;  %v612_v34 = vld [vmem:[%s5718_s1 + $0x1080] sm:$0xff] }
 0x115   :  { %1789 = vmatpush.msra.mxu2 %v642_v36  ;;  %1808 = vmatpush.msra.mxu3 %v659_v37  ;;  %v644_v35 = vld [vmem:[%s5718_s1 + $0x1180] sm:$0xff]  ;;  %v53_v36 = vld [vmem:[%s5719_s0 + $0x108] sm:$0xff]  ;;  %v55_v37 = vld [vmem:[%s5719_s0 + $0x118] sm:$0xff] }
 0x116   :  { %1750 = vmatpush.msra.mxu0 %v609_v38  ;;  %1769 = vmatpush.msra.mxu1 %v626_v39  ;;  %v674_v38 = vld [vmem:[%s5718_s1 + $0x1270] sm:$0xff]  ;;  %v691_v39 = vld [vmem:[%s5718_s1 + $0x12f8] sm:$0xff] }
 0x117   :  { %1790 = vmatpush.msra.mxu2 %v641_v40  ;;  %1809 = vmatpush.msra.mxu3 %v658_v41  ;;  %v706_v40 = vld [vmem:[%s5718_s1 + $0x1370] sm:$0xff]  ;;  %v723_v41 = vld [vmem:[%s5718_s1 + $0x13f8] sm:$0xff] }
 0x118   :  { %1751 = vmatpush.msra.mxu0 %v608_v42  ;;  %1770 = vmatpush.msra.mxu1 %v625_v43  ;;  %v673_v42 = vld [vmem:[%s5718_s1 + $0x1268] sm:$0xff]  ;;  %v690_v43 = vld [vmem:[%s5718_s1 + $0x12f0] sm:$0xff] }
 0x119   :  { %1791 = vmatpush.msra.mxu2 %v640_v44  ;;  %1810 = vmatpush.msra.mxu3 %v657_v45  ;;  %v705_v44 = vld [vmem:[%s5718_s1 + $0x1368] sm:$0xff]  ;;  %v722_v45 = vld [vmem:[%s5718_s1 + $0x13f0] sm:$0xff] }
 0x11a   :  { %1752 = vmatpush.msra.mxu0 %v607_v46  ;;  %1771 = vmatpush.msra.mxu1 %v624_v47  ;;  %v672_v46 = vld [vmem:[%s5718_s1 + $0x1260] sm:$0xff]  ;;  %v689_v47 = vld [vmem:[%s5718_s1 + $0x12e8] sm:$0xff] }
 0x11b   :  { %1792 = vmatpush.msra.mxu2 %v639_v48  ;;  %1811 = vmatpush.msra.mxu3 %v656_v49  ;;  %v704_v48 = vld [vmem:[%s5718_s1 + $0x1360] sm:$0xff]  ;;  %v721_v49 = vld [vmem:[%s5718_s1 + $0x13e8] sm:$0xff] }
 0x11c   :  { %1753 = vmatpush.msra.mxu0 %v606_v50  ;;  %1772 = vmatpush.msra.mxu1 %v623_v51  ;;  %v671_v50 = vld [vmem:[%s5718_s1 + $0x1258] sm:$0xff]  ;;  %v688_v51 = vld [vmem:[%s5718_s1 + $0x12e0] sm:$0xff] }
 0x11d   :  { %1793 = vmatpush.msra.mxu2 %v638_v52  ;;  %1812 = vmatpush.msra.mxu3 %v655_v53  ;;  %v703_v52 = vld [vmem:[%s5718_s1 + $0x1358] sm:$0xff]  ;;  %v720_v53 = vld [vmem:[%s5718_s1 + $0x13e0] sm:$0xff] }
 0x11e   :  { %1754 = vmatpush.msra.mxu0 %v605_v54  ;;  %1773 = vmatpush.msra.mxu1 %v622_v55  ;;  %v670_v54 = vld [vmem:[%s5718_s1 + $0x1250] sm:$0xff]  ;;  %v687_v55 = vld [vmem:[%s5718_s1 + $0x12d8] sm:$0xff] }
 0x11f   :  { %1794 = vmatpush.msra.mxu2 %v637_v56  ;;  %1813 = vmatpush.msra.mxu3 %v654_v57  ;;  %v702_v56 = vld [vmem:[%s5718_s1 + $0x1350] sm:$0xff]  ;;  %v719_v57 = vld [vmem:[%s5718_s1 + $0x13d8] sm:$0xff] }
 0x120   :  { %1755 = vmatpush.msra.mxu0 %v604_v58  ;;  %1774 = vmatpush.msra.mxu1 %v621_v59  ;;  %v669_v58 = vld [vmem:[%s5718_s1 + $0x1248] sm:$0xff]  ;;  %v686_v59 = vld [vmem:[%s5718_s1 + $0x12d0] sm:$0xff] }
 0x121   :  { %1795 = vmatpush.msra.mxu2 %v636_v60  ;;  %1814 = vmatpush.msra.mxu3 %v653_v61  ;;  %v701_v60 = vld [vmem:[%s5718_s1 + $0x1348] sm:$0xff]  ;;  %v718_v61 = vld [vmem:[%s5718_s1 + $0x13d0] sm:$0xff] }
 0x122   :  { %1756 = vmatpush.msra.mxu0 %v603_v62  ;;  %1775 = vmatpush.msra.mxu1 %v620_v63  ;;  %v668_v62 = vld [vmem:[%s5718_s1 + $0x1240] sm:$0xff]  ;;  %v685_v63 = vld [vmem:[%s5718_s1 + $0x12c8] sm:$0xff] }
 0x123   :  { %1796 = vmatpush.msra.mxu2 %v635_v0  ;;  %1815 = vmatpush.msra.mxu3 %v652_v1  ;;  %v700_v0 = vld [vmem:[%s5718_s1 + $0x1340] sm:$0xff]  ;;  %v717_v1 = vld [vmem:[%s5718_s1 + $0x13c8] sm:$0xff] }
 0x124   :  { %1757 = vmatpush.msra.mxu0 %v602_v2  ;;  %1776 = vmatpush.msra.mxu1 %v619_v3  ;;  %v667_v2 = vld [vmem:[%s5718_s1 + $0x1238] sm:$0xff]  ;;  %v684_v3 = vld [vmem:[%s5718_s1 + $0x12c0] sm:$0xff] }
 0x125   :  { %1797 = vmatpush.msra.mxu2 %v634_v4  ;;  %1816 = vmatpush.msra.mxu3 %v651_v5  ;;  %v699_v4 = vld [vmem:[%s5718_s1 + $0x1338] sm:$0xff]  ;;  %v716_v5 = vld [vmem:[%s5718_s1 + $0x13c0] sm:$0xff] }
 0x126   :  { %1758 = vmatpush.msra.mxu0 %v601_v6  ;;  %1777 = vmatpush.msra.mxu1 %v618_v7  ;;  %v666_v6 = vld [vmem:[%s5718_s1 + $0x1230] sm:$0xff]  ;;  %v683_v7 = vld [vmem:[%s5718_s1 + $0x12b8] sm:$0xff] }
 0x127   :  { %1798 = vmatpush.msra.mxu2 %v633_v8  ;;  %1817 = vmatpush.msra.mxu3 %v650_v9  ;;  %v698_v8 = vld [vmem:[%s5718_s1 + $0x1330] sm:$0xff]  ;;  %v715_v9 = vld [vmem:[%s5718_s1 + $0x13b8] sm:$0xff] }
 0x128   :  { %1759 = vmatpush.msra.mxu0 %v600_v10  ;;  %1778 = vmatpush.msra.mxu1 %v617_v11  ;;  %v665_v10 = vld [vmem:[%s5718_s1 + $0x1228] sm:$0xff]  ;;  %v682_v11 = vld [vmem:[%s5718_s1 + $0x12b0] sm:$0xff] }
 0x129   :  { %1799 = vmatpush.msra.mxu2 %v632_v12  ;;  %1818 = vmatpush.msra.mxu3 %v649_v13  ;;  %v697_v12 = vld [vmem:[%s5718_s1 + $0x1328] sm:$0xff]  ;;  %v714_v13 = vld [vmem:[%s5718_s1 + $0x13b0] sm:$0xff] }
 0x12a   :  { %1760 = vmatpush.msra.mxu0 %v599_v14  ;;  %1779 = vmatpush.msra.mxu1 %v616_v15  ;;  %v664_v14 = vld [vmem:[%s5718_s1 + $0x1220] sm:$0xff]  ;;  %v681_v15 = vld [vmem:[%s5718_s1 + $0x12a8] sm:$0xff] }
 0x12b   :  { %1800 = vmatpush.msra.mxu2 %v631_v16  ;;  %1819 = vmatpush.msra.mxu3 %v648_v17  ;;  %v696_v16 = vld [vmem:[%s5718_s1 + $0x1320] sm:$0xff]  ;;  %v713_v17 = vld [vmem:[%s5718_s1 + $0x13a8] sm:$0xff] }
 0x12c   :  { %1761 = vmatpush.msra.mxu0 %v598_v18  ;;  %1780 = vmatpush.msra.mxu1 %v615_v19  ;;  %v663_v18 = vld [vmem:[%s5718_s1 + $0x1218] sm:$0xff]  ;;  %v680_v19 = vld [vmem:[%s5718_s1 + $0x12a0] sm:$0xff] }
 0x12d   :  { %1801 = vmatpush.msra.mxu2 %v630_v20  ;;  %1820 = vmatpush.msra.mxu3 %v647_v21  ;;  %v695_v20 = vld [vmem:[%s5718_s1 + $0x1318] sm:$0xff]  ;;  %v712_v21 = vld [vmem:[%s5718_s1 + $0x13a0] sm:$0xff] }
 0x12e   :  { %1762 = vmatpush.msra.mxu0 %v597_v22  ;;  %1781 = vmatpush.msra.mxu1 %v614_v23  ;;  %v662_v22 = vld [vmem:[%s5718_s1 + $0x1210] sm:$0xff]  ;;  %v679_v23 = vld [vmem:[%s5718_s1 + $0x1298] sm:$0xff] }
 0x12f   :  { %1802 = vmatpush.msra.mxu2 %v629_v24  ;;  %1821 = vmatpush.msra.mxu3 %v646_v25  ;;  %v694_v24 = vld [vmem:[%s5718_s1 + $0x1310] sm:$0xff]  ;;  %v711_v25 = vld [vmem:[%s5718_s1 + $0x1398] sm:$0xff] }
 0x130   :  { %1763 = vmatpush.msra.mxu0 %v596_v26  ;;  %1782 = vmatpush.msra.mxu1 %v613_v27  ;;  %v661_v26 = vld [vmem:[%s5718_s1 + $0x1208] sm:$0xff]  ;;  %v678_v27 = vld [vmem:[%s5718_s1 + $0x1290] sm:$0xff] }
 0x131   :  { %1803 = vmatpush.msra.mxu2 %v628_v28  ;;  %1822 = vmatpush.msra.mxu3 %v645_v29  ;;  %v693_v28 = vld [vmem:[%s5718_s1 + $0x1308] sm:$0xff]  ;;  %v710_v29 = vld [vmem:[%s5718_s1 + $0x1390] sm:$0xff] }
 0x132   :  { %1764 = vmatmul.f32.vlgmr.msra.gmra.mxu0 %v52_v30  ;;  %1804 = vmatmul.f32.vlgmr.msra.gmra.mxu2 %v54_v31  ;;  %v660_v30 = vld [vmem:[%s5718_s1 + $0x1200] sm:$0xff]  ;;  %v677_v31 = vld [vmem:[%s5718_s1 + $0x1288] sm:$0xff] }
 0x133   :  { %1828 = vmatpush.msrb.mxu0 %v675_v32  ;;  %1868 = vmatpush.msrb.mxu2 %v707_v33  ;;  %v692_v32 = vld [vmem:[%s5718_s1 + $0x1300] sm:$0xff]  ;;  %v709_v33 = vld [vmem:[%s5718_s1 + $0x1388] sm:$0xff] }
 0x134   :  { %1783 = vmatpush.msra.mxu1 %v612_v34  ;;  %1823 = vmatpush.msra.mxu3 %v644_v35  ;;  %v56_v34 = vld [vmem:[%s5719_s0 + $0x120] sm:$0xff]  ;;  %v58_v35 = vld [vmem:[%s5719_s0 + $0x130] sm:$0xff] }
 0x135   :  { %1784 = vmatmul.f32.vlgmr.msra.gmra.mxu1 %v53_v36  ;;  %1824 = vmatmul.f32.vlgmr.msra.gmra.mxu3 %v55_v37  ;;  %v739_v36 = vld [vmem:[%s5718_s1 + $0x1478] sm:$0xff] }
 0x136   :  { %1829 = vmatpush.msrb.mxu0 %v674_v38  ;;  %1848 = vmatpush.msrb.mxu1 %v691_v39  ;;  %v771_v37 = vld [vmem:[%s5718_s1 + $0x1578] sm:$0xff]  ;;  %v676_v38 = vld [vmem:[%s5718_s1 + $0x1280] sm:$0xff] }
 0x137   :  { %1869 = vmatpush.msrb.mxu2 %v706_v40  ;;  %1888 = vmatpush.msrb.mxu3 %v723_v41  ;;  %v708_v39 = vld [vmem:[%s5718_s1 + $0x1380] sm:$0xff]  ;;  %v57_v40 = vld [vmem:[%s5719_s0 + $0x128] sm:$0xff]  ;;  %v59_v41 = vld [vmem:[%s5719_s0 + $0x138] sm:$0xff] }
 0x138   :  { %1830 = vmatpush.msrb.mxu0 %v673_v42  ;;  %1849 = vmatpush.msrb.mxu1 %v690_v43  ;;  %v738_v42 = vld [vmem:[%s5718_s1 + $0x1470] sm:$0xff]  ;;  %v755_v43 = vld [vmem:[%s5718_s1 + $0x14f8] sm:$0xff] }
 0x139   :  { %1870 = vmatpush.msrb.mxu2 %v705_v44  ;;  %1889 = vmatpush.msrb.mxu3 %v722_v45  ;;  %v770_v44 = vld [vmem:[%s5718_s1 + $0x1570] sm:$0xff]  ;;  %v787_v45 = vld [vmem:[%s5718_s1 + $0x15f8] sm:$0xff] }
 0x13a   :  { %1831 = vmatpush.msrb.mxu0 %v672_v46  ;;  %1850 = vmatpush.msrb.mxu1 %v689_v47  ;;  %v737_v46 = vld [vmem:[%s5718_s1 + $0x1468] sm:$0xff]  ;;  %v754_v47 = vld [vmem:[%s5718_s1 + $0x14f0] sm:$0xff] }
 0x13b   :  { %1871 = vmatpush.msrb.mxu2 %v704_v48  ;;  %1890 = vmatpush.msrb.mxu3 %v721_v49  ;;  %v769_v48 = vld [vmem:[%s5718_s1 + $0x1568] sm:$0xff]  ;;  %v786_v49 = vld [vmem:[%s5718_s1 + $0x15f0] sm:$0xff] }
 0x13c   :  { %1832 = vmatpush.msrb.mxu0 %v671_v50  ;;  %1851 = vmatpush.msrb.mxu1 %v688_v51  ;;  %v736_v50 = vld [vmem:[%s5718_s1 + $0x1460] sm:$0xff]  ;;  %v753_v51 = vld [vmem:[%s5718_s1 + $0x14e8] sm:$0xff] }
 0x13d   :  { %1872 = vmatpush.msrb.mxu2 %v703_v52  ;;  %1891 = vmatpush.msrb.mxu3 %v720_v53  ;;  %v768_v52 = vld [vmem:[%s5718_s1 + $0x1560] sm:$0xff]  ;;  %v785_v53 = vld [vmem:[%s5718_s1 + $0x15e8] sm:$0xff] }
 0x13e   :  { %1833 = vmatpush.msrb.mxu0 %v670_v54  ;;  %1852 = vmatpush.msrb.mxu1 %v687_v55  ;;  %v735_v54 = vld [vmem:[%s5718_s1 + $0x1458] sm:$0xff]  ;;  %v752_v55 = vld [vmem:[%s5718_s1 + $0x14e0] sm:$0xff] }
 0x13f   :  { %1873 = vmatpush.msrb.mxu2 %v702_v56  ;;  %1892 = vmatpush.msrb.mxu3 %v719_v57  ;;  %v767_v56 = vld [vmem:[%s5718_s1 + $0x1558] sm:$0xff]  ;;  %v784_v57 = vld [vmem:[%s5718_s1 + $0x15e0] sm:$0xff] }
 0x140   :  { %1834 = vmatpush.msrb.mxu0 %v669_v58  ;;  %1853 = vmatpush.msrb.mxu1 %v686_v59  ;;  %v734_v58 = vld [vmem:[%s5718_s1 + $0x1450] sm:$0xff]  ;;  %v751_v59 = vld [vmem:[%s5718_s1 + $0x14d8] sm:$0xff] }
 0x141   :  { %1874 = vmatpush.msrb.mxu2 %v701_v60  ;;  %1893 = vmatpush.msrb.mxu3 %v718_v61  ;;  %v766_v60 = vld [vmem:[%s5718_s1 + $0x1550] sm:$0xff]  ;;  %v783_v61 = vld [vmem:[%s5718_s1 + $0x15d8] sm:$0xff] }
 0x142   :  { %1835 = vmatpush.msrb.mxu0 %v668_v62  ;;  %1854 = vmatpush.msrb.mxu1 %v685_v63  ;;  %v733_v62 = vld [vmem:[%s5718_s1 + $0x1448] sm:$0xff]  ;;  %v750_v63 = vld [vmem:[%s5718_s1 + $0x14d0] sm:$0xff] }
 0x143   :  { %1875 = vmatpush.msrb.mxu2 %v700_v0  ;;  %1894 = vmatpush.msrb.mxu3 %v717_v1  ;;  %v765_v0 = vld [vmem:[%s5718_s1 + $0x1548] sm:$0xff]  ;;  %v782_v1 = vld [vmem:[%s5718_s1 + $0x15d0] sm:$0xff] }
 0x144   :  { %1836 = vmatpush.msrb.mxu0 %v667_v2  ;;  %1855 = vmatpush.msrb.mxu1 %v684_v3  ;;  %v732_v2 = vld [vmem:[%s5718_s1 + $0x1440] sm:$0xff]  ;;  %v749_v3 = vld [vmem:[%s5718_s1 + $0x14c8] sm:$0xff] }
 0x145   :  { %1876 = vmatpush.msrb.mxu2 %v699_v4  ;;  %1895 = vmatpush.msrb.mxu3 %v716_v5  ;;  %v764_v4 = vld [vmem:[%s5718_s1 + $0x1540] sm:$0xff]  ;;  %v781_v5 = vld [vmem:[%s5718_s1 + $0x15c8] sm:$0xff] }
 0x146   :  { %1837 = vmatpush.msrb.mxu0 %v666_v6  ;;  %1856 = vmatpush.msrb.mxu1 %v683_v7  ;;  %v731_v6 = vld [vmem:[%s5718_s1 + $0x1438] sm:$0xff]  ;;  %v748_v7 = vld [vmem:[%s5718_s1 + $0x14c0] sm:$0xff] }
 0x147   :  { %1877 = vmatpush.msrb.mxu2 %v698_v8  ;;  %1896 = vmatpush.msrb.mxu3 %v715_v9  ;;  %v763_v8 = vld [vmem:[%s5718_s1 + $0x1538] sm:$0xff]  ;;  %v780_v9 = vld [vmem:[%s5718_s1 + $0x15c0] sm:$0xff] }
 0x148   :  { %1838 = vmatpush.msrb.mxu0 %v665_v10  ;;  %1857 = vmatpush.msrb.mxu1 %v682_v11  ;;  %v730_v10 = vld [vmem:[%s5718_s1 + $0x1430] sm:$0xff]  ;;  %v747_v11 = vld [vmem:[%s5718_s1 + $0x14b8] sm:$0xff] }
 0x149   :  { %1878 = vmatpush.msrb.mxu2 %v697_v12  ;;  %1897 = vmatpush.msrb.mxu3 %v714_v13  ;;  %v762_v12 = vld [vmem:[%s5718_s1 + $0x1530] sm:$0xff]  ;;  %v779_v13 = vld [vmem:[%s5718_s1 + $0x15b8] sm:$0xff] }
 0x14a   :  { %1839 = vmatpush.msrb.mxu0 %v664_v14  ;;  %1858 = vmatpush.msrb.mxu1 %v681_v15  ;;  %v729_v14 = vld [vmem:[%s5718_s1 + $0x1428] sm:$0xff]  ;;  %v746_v15 = vld [vmem:[%s5718_s1 + $0x14b0] sm:$0xff] }
 0x14b   :  { %1879 = vmatpush.msrb.mxu2 %v696_v16  ;;  %1898 = vmatpush.msrb.mxu3 %v713_v17  ;;  %v761_v16 = vld [vmem:[%s5718_s1 + $0x1528] sm:$0xff]  ;;  %v778_v17 = vld [vmem:[%s5718_s1 + $0x15b0] sm:$0xff] }
 0x14c   :  { %1840 = vmatpush.msrb.mxu0 %v663_v18  ;;  %1859 = vmatpush.msrb.mxu1 %v680_v19  ;;  %v728_v18 = vld [vmem:[%s5718_s1 + $0x1420] sm:$0xff]  ;;  %v745_v19 = vld [vmem:[%s5718_s1 + $0x14a8] sm:$0xff] }
 0x14d   :  { %1880 = vmatpush.msrb.mxu2 %v695_v20  ;;  %1899 = vmatpush.msrb.mxu3 %v712_v21  ;;  %v760_v20 = vld [vmem:[%s5718_s1 + $0x1520] sm:$0xff]  ;;  %v777_v21 = vld [vmem:[%s5718_s1 + $0x15a8] sm:$0xff] }
 0x14e   :  { %1841 = vmatpush.msrb.mxu0 %v662_v22  ;;  %1860 = vmatpush.msrb.mxu1 %v679_v23  ;;  %v727_v22 = vld [vmem:[%s5718_s1 + $0x1418] sm:$0xff]  ;;  %v744_v23 = vld [vmem:[%s5718_s1 + $0x14a0] sm:$0xff] }
 0x14f   :  { %1881 = vmatpush.msrb.mxu2 %v694_v24  ;;  %1900 = vmatpush.msrb.mxu3 %v711_v25  ;;  %v759_v24 = vld [vmem:[%s5718_s1 + $0x1518] sm:$0xff]  ;;  %v776_v25 = vld [vmem:[%s5718_s1 + $0x15a0] sm:$0xff] }
 0x150   :  { %1842 = vmatpush.msrb.mxu0 %v661_v26  ;;  %1861 = vmatpush.msrb.mxu1 %v678_v27  ;;  %v726_v26 = vld [vmem:[%s5718_s1 + $0x1410] sm:$0xff]  ;;  %v743_v27 = vld [vmem:[%s5718_s1 + $0x1498] sm:$0xff] }
 0x151   :  { %1882 = vmatpush.msrb.mxu2 %v693_v28  ;;  %1901 = vmatpush.msrb.mxu3 %v710_v29  ;;  %v758_v28 = vld [vmem:[%s5718_s1 + $0x1510] sm:$0xff]  ;;  %v775_v29 = vld [vmem:[%s5718_s1 + $0x1598] sm:$0xff] }
 0x152   :  { %1843 = vmatpush.msrb.mxu0 %v660_v30  ;;  %1862 = vmatpush.msrb.mxu1 %v677_v31  ;;  %v725_v30 = vld [vmem:[%s5718_s1 + $0x1408] sm:$0xff]  ;;  %v742_v31 = vld [vmem:[%s5718_s1 + $0x1490] sm:$0xff] }
 0x153   :  { %1883 = vmatpush.msrb.mxu2 %v692_v32  ;;  %1902 = vmatpush.msrb.mxu3 %v709_v33  ;;  %v757_v32 = vld [vmem:[%s5718_s1 + $0x1508] sm:$0xff]  ;;  %v774_v33 = vld [vmem:[%s5718_s1 + $0x1590] sm:$0xff] }
 0x154   :  { %1844 = vmatmul.f32.vlgmr.msrb.gmra.mxu0 %v56_v34  ;;  %1884 = vmatmul.f32.vlgmr.msrb.gmra.mxu2 %v58_v35  ;;  %v724_v34 = vld [vmem:[%s5718_s1 + $0x1400] sm:$0xff]  ;;  %v741_v35 = vld [vmem:[%s5718_s1 + $0x1488] sm:$0xff] }
 0x155   :  { %1908 = vmatpush.msra.mxu0 %v739_v36  ;;  %1948 = vmatpush.msra.mxu2 %v771_v37  ;;  %v756_v36 = vld [vmem:[%s5718_s1 + $0x1500] sm:$0xff]  ;;  %v773_v37 = vld [vmem:[%s5718_s1 + $0x1588] sm:$0xff] }
 0x156   :  { %1863 = vmatpush.msrb.mxu1 %v676_v38  ;;  %1903 = vmatpush.msrb.mxu3 %v708_v39  ;;  %v60_v38 = vld [vmem:[%s5719_s0 + $0x140] sm:$0xff]  ;;  %v62_v39 = vld [vmem:[%s5719_s0 + $0x150] sm:$0xff] }
 0x157   :  { %1864 = vmatmul.f32.vlgmr.msrb.gmra.mxu1 %v57_v40  ;;  %1904 = vmatmul.f32.vlgmr.msrb.gmra.mxu3 %v59_v41  ;;  %v803_v40 = vld [vmem:[%s5718_s1 + $0x1678] sm:$0xff] }
 0x158   :  { %1909 = vmatpush.msra.mxu0 %v738_v42  ;;  %1928 = vmatpush.msra.mxu1 %v755_v43  ;;  %v835_v41 = vld [vmem:[%s5718_s1 + $0x1778] sm:$0xff]  ;;  %v740_v42 = vld [vmem:[%s5718_s1 + $0x1480] sm:$0xff] }
 0x159   :  { %1949 = vmatpush.msra.mxu2 %v770_v44  ;;  %1968 = vmatpush.msra.mxu3 %v787_v45  ;;  %v772_v43 = vld [vmem:[%s5718_s1 + $0x1580] sm:$0xff]  ;;  %v61_v44 = vld [vmem:[%s5719_s0 + $0x148] sm:$0xff]  ;;  %v63_v45 = vld [vmem:[%s5719_s0 + $0x158] sm:$0xff] }
 0x15a   :  { %1910 = vmatpush.msra.mxu0 %v737_v46  ;;  %1929 = vmatpush.msra.mxu1 %v754_v47  ;;  %v802_v46 = vld [vmem:[%s5718_s1 + $0x1670] sm:$0xff]  ;;  %v819_v47 = vld [vmem:[%s5718_s1 + $0x16f8] sm:$0xff] }
 0x15b   :  { %1950 = vmatpush.msra.mxu2 %v769_v48  ;;  %1969 = vmatpush.msra.mxu3 %v786_v49  ;;  %v834_v48 = vld [vmem:[%s5718_s1 + $0x1770] sm:$0xff]  ;;  %v851_v49 = vld [vmem:[%s5718_s1 + $0x17f8] sm:$0xff] }
 0x15c   :  { %1911 = vmatpush.msra.mxu0 %v736_v50  ;;  %1930 = vmatpush.msra.mxu1 %v753_v51  ;;  %v801_v50 = vld [vmem:[%s5718_s1 + $0x1668] sm:$0xff]  ;;  %v818_v51 = vld [vmem:[%s5718_s1 + $0x16f0] sm:$0xff] }
 0x15d   :  { %1951 = vmatpush.msra.mxu2 %v768_v52  ;;  %1970 = vmatpush.msra.mxu3 %v785_v53  ;;  %v833_v52 = vld [vmem:[%s5718_s1 + $0x1768] sm:$0xff]  ;;  %v850_v53 = vld [vmem:[%s5718_s1 + $0x17f0] sm:$0xff] }
 0x15e   :  { %1912 = vmatpush.msra.mxu0 %v735_v54  ;;  %1931 = vmatpush.msra.mxu1 %v752_v55  ;;  %v800_v54 = vld [vmem:[%s5718_s1 + $0x1660] sm:$0xff]  ;;  %v817_v55 = vld [vmem:[%s5718_s1 + $0x16e8] sm:$0xff] }
 0x15f   :  { %1952 = vmatpush.msra.mxu2 %v767_v56  ;;  %1971 = vmatpush.msra.mxu3 %v784_v57  ;;  %v832_v56 = vld [vmem:[%s5718_s1 + $0x1760] sm:$0xff]  ;;  %v849_v57 = vld [vmem:[%s5718_s1 + $0x17e8] sm:$0xff] }
 0x160   :  { %1913 = vmatpush.msra.mxu0 %v734_v58  ;;  %1932 = vmatpush.msra.mxu1 %v751_v59  ;;  %v799_v58 = vld [vmem:[%s5718_s1 + $0x1658] sm:$0xff]  ;;  %v816_v59 = vld [vmem:[%s5718_s1 + $0x16e0] sm:$0xff] }
 0x161   :  { %1953 = vmatpush.msra.mxu2 %v766_v60  ;;  %1972 = vmatpush.msra.mxu3 %v783_v61  ;;  %v831_v60 = vld [vmem:[%s5718_s1 + $0x1758] sm:$0xff]  ;;  %v848_v61 = vld [vmem:[%s5718_s1 + $0x17e0] sm:$0xff] }
 0x162   :  { %1914 = vmatpush.msra.mxu0 %v733_v62  ;;  %1933 = vmatpush.msra.mxu1 %v750_v63  ;;  %v798_v62 = vld [vmem:[%s5718_s1 + $0x1650] sm:$0xff]  ;;  %v815_v63 = vld [vmem:[%s5718_s1 + $0x16d8] sm:$0xff] }
 0x163   :  { %1954 = vmatpush.msra.mxu2 %v765_v0  ;;  %1973 = vmatpush.msra.mxu3 %v782_v1  ;;  %v830_v0 = vld [vmem:[%s5718_s1 + $0x1750] sm:$0xff]  ;;  %v847_v1 = vld [vmem:[%s5718_s1 + $0x17d8] sm:$0xff] }
 0x164   :  { %1915 = vmatpush.msra.mxu0 %v732_v2  ;;  %1934 = vmatpush.msra.mxu1 %v749_v3  ;;  %v797_v2 = vld [vmem:[%s5718_s1 + $0x1648] sm:$0xff]  ;;  %v814_v3 = vld [vmem:[%s5718_s1 + $0x16d0] sm:$0xff] }
 0x165   :  { %1955 = vmatpush.msra.mxu2 %v764_v4  ;;  %1974 = vmatpush.msra.mxu3 %v781_v5  ;;  %v829_v4 = vld [vmem:[%s5718_s1 + $0x1748] sm:$0xff]  ;;  %v846_v5 = vld [vmem:[%s5718_s1 + $0x17d0] sm:$0xff] }
 0x166   :  { %1916 = vmatpush.msra.mxu0 %v731_v6  ;;  %1935 = vmatpush.msra.mxu1 %v748_v7  ;;  %v796_v6 = vld [vmem:[%s5718_s1 + $0x1640] sm:$0xff]  ;;  %v813_v7 = vld [vmem:[%s5718_s1 + $0x16c8] sm:$0xff] }
 0x167   :  { %1956 = vmatpush.msra.mxu2 %v763_v8  ;;  %1975 = vmatpush.msra.mxu3 %v780_v9  ;;  %v828_v8 = vld [vmem:[%s5718_s1 + $0x1740] sm:$0xff]  ;;  %v845_v9 = vld [vmem:[%s5718_s1 + $0x17c8] sm:$0xff] }
 0x168   :  { %1917 = vmatpush.msra.mxu0 %v730_v10  ;;  %1936 = vmatpush.msra.mxu1 %v747_v11  ;;  %v795_v10 = vld [vmem:[%s5718_s1 + $0x1638] sm:$0xff]  ;;  %v812_v11 = vld [vmem:[%s5718_s1 + $0x16c0] sm:$0xff] }
 0x169   :  { %1957 = vmatpush.msra.mxu2 %v762_v12  ;;  %1976 = vmatpush.msra.mxu3 %v779_v13  ;;  %v827_v12 = vld [vmem:[%s5718_s1 + $0x1738] sm:$0xff]  ;;  %v844_v13 = vld [vmem:[%s5718_s1 + $0x17c0] sm:$0xff] }
 0x16a   :  { %1918 = vmatpush.msra.mxu0 %v729_v14  ;;  %1937 = vmatpush.msra.mxu1 %v746_v15  ;;  %v794_v14 = vld [vmem:[%s5718_s1 + $0x1630] sm:$0xff]  ;;  %v811_v15 = vld [vmem:[%s5718_s1 + $0x16b8] sm:$0xff] }
 0x16b   :  { %1958 = vmatpush.msra.mxu2 %v761_v16  ;;  %1977 = vmatpush.msra.mxu3 %v778_v17  ;;  %v826_v16 = vld [vmem:[%s5718_s1 + $0x1730] sm:$0xff]  ;;  %v843_v17 = vld [vmem:[%s5718_s1 + $0x17b8] sm:$0xff] }
 0x16c   :  { %1919 = vmatpush.msra.mxu0 %v728_v18  ;;  %1938 = vmatpush.msra.mxu1 %v745_v19  ;;  %v793_v18 = vld [vmem:[%s5718_s1 + $0x1628] sm:$0xff]  ;;  %v810_v19 = vld [vmem:[%s5718_s1 + $0x16b0] sm:$0xff] }
 0x16d   :  { %1959 = vmatpush.msra.mxu2 %v760_v20  ;;  %1978 = vmatpush.msra.mxu3 %v777_v21  ;;  %v825_v20 = vld [vmem:[%s5718_s1 + $0x1728] sm:$0xff]  ;;  %v842_v21 = vld [vmem:[%s5718_s1 + $0x17b0] sm:$0xff] }
 0x16e   :  { %1920 = vmatpush.msra.mxu0 %v727_v22  ;;  %1939 = vmatpush.msra.mxu1 %v744_v23  ;;  %v792_v22 = vld [vmem:[%s5718_s1 + $0x1620] sm:$0xff]  ;;  %v809_v23 = vld [vmem:[%s5718_s1 + $0x16a8] sm:$0xff] }
 0x16f   :  { %1960 = vmatpush.msra.mxu2 %v759_v24  ;;  %1979 = vmatpush.msra.mxu3 %v776_v25  ;;  %v824_v24 = vld [vmem:[%s5718_s1 + $0x1720] sm:$0xff]  ;;  %v841_v25 = vld [vmem:[%s5718_s1 + $0x17a8] sm:$0xff] }
 0x170   :  { %1921 = vmatpush.msra.mxu0 %v726_v26  ;;  %1940 = vmatpush.msra.mxu1 %v743_v27  ;;  %v791_v26 = vld [vmem:[%s5718_s1 + $0x1618] sm:$0xff]  ;;  %v808_v27 = vld [vmem:[%s5718_s1 + $0x16a0] sm:$0xff] }
 0x171   :  { %1961 = vmatpush.msra.mxu2 %v758_v28  ;;  %1980 = vmatpush.msra.mxu3 %v775_v29  ;;  %v823_v28 = vld [vmem:[%s5718_s1 + $0x1718] sm:$0xff]  ;;  %v840_v29 = vld [vmem:[%s5718_s1 + $0x17a0] sm:$0xff] }
 0x172   :  { %1922 = vmatpush.msra.mxu0 %v725_v30  ;;  %1941 = vmatpush.msra.mxu1 %v742_v31  ;;  %v790_v30 = vld [vmem:[%s5718_s1 + $0x1610] sm:$0xff]  ;;  %v807_v31 = vld [vmem:[%s5718_s1 + $0x1698] sm:$0xff] }
 0x173   :  { %1962 = vmatpush.msra.mxu2 %v757_v32  ;;  %1981 = vmatpush.msra.mxu3 %v774_v33  ;;  %v822_v32 = vld [vmem:[%s5718_s1 + $0x1710] sm:$0xff]  ;;  %v839_v33 = vld [vmem:[%s5718_s1 + $0x1798] sm:$0xff] }
 0x174   :  { %1923 = vmatpush.msra.mxu0 %v724_v34  ;;  %1942 = vmatpush.msra.mxu1 %v741_v35  ;;  %v789_v34 = vld [vmem:[%s5718_s1 + $0x1608] sm:$0xff]  ;;  %v806_v35 = vld [vmem:[%s5718_s1 + $0x1690] sm:$0xff] }
 0x175   :  { %1963 = vmatpush.msra.mxu2 %v756_v36  ;;  %1982 = vmatpush.msra.mxu3 %v773_v37  ;;  %v821_v36 = vld [vmem:[%s5718_s1 + $0x1708] sm:$0xff]  ;;  %v838_v37 = vld [vmem:[%s5718_s1 + $0x1790] sm:$0xff] }
 0x176   :  { %1924 = vmatmul.f32.vlgmr.msra.gmra.mxu0 %v60_v38  ;;  %1964 = vmatmul.f32.vlgmr.msra.gmra.mxu2 %v62_v39  ;;  %v788_v38 = vld [vmem:[%s5718_s1 + $0x1600] sm:$0xff]  ;;  %v805_v39 = vld [vmem:[%s5718_s1 + $0x1688] sm:$0xff] }
 0x177   :  { %1988 = vmatpush.msrb.mxu0 %v803_v40  ;;  %2028 = vmatpush.msrb.mxu2 %v835_v41  ;;  %v820_v40 = vld [vmem:[%s5718_s1 + $0x1700] sm:$0xff]  ;;  %v837_v41 = vld [vmem:[%s5718_s1 + $0x1788] sm:$0xff] }
 0x178   :  { %1943 = vmatpush.msra.mxu1 %v740_v42  ;;  %1983 = vmatpush.msra.mxu3 %v772_v43  ;;  %v64_v42 = vld [vmem:[%s5719_s0 + $0x160] sm:$0xff]  ;;  %v66_v43 = vld [vmem:[%s5719_s0 + $0x170] sm:$0xff] }
 0x179   :  { %1944 = vmatmul.f32.vlgmr.msra.gmra.mxu1 %v61_v44  ;;  %1984 = vmatmul.f32.vlgmr.msra.gmra.mxu3 %v63_v45  ;;  %v867_v44 = vld [vmem:[%s5718_s1 + $0x1878] sm:$0xff] }
 0x17a   :  { %1989 = vmatpush.msrb.mxu0 %v802_v46  ;;  %2008 = vmatpush.msrb.mxu1 %v819_v47  ;;  %v899_v45 = vld [vmem:[%s5718_s1 + $0x1978] sm:$0xff]  ;;  %v804_v46 = vld [vmem:[%s5718_s1 + $0x1680] sm:$0xff] }
 0x17b   :  { %2029 = vmatpush.msrb.mxu2 %v834_v48  ;;  %2048 = vmatpush.msrb.mxu3 %v851_v49  ;;  %v836_v47 = vld [vmem:[%s5718_s1 + $0x1780] sm:$0xff]  ;;  %v65_v48 = vld [vmem:[%s5719_s0 + $0x168] sm:$0xff]  ;;  %v67_v49 = vld [vmem:[%s5719_s0 + $0x178] sm:$0xff] }
 0x17c   :  { %1990 = vmatpush.msrb.mxu0 %v801_v50  ;;  %2009 = vmatpush.msrb.mxu1 %v818_v51  ;;  %v866_v50 = vld [vmem:[%s5718_s1 + $0x1870] sm:$0xff]  ;;  %v883_v51 = vld [vmem:[%s5718_s1 + $0x18f8] sm:$0xff] }
 0x17d   :  { %2030 = vmatpush.msrb.mxu2 %v833_v52  ;;  %2049 = vmatpush.msrb.mxu3 %v850_v53  ;;  %v898_v52 = vld [vmem:[%s5718_s1 + $0x1970] sm:$0xff]  ;;  %v915_v53 = vld [vmem:[%s5718_s1 + $0x19f8] sm:$0xff] }
 0x17e   :  { %1991 = vmatpush.msrb.mxu0 %v800_v54  ;;  %2010 = vmatpush.msrb.mxu1 %v817_v55  ;;  %v865_v54 = vld [vmem:[%s5718_s1 + $0x1868] sm:$0xff]  ;;  %v882_v55 = vld [vmem:[%s5718_s1 + $0x18f0] sm:$0xff] }
 0x17f   :  { %2031 = vmatpush.msrb.mxu2 %v832_v56  ;;  %2050 = vmatpush.msrb.mxu3 %v849_v57  ;;  %v897_v56 = vld [vmem:[%s5718_s1 + $0x1968] sm:$0xff]  ;;  %v914_v57 = vld [vmem:[%s5718_s1 + $0x19f0] sm:$0xff] }
 0x180   :  { %1992 = vmatpush.msrb.mxu0 %v799_v58  ;;  %2011 = vmatpush.msrb.mxu1 %v816_v59  ;;  %v864_v58 = vld [vmem:[%s5718_s1 + $0x1860] sm:$0xff]  ;;  %v881_v59 = vld [vmem:[%s5718_s1 + $0x18e8] sm:$0xff] }
 0x181   :  { %2032 = vmatpush.msrb.mxu2 %v831_v60  ;;  %2051 = vmatpush.msrb.mxu3 %v848_v61  ;;  %v896_v60 = vld [vmem:[%s5718_s1 + $0x1960] sm:$0xff]  ;;  %v913_v61 = vld [vmem:[%s5718_s1 + $0x19e8] sm:$0xff] }
 0x182   :  { %1993 = vmatpush.msrb.mxu0 %v798_v62  ;;  %2012 = vmatpush.msrb.mxu1 %v815_v63  ;;  %v863_v62 = vld [vmem:[%s5718_s1 + $0x1858] sm:$0xff]  ;;  %v880_v63 = vld [vmem:[%s5718_s1 + $0x18e0] sm:$0xff] }
 0x183   :  { %2033 = vmatpush.msrb.mxu2 %v830_v0  ;;  %2052 = vmatpush.msrb.mxu3 %v847_v1  ;;  %v895_v0 = vld [vmem:[%s5718_s1 + $0x1958] sm:$0xff]  ;;  %v912_v1 = vld [vmem:[%s5718_s1 + $0x19e0] sm:$0xff] }
 0x184   :  { %1994 = vmatpush.msrb.mxu0 %v797_v2  ;;  %2013 = vmatpush.msrb.mxu1 %v814_v3  ;;  %v862_v2 = vld [vmem:[%s5718_s1 + $0x1850] sm:$0xff]  ;;  %v879_v3 = vld [vmem:[%s5718_s1 + $0x18d8] sm:$0xff] }
 0x185   :  { %2034 = vmatpush.msrb.mxu2 %v829_v4  ;;  %2053 = vmatpush.msrb.mxu3 %v846_v5  ;;  %v894_v4 = vld [vmem:[%s5718_s1 + $0x1950] sm:$0xff]  ;;  %v911_v5 = vld [vmem:[%s5718_s1 + $0x19d8] sm:$0xff] }
 0x186   :  { %1995 = vmatpush.msrb.mxu0 %v796_v6  ;;  %2014 = vmatpush.msrb.mxu1 %v813_v7  ;;  %v861_v6 = vld [vmem:[%s5718_s1 + $0x1848] sm:$0xff]  ;;  %v878_v7 = vld [vmem:[%s5718_s1 + $0x18d0] sm:$0xff] }
 0x187   :  { %2035 = vmatpush.msrb.mxu2 %v828_v8  ;;  %2054 = vmatpush.msrb.mxu3 %v845_v9  ;;  %v893_v8 = vld [vmem:[%s5718_s1 + $0x1948] sm:$0xff]  ;;  %v910_v9 = vld [vmem:[%s5718_s1 + $0x19d0] sm:$0xff] }
 0x188   :  { %1996 = vmatpush.msrb.mxu0 %v795_v10  ;;  %2015 = vmatpush.msrb.mxu1 %v812_v11  ;;  %v860_v10 = vld [vmem:[%s5718_s1 + $0x1840] sm:$0xff]  ;;  %v877_v11 = vld [vmem:[%s5718_s1 + $0x18c8] sm:$0xff] }
 0x189   :  { %2036 = vmatpush.msrb.mxu2 %v827_v12  ;;  %2055 = vmatpush.msrb.mxu3 %v844_v13  ;;  %v892_v12 = vld [vmem:[%s5718_s1 + $0x1940] sm:$0xff]  ;;  %v909_v13 = vld [vmem:[%s5718_s1 + $0x19c8] sm:$0xff] }
 0x18a   :  { %1997 = vmatpush.msrb.mxu0 %v794_v14  ;;  %2016 = vmatpush.msrb.mxu1 %v811_v15  ;;  %v859_v14 = vld [vmem:[%s5718_s1 + $0x1838] sm:$0xff]  ;;  %v876_v15 = vld [vmem:[%s5718_s1 + $0x18c0] sm:$0xff] }
 0x18b   :  { %2037 = vmatpush.msrb.mxu2 %v826_v16  ;;  %2056 = vmatpush.msrb.mxu3 %v843_v17  ;;  %v891_v16 = vld [vmem:[%s5718_s1 + $0x1938] sm:$0xff]  ;;  %v908_v17 = vld [vmem:[%s5718_s1 + $0x19c0] sm:$0xff] }
 0x18c   :  { %1998 = vmatpush.msrb.mxu0 %v793_v18  ;;  %2017 = vmatpush.msrb.mxu1 %v810_v19  ;;  %v858_v18 = vld [vmem:[%s5718_s1 + $0x1830] sm:$0xff]  ;;  %v875_v19 = vld [vmem:[%s5718_s1 + $0x18b8] sm:$0xff] }
 0x18d   :  { %2038 = vmatpush.msrb.mxu2 %v825_v20  ;;  %2057 = vmatpush.msrb.mxu3 %v842_v21  ;;  %v890_v20 = vld [vmem:[%s5718_s1 + $0x1930] sm:$0xff]  ;;  %v907_v21 = vld [vmem:[%s5718_s1 + $0x19b8] sm:$0xff] }
 0x18e   :  { %1999 = vmatpush.msrb.mxu0 %v792_v22  ;;  %2018 = vmatpush.msrb.mxu1 %v809_v23  ;;  %v857_v22 = vld [vmem:[%s5718_s1 + $0x1828] sm:$0xff]  ;;  %v874_v23 = vld [vmem:[%s5718_s1 + $0x18b0] sm:$0xff] }
 0x18f   :  { %2039 = vmatpush.msrb.mxu2 %v824_v24  ;;  %2058 = vmatpush.msrb.mxu3 %v841_v25  ;;  %v889_v24 = vld [vmem:[%s5718_s1 + $0x1928] sm:$0xff]  ;;  %v906_v25 = vld [vmem:[%s5718_s1 + $0x19b0] sm:$0xff] }
 0x190   :  { %2000 = vmatpush.msrb.mxu0 %v791_v26  ;;  %2019 = vmatpush.msrb.mxu1 %v808_v27  ;;  %v856_v26 = vld [vmem:[%s5718_s1 + $0x1820] sm:$0xff]  ;;  %v873_v27 = vld [vmem:[%s5718_s1 + $0x18a8] sm:$0xff] }
 0x191   :  { %2040 = vmatpush.msrb.mxu2 %v823_v28  ;;  %2059 = vmatpush.msrb.mxu3 %v840_v29  ;;  %v888_v28 = vld [vmem:[%s5718_s1 + $0x1920] sm:$0xff]  ;;  %v905_v29 = vld [vmem:[%s5718_s1 + $0x19a8] sm:$0xff] }
 0x192   :  { %2001 = vmatpush.msrb.mxu0 %v790_v30  ;;  %2020 = vmatpush.msrb.mxu1 %v807_v31  ;;  %v855_v30 = vld [vmem:[%s5718_s1 + $0x1818] sm:$0xff]  ;;  %v872_v31 = vld [vmem:[%s5718_s1 + $0x18a0] sm:$0xff] }
 0x193   :  { %2041 = vmatpush.msrb.mxu2 %v822_v32  ;;  %2060 = vmatpush.msrb.mxu3 %v839_v33  ;;  %v887_v32 = vld [vmem:[%s5718_s1 + $0x1918] sm:$0xff]  ;;  %v904_v33 = vld [vmem:[%s5718_s1 + $0x19a0] sm:$0xff] }
 0x194   :  { %2002 = vmatpush.msrb.mxu0 %v789_v34  ;;  %2021 = vmatpush.msrb.mxu1 %v806_v35  ;;  %v854_v34 = vld [vmem:[%s5718_s1 + $0x1810] sm:$0xff]  ;;  %v871_v35 = vld [vmem:[%s5718_s1 + $0x1898] sm:$0xff] }
 0x195   :  { %2042 = vmatpush.msrb.mxu2 %v821_v36  ;;  %2061 = vmatpush.msrb.mxu3 %v838_v37  ;;  %v886_v36 = vld [vmem:[%s5718_s1 + $0x1910] sm:$0xff]  ;;  %v903_v37 = vld [vmem:[%s5718_s1 + $0x1998] sm:$0xff] }
 0x196   :  { %2003 = vmatpush.msrb.mxu0 %v788_v38  ;;  %2022 = vmatpush.msrb.mxu1 %v805_v39  ;;  %v853_v38 = vld [vmem:[%s5718_s1 + $0x1808] sm:$0xff]  ;;  %v870_v39 = vld [vmem:[%s5718_s1 + $0x1890] sm:$0xff] }
 0x197   :  { %2043 = vmatpush.msrb.mxu2 %v820_v40  ;;  %2062 = vmatpush.msrb.mxu3 %v837_v41  ;;  %v885_v40 = vld [vmem:[%s5718_s1 + $0x1908] sm:$0xff]  ;;  %v902_v41 = vld [vmem:[%s5718_s1 + $0x1990] sm:$0xff] }
 0x198   :  { %2004 = vmatmul.f32.vlgmr.msrb.gmra.mxu0 %v64_v42  ;;  %2044 = vmatmul.f32.vlgmr.msrb.gmra.mxu2 %v66_v43  ;;  %v852_v42 = vld [vmem:[%s5718_s1 + $0x1800] sm:$0xff]  ;;  %v869_v43 = vld [vmem:[%s5718_s1 + $0x1888] sm:$0xff] }
 0x199   :  { %2068 = vmatpush.msra.mxu0 %v867_v44  ;;  %2108 = vmatpush.msra.mxu2 %v899_v45  ;;  %v884_v44 = vld [vmem:[%s5718_s1 + $0x1900] sm:$0xff]  ;;  %v901_v45 = vld [vmem:[%s5718_s1 + $0x1988] sm:$0xff] }
 0x19a   :  { %2023 = vmatpush.msrb.mxu1 %v804_v46  ;;  %2063 = vmatpush.msrb.mxu3 %v836_v47  ;;  %v68_v46 = vld [vmem:[%s5719_s0 + $0x180] sm:$0xff]  ;;  %v70_v47 = vld [vmem:[%s5719_s0 + $0x190] sm:$0xff] }
 0x19b   :  { %2024 = vmatmul.f32.vlgmr.msrb.gmra.mxu1 %v65_v48  ;;  %2064 = vmatmul.f32.vlgmr.msrb.gmra.mxu3 %v67_v49  ;;  %v931_v48 = vld [vmem:[%s5718_s1 + $0x1a78] sm:$0xff] }
 0x19c   :  { %2069 = vmatpush.msra.mxu0 %v866_v50  ;;  %2088 = vmatpush.msra.mxu1 %v883_v51  ;;  %v963_v49 = vld [vmem:[%s5718_s1 + $0x1b78] sm:$0xff]  ;;  %v868_v50 = vld [vmem:[%s5718_s1 + $0x1880] sm:$0xff] }
 0x19d   :  { %2109 = vmatpush.msra.mxu2 %v898_v52  ;;  %2128 = vmatpush.msra.mxu3 %v915_v53  ;;  %v900_v51 = vld [vmem:[%s5718_s1 + $0x1980] sm:$0xff]  ;;  %v69_v52 = vld [vmem:[%s5719_s0 + $0x188] sm:$0xff]  ;;  %v71_v53 = vld [vmem:[%s5719_s0 + $0x198] sm:$0xff] }
 0x19e   :  { %2070 = vmatpush.msra.mxu0 %v865_v54  ;;  %2089 = vmatpush.msra.mxu1 %v882_v55  ;;  %v930_v54 = vld [vmem:[%s5718_s1 + $0x1a70] sm:$0xff]  ;;  %v947_v55 = vld [vmem:[%s5718_s1 + $0x1af8] sm:$0xff] }
 0x19f   :  { %2110 = vmatpush.msra.mxu2 %v897_v56  ;;  %2129 = vmatpush.msra.mxu3 %v914_v57  ;;  %v962_v56 = vld [vmem:[%s5718_s1 + $0x1b70] sm:$0xff]  ;;  %v979_v57 = vld [vmem:[%s5718_s1 + $0x1bf8] sm:$0xff] }
 0x1a0   :  { %2071 = vmatpush.msra.mxu0 %v864_v58  ;;  %2090 = vmatpush.msra.mxu1 %v881_v59  ;;  %v929_v58 = vld [vmem:[%s5718_s1 + $0x1a68] sm:$0xff]  ;;  %v946_v59 = vld [vmem:[%s5718_s1 + $0x1af0] sm:$0xff] }
 0x1a1   :  { %2111 = vmatpush.msra.mxu2 %v896_v60  ;;  %2130 = vmatpush.msra.mxu3 %v913_v61  ;;  %v961_v60 = vld [vmem:[%s5718_s1 + $0x1b68] sm:$0xff]  ;;  %v978_v61 = vld [vmem:[%s5718_s1 + $0x1bf0] sm:$0xff] }
 0x1a2   :  { %2072 = vmatpush.msra.mxu0 %v863_v62  ;;  %2091 = vmatpush.msra.mxu1 %v880_v63  ;;  %v928_v62 = vld [vmem:[%s5718_s1 + $0x1a60] sm:$0xff]  ;;  %v945_v63 = vld [vmem:[%s5718_s1 + $0x1ae8] sm:$0xff] }
 0x1a3   :  { %2112 = vmatpush.msra.mxu2 %v895_v0  ;;  %2131 = vmatpush.msra.mxu3 %v912_v1  ;;  %v960_v0 = vld [vmem:[%s5718_s1 + $0x1b60] sm:$0xff]  ;;  %v977_v1 = vld [vmem:[%s5718_s1 + $0x1be8] sm:$0xff] }
 0x1a4   :  { %2073 = vmatpush.msra.mxu0 %v862_v2  ;;  %2092 = vmatpush.msra.mxu1 %v879_v3  ;;  %v927_v2 = vld [vmem:[%s5718_s1 + $0x1a58] sm:$0xff]  ;;  %v944_v3 = vld [vmem:[%s5718_s1 + $0x1ae0] sm:$0xff] }
 0x1a5   :  { %2113 = vmatpush.msra.mxu2 %v894_v4  ;;  %2132 = vmatpush.msra.mxu3 %v911_v5  ;;  %v959_v4 = vld [vmem:[%s5718_s1 + $0x1b58] sm:$0xff]  ;;  %v976_v5 = vld [vmem:[%s5718_s1 + $0x1be0] sm:$0xff] }
 0x1a6   :  { %2074 = vmatpush.msra.mxu0 %v861_v6  ;;  %2093 = vmatpush.msra.mxu1 %v878_v7  ;;  %v926_v6 = vld [vmem:[%s5718_s1 + $0x1a50] sm:$0xff]  ;;  %v943_v7 = vld [vmem:[%s5718_s1 + $0x1ad8] sm:$0xff] }
 0x1a7   :  { %2114 = vmatpush.msra.mxu2 %v893_v8  ;;  %2133 = vmatpush.msra.mxu3 %v910_v9  ;;  %v958_v8 = vld [vmem:[%s5718_s1 + $0x1b50] sm:$0xff]  ;;  %v975_v9 = vld [vmem:[%s5718_s1 + $0x1bd8] sm:$0xff] }
 0x1a8   :  { %2075 = vmatpush.msra.mxu0 %v860_v10  ;;  %2094 = vmatpush.msra.mxu1 %v877_v11  ;;  %v925_v10 = vld [vmem:[%s5718_s1 + $0x1a48] sm:$0xff]  ;;  %v942_v11 = vld [vmem:[%s5718_s1 + $0x1ad0] sm:$0xff] }
 0x1a9   :  { %2115 = vmatpush.msra.mxu2 %v892_v12  ;;  %2134 = vmatpush.msra.mxu3 %v909_v13  ;;  %v957_v12 = vld [vmem:[%s5718_s1 + $0x1b48] sm:$0xff]  ;;  %v974_v13 = vld [vmem:[%s5718_s1 + $0x1bd0] sm:$0xff] }
 0x1aa   :  { %2076 = vmatpush.msra.mxu0 %v859_v14  ;;  %2095 = vmatpush.msra.mxu1 %v876_v15  ;;  %v924_v14 = vld [vmem:[%s5718_s1 + $0x1a40] sm:$0xff]  ;;  %v941_v15 = vld [vmem:[%s5718_s1 + $0x1ac8] sm:$0xff] }
 0x1ab   :  { %2116 = vmatpush.msra.mxu2 %v891_v16  ;;  %2135 = vmatpush.msra.mxu3 %v908_v17  ;;  %v956_v16 = vld [vmem:[%s5718_s1 + $0x1b40] sm:$0xff]  ;;  %v973_v17 = vld [vmem:[%s5718_s1 + $0x1bc8] sm:$0xff] }
 0x1ac   :  { %2077 = vmatpush.msra.mxu0 %v858_v18  ;;  %2096 = vmatpush.msra.mxu1 %v875_v19  ;;  %v923_v18 = vld [vmem:[%s5718_s1 + $0x1a38] sm:$0xff]  ;;  %v940_v19 = vld [vmem:[%s5718_s1 + $0x1ac0] sm:$0xff] }
 0x1ad   :  { %2117 = vmatpush.msra.mxu2 %v890_v20  ;;  %2136 = vmatpush.msra.mxu3 %v907_v21  ;;  %v955_v20 = vld [vmem:[%s5718_s1 + $0x1b38] sm:$0xff]  ;;  %v972_v21 = vld [vmem:[%s5718_s1 + $0x1bc0] sm:$0xff] }
 0x1ae   :  { %2078 = vmatpush.msra.mxu0 %v857_v22  ;;  %2097 = vmatpush.msra.mxu1 %v874_v23  ;;  %v922_v22 = vld [vmem:[%s5718_s1 + $0x1a30] sm:$0xff]  ;;  %v939_v23 = vld [vmem:[%s5718_s1 + $0x1ab8] sm:$0xff] }
 0x1af   :  { %2118 = vmatpush.msra.mxu2 %v889_v24  ;;  %2137 = vmatpush.msra.mxu3 %v906_v25  ;;  %v954_v24 = vld [vmem:[%s5718_s1 + $0x1b30] sm:$0xff]  ;;  %v971_v25 = vld [vmem:[%s5718_s1 + $0x1bb8] sm:$0xff] }
 0x1b0   :  { %2079 = vmatpush.msra.mxu0 %v856_v26  ;;  %2098 = vmatpush.msra.mxu1 %v873_v27  ;;  %v921_v26 = vld [vmem:[%s5718_s1 + $0x1a28] sm:$0xff]  ;;  %v938_v27 = vld [vmem:[%s5718_s1 + $0x1ab0] sm:$0xff] }
 0x1b1   :  { %2119 = vmatpush.msra.mxu2 %v888_v28  ;;  %2138 = vmatpush.msra.mxu3 %v905_v29  ;;  %v953_v28 = vld [vmem:[%s5718_s1 + $0x1b28] sm:$0xff]  ;;  %v970_v29 = vld [vmem:[%s5718_s1 + $0x1bb0] sm:$0xff] }
 0x1b2   :  { %2080 = vmatpush.msra.mxu0 %v855_v30  ;;  %2099 = vmatpush.msra.mxu1 %v872_v31  ;;  %v920_v30 = vld [vmem:[%s5718_s1 + $0x1a20] sm:$0xff]  ;;  %v937_v31 = vld [vmem:[%s5718_s1 + $0x1aa8] sm:$0xff] }
 0x1b3   :  { %2120 = vmatpush.msra.mxu2 %v887_v32  ;;  %2139 = vmatpush.msra.mxu3 %v904_v33  ;;  %v952_v32 = vld [vmem:[%s5718_s1 + $0x1b20] sm:$0xff]  ;;  %v969_v33 = vld [vmem:[%s5718_s1 + $0x1ba8] sm:$0xff] }
 0x1b4   :  { %2081 = vmatpush.msra.mxu0 %v854_v34  ;;  %2100 = vmatpush.msra.mxu1 %v871_v35  ;;  %v919_v34 = vld [vmem:[%s5718_s1 + $0x1a18] sm:$0xff]  ;;  %v936_v35 = vld [vmem:[%s5718_s1 + $0x1aa0] sm:$0xff] }
 0x1b5   :  { %2121 = vmatpush.msra.mxu2 %v886_v36  ;;  %2140 = vmatpush.msra.mxu3 %v903_v37  ;;  %v951_v36 = vld [vmem:[%s5718_s1 + $0x1b18] sm:$0xff]  ;;  %v968_v37 = vld [vmem:[%s5718_s1 + $0x1ba0] sm:$0xff] }
 0x1b6   :  { %2082 = vmatpush.msra.mxu0 %v853_v38  ;;  %2101 = vmatpush.msra.mxu1 %v870_v39  ;;  %v918_v38 = vld [vmem:[%s5718_s1 + $0x1a10] sm:$0xff]  ;;  %v935_v39 = vld [vmem:[%s5718_s1 + $0x1a98] sm:$0xff] }
 0x1b7   :  { %2122 = vmatpush.msra.mxu2 %v885_v40  ;;  %2141 = vmatpush.msra.mxu3 %v902_v41  ;;  %v950_v40 = vld [vmem:[%s5718_s1 + $0x1b10] sm:$0xff]  ;;  %v967_v41 = vld [vmem:[%s5718_s1 + $0x1b98] sm:$0xff] }
 0x1b8   :  { %2083 = vmatpush.msra.mxu0 %v852_v42  ;;  %2102 = vmatpush.msra.mxu1 %v869_v43  ;;  %v917_v42 = vld [vmem:[%s5718_s1 + $0x1a08] sm:$0xff]  ;;  %v934_v43 = vld [vmem:[%s5718_s1 + $0x1a90] sm:$0xff] }
 0x1b9   :  { %2123 = vmatpush.msra.mxu2 %v884_v44  ;;  %2142 = vmatpush.msra.mxu3 %v901_v45  ;;  %v949_v44 = vld [vmem:[%s5718_s1 + $0x1b08] sm:$0xff]  ;;  %v966_v45 = vld [vmem:[%s5718_s1 + $0x1b90] sm:$0xff] }
 0x1ba   :  { %2084 = vmatmul.f32.vlgmr.msra.gmra.mxu0 %v68_v46  ;;  %2124 = vmatmul.f32.vlgmr.msra.gmra.mxu2 %v70_v47  ;;  %v916_v46 = vld [vmem:[%s5718_s1 + $0x1a00] sm:$0xff]  ;;  %v933_v47 = vld [vmem:[%s5718_s1 + $0x1a88] sm:$0xff] }
 0x1bb   :  { %2148 = vmatpush.msrb.mxu0 %v931_v48  ;;  %2188 = vmatpush.msrb.mxu2 %v963_v49  ;;  %v948_v48 = vld [vmem:[%s5718_s1 + $0x1b00] sm:$0xff]  ;;  %v965_v49 = vld [vmem:[%s5718_s1 + $0x1b88] sm:$0xff] }
 0x1bc   :  { %2103 = vmatpush.msra.mxu1 %v868_v50  ;;  %2143 = vmatpush.msra.mxu3 %v900_v51  ;;  %v72_v50 = vld [vmem:[%s5719_s0 + $0x1a0] sm:$0xff]  ;;  %v74_v51 = vld [vmem:[%s5719_s0 + $0x1b0] sm:$0xff] }
 0x1bd   :  { %2104 = vmatmul.f32.vlgmr.msra.gmra.mxu1 %v69_v52  ;;  %2144 = vmatmul.f32.vlgmr.msra.gmra.mxu3 %v71_v53  ;;  %v995_v52 = vld [vmem:[%s5718_s1 + $0x1c78] sm:$0xff] }
 0x1be   :  { %2149 = vmatpush.msrb.mxu0 %v930_v54  ;;  %2168 = vmatpush.msrb.mxu1 %v947_v55  ;;  %v1027_v53 = vld [vmem:[%s5718_s1 + $0x1d78] sm:$0xff]  ;;  %v932_v54 = vld [vmem:[%s5718_s1 + $0x1a80] sm:$0xff] }
 0x1bf   :  { %2189 = vmatpush.msrb.mxu2 %v962_v56  ;;  %2208 = vmatpush.msrb.mxu3 %v979_v57  ;;  %v964_v55 = vld [vmem:[%s5718_s1 + $0x1b80] sm:$0xff]  ;;  %v73_v56 = vld [vmem:[%s5719_s0 + $0x1a8] sm:$0xff]  ;;  %v75_v57 = vld [vmem:[%s5719_s0 + $0x1b8] sm:$0xff] }
 0x1c0   :  { %2150 = vmatpush.msrb.mxu0 %v929_v58  ;;  %2169 = vmatpush.msrb.mxu1 %v946_v59  ;;  %v994_v58 = vld [vmem:[%s5718_s1 + $0x1c70] sm:$0xff]  ;;  %v1011_v59 = vld [vmem:[%s5718_s1 + $0x1cf8] sm:$0xff] }
 0x1c1   :  { %2190 = vmatpush.msrb.mxu2 %v961_v60  ;;  %2209 = vmatpush.msrb.mxu3 %v978_v61  ;;  %v1026_v60 = vld [vmem:[%s5718_s1 + $0x1d70] sm:$0xff]  ;;  %v1043_v61 = vld [vmem:[%s5718_s1 + $0x1df8] sm:$0xff] }
 0x1c2   :  { %2151 = vmatpush.msrb.mxu0 %v928_v62  ;;  %2170 = vmatpush.msrb.mxu1 %v945_v63  ;;  %v993_v62 = vld [vmem:[%s5718_s1 + $0x1c68] sm:$0xff]  ;;  %v1010_v63 = vld [vmem:[%s5718_s1 + $0x1cf0] sm:$0xff] }
 0x1c3   :  { %2191 = vmatpush.msrb.mxu2 %v960_v0  ;;  %2210 = vmatpush.msrb.mxu3 %v977_v1  ;;  %v1025_v0 = vld [vmem:[%s5718_s1 + $0x1d68] sm:$0xff]  ;;  %v1042_v1 = vld [vmem:[%s5718_s1 + $0x1df0] sm:$0xff] }
 0x1c4   :  { %2152 = vmatpush.msrb.mxu0 %v927_v2  ;;  %2171 = vmatpush.msrb.mxu1 %v944_v3  ;;  %v992_v2 = vld [vmem:[%s5718_s1 + $0x1c60] sm:$0xff]  ;;  %v1009_v3 = vld [vmem:[%s5718_s1 + $0x1ce8] sm:$0xff] }
 0x1c5   :  { %2192 = vmatpush.msrb.mxu2 %v959_v4  ;;  %2211 = vmatpush.msrb.mxu3 %v976_v5  ;;  %v1024_v4 = vld [vmem:[%s5718_s1 + $0x1d60] sm:$0xff]  ;;  %v1041_v5 = vld [vmem:[%s5718_s1 + $0x1de8] sm:$0xff] }
 0x1c6   :  { %2153 = vmatpush.msrb.mxu0 %v926_v6  ;;  %2172 = vmatpush.msrb.mxu1 %v943_v7  ;;  %v991_v6 = vld [vmem:[%s5718_s1 + $0x1c58] sm:$0xff]  ;;  %v1008_v7 = vld [vmem:[%s5718_s1 + $0x1ce0] sm:$0xff] }
 0x1c7   :  { %2193 = vmatpush.msrb.mxu2 %v958_v8  ;;  %2212 = vmatpush.msrb.mxu3 %v975_v9  ;;  %v1023_v8 = vld [vmem:[%s5718_s1 + $0x1d58] sm:$0xff]  ;;  %v1040_v9 = vld [vmem:[%s5718_s1 + $0x1de0] sm:$0xff] }
 0x1c8   :  { %2154 = vmatpush.msrb.mxu0 %v925_v10  ;;  %2173 = vmatpush.msrb.mxu1 %v942_v11  ;;  %v1145_v10 = vpop.f32.mrf.mxu1  ;;  %v990_v11 = vld [vmem:[%s5718_s1 + $0x1c50] sm:$0xff] }
 0x1c9   :  { %2194 = vmatpush.msrb.mxu2 %v957_v12  ;;  %2213 = vmatpush.msrb.mxu3 %v974_v13  ;;  %v1007_v12 = vld [vmem:[%s5718_s1 + $0x1cd8] sm:$0xff]  ;;  %v1022_v13 = vld [vmem:[%s5718_s1 + $0x1d50] sm:$0xff] }
 0x1ca   :  { %2155 = vmatpush.msrb.mxu0 %v924_v14  ;;  %2174 = vmatpush.msrb.mxu1 %v941_v15  ;;  %v1039_v14 = vld [vmem:[%s5718_s1 + $0x1dd8] sm:$0xff]  ;;  %v1125_v15 = vpop.f32.mrf.mxu0 }
 0x1cb   :  { %2195 = vmatpush.msrb.mxu2 %v956_v16  ;;  %2214 = vmatpush.msrb.mxu3 %v973_v17  ;;  %v989_v16 = vld [vmem:[%s5718_s1 + $0x1c48] sm:$0xff]  ;;  %v1006_v17 = vld [vmem:[%s5718_s1 + $0x1cd0] sm:$0xff] }
 0x1cc   :  { %2156 = vmatpush.msrb.mxu0 %v923_v18  ;;  %2175 = vmatpush.msrb.mxu1 %v940_v19  ;;  %v1146_v18 = vadd.f32 %v1145_v10, %v1125_v15  ;;  %v1021_v19 = vld [vmem:[%s5718_s1 + $0x1d48] sm:$0xff] }
 0x1cd   :  { %2196 = vmatpush.msrb.mxu2 %v955_v20  ;;  %2215 = vmatpush.msrb.mxu3 %v972_v21  ;;  %v1038_v20 = vld [vmem:[%s5718_s1 + $0x1dd0] sm:$0xff]  ;;  %v1165_v21 = vpop.f32.mrf.mxu2  ;;  %v77_v10 = vld [vmem:[%s5719_s0 + $0x1c8] sm:$0xff] }
 0x1ce   :  { %2157 = vmatpush.msrb.mxu0 %v922_v22  ;;  %2176 = vmatpush.msrb.mxu1 %v939_v23  ;;  %v988_v22 = vld [vmem:[%s5718_s1 + $0x1c40] sm:$0xff]  ;;  %v1005_v23 = vld [vmem:[%s5718_s1 + $0x1cc8] sm:$0xff] }
 0x1cf   :  { %2197 = vmatpush.msrb.mxu2 %v954_v24  ;;  %2216 = vmatpush.msrb.mxu3 %v971_v25  ;;  %v1020_v24 = vld [vmem:[%s5718_s1 + $0x1d40] sm:$0xff]  ;;  %v1037_v25 = vld [vmem:[%s5718_s1 + $0x1dc8] sm:$0xff] }
 0x1d0   :  { %2158 = vmatpush.msrb.mxu0 %v921_v26  ;;  %2177 = vmatpush.msrb.mxu1 %v938_v27  ;;  %v987_v26 = vld [vmem:[%s5718_s1 + $0x1c38] sm:$0xff]  ;;  %v1004_v27 = vld [vmem:[%s5718_s1 + $0x1cc0] sm:$0xff] }
 0x1d1   :  { %2198 = vmatpush.msrb.mxu2 %v953_v28  ;;  %2217 = vmatpush.msrb.mxu3 %v970_v29  ;;  %v1166_v28 = vadd.f32 %v1165_v21, %v1146_v18  ;;  %v1019_v29 = vld [vmem:[%s5718_s1 + $0x1d38] sm:$0xff]  ;;  %v1057_v18 = vld [vmem:[%s5718_s1 + $0x1e68] sm:$0xff] }
 0x1d2   :  { %2159 = vmatpush.msrb.mxu0 %v920_v30  ;;  %2178 = vmatpush.msrb.mxu1 %v937_v31  ;;  %v1036_v30 = vld [vmem:[%s5718_s1 + $0x1dc0] sm:$0xff]  ;;  %v1185_v31 = vpop.f32.mrf.mxu3  ;;  %v1089_v21 = vld [vmem:[%s5718_s1 + $0x1f68] sm:$0xff] }
 0x1d3   :  { %2199 = vmatpush.msrb.mxu2 %v952_v32  ;;  %2218 = vmatpush.msrb.mxu3 %v969_v33  ;;  %v986_v32 = vld [vmem:[%s5718_s1 + $0x1c30] sm:$0xff]  ;;  %v1003_v33 = vld [vmem:[%s5718_s1 + $0x1cb8] sm:$0xff] }
 0x1d4   :  { %2160 = vmatpush.msrb.mxu0 %v919_v34  ;;  %2179 = vmatpush.msrb.mxu1 %v936_v35  ;;  %v1018_v34 = vld [vmem:[%s5718_s1 + $0x1d30] sm:$0xff]  ;;  %v1035_v35 = vld [vmem:[%s5718_s1 + $0x1db8] sm:$0xff] }
 0x1d5   :  { %2200 = vmatpush.msrb.mxu2 %v951_v36  ;;  %2219 = vmatpush.msrb.mxu3 %v968_v37  ;;  %v985_v36 = vld [vmem:[%s5718_s1 + $0x1c28] sm:$0xff]  ;;  %v1002_v37 = vld [vmem:[%s5718_s1 + $0x1cb0] sm:$0xff] }
 0x1d6   :  { %2161 = vmatpush.msrb.mxu0 %v918_v38  ;;  %2180 = vmatpush.msrb.mxu1 %v935_v39  ;;  %v1186_v38 = vadd.f32 %v1185_v31, %v1166_v28  ;;  %v1017_v39 = vld [vmem:[%s5718_s1 + $0x1d28] sm:$0xff] }
 0x1d7   :  { %2201 = vmatpush.msrb.mxu2 %v950_v40  ;;  %2220 = vmatpush.msrb.mxu3 %v967_v41  ;;  %v1034_v40 = vld [vmem:[%s5718_s1 + $0x1db0] sm:$0xff]  ;;  %v1205_v41 = vpop.f32.mrf.mxu0 }
 0x1d8   :  { %2162 = vmatpush.msrb.mxu0 %v917_v42  ;;  %2181 = vmatpush.msrb.mxu1 %v934_v43  ;;  %v984_v42 = vld [vmem:[%s5718_s1 + $0x1c20] sm:$0xff]  ;;  %v1001_v43 = vld [vmem:[%s5718_s1 + $0x1ca8] sm:$0xff] }
 0x1d9   :  { %2202 = vmatpush.msrb.mxu2 %v949_v44  ;;  %2221 = vmatpush.msrb.mxu3 %v966_v45  ;;  %v1016_v44 = vld [vmem:[%s5718_s1 + $0x1d20] sm:$0xff]  ;;  %v1033_v45 = vld [vmem:[%s5718_s1 + $0x1da8] sm:$0xff] }
 0x1da   :  { %2163 = vmatpush.msrb.mxu0 %v916_v46  ;;  %2182 = vmatpush.msrb.mxu1 %v933_v47  ;;  %v983_v46 = vld [vmem:[%s5718_s1 + $0x1c18] sm:$0xff]  ;;  %v1000_v47 = vld [vmem:[%s5718_s1 + $0x1ca0] sm:$0xff] }
 0x1db   :  { %2203 = vmatpush.msrb.mxu2 %v948_v48  ;;  %2222 = vmatpush.msrb.mxu3 %v965_v49  ;;  %v1206_v48 = vadd.f32 %v1205_v41, %v1186_v38  ;;  %v1015_v49 = vld [vmem:[%s5718_s1 + $0x1d18] sm:$0xff]  ;;  %v1070_v41 = vld [vmem:[%s5718_s1 + $0x1ed0] sm:$0xff] }
 0x1dc   :  { %2164 = vmatmul.f32.vlgmr.msrb.gmra.mxu0 %v72_v50  ;;  %2204 = vmatmul.f32.vlgmr.msrb.gmra.mxu2 %v74_v51  ;;  %v1032_v50 = vld [vmem:[%s5718_s1 + $0x1da0] sm:$0xff]  ;;  %v1225_v51 = vpop.f32.mrf.mxu1  ;;  %v1103_v38 = vld [vmem:[%s5718_s1 + $0x1fd8] sm:$0xff] }
 0x1dd   :  { %2228 = vmatpush.msra.mxu0 %v995_v52  ;;  %2268 = vmatpush.msra.mxu2 %v1027_v53  ;;  %v982_v52 = vld [vmem:[%s5718_s1 + $0x1c10] sm:$0xff]  ;;  %v999_v53 = vld [vmem:[%s5718_s1 + $0x1c98] sm:$0xff] }
 0x1de   :  { %2183 = vmatpush.msrb.mxu1 %v932_v54  ;;  %2223 = vmatpush.msrb.mxu3 %v964_v55  ;;  %v1014_v54 = vld [vmem:[%s5718_s1 + $0x1d10] sm:$0xff]  ;;  %v1031_v55 = vld [vmem:[%s5718_s1 + $0x1d98] sm:$0xff] }
 0x1df   :  { %2184 = vmatmul.f32.vlgmr.msrb.gmra.mxu1 %v73_v56  ;;  %2224 = vmatmul.f32.vlgmr.msrb.gmra.mxu3 %v75_v57  ;;  %v981_v56 = vld [vmem:[%s5718_s1 + $0x1c08] sm:$0xff]  ;;  %v998_v57 = vld [vmem:[%s5718_s1 + $0x1c90] sm:$0xff] }
 0x1e0   :  { %2229 = vmatpush.msra.mxu0 %v994_v58  ;;  %2248 = vmatpush.msra.mxu1 %v1011_v59  ;;  %v1226_v58 = vadd.f32 %v1225_v51, %v1206_v48  ;;  %v1013_v59 = vld [vmem:[%s5718_s1 + $0x1d08] sm:$0xff]  ;;  %v1084_v48 = vld [vmem:[%s5718_s1 + $0x1f40] sm:$0xff] }
 0x1e1   :  { %2269 = vmatpush.msra.mxu2 %v1026_v60  ;;  %2288 = vmatpush.msra.mxu3 %v1043_v61  ;;  %v1030_v60 = vld [vmem:[%s5718_s1 + $0x1d90] sm:$0xff]  ;;  %v1245_v61 = vpop.f32.mrf.mxu2  ;;  %v1068_v51 = vld [vmem:[%s5718_s1 + $0x1ec0] sm:$0xff] }
 0x1e2   :  { %2230 = vmatpush.msra.mxu0 %v993_v62  ;;  %2249 = vmatpush.msra.mxu1 %v1010_v63  ;;  %v980_v62 = vld [vmem:[%s5718_s1 + $0x1c00] sm:$0xff]  ;;  %v997_v63 = vld [vmem:[%s5718_s1 + $0x1c88] sm:$0xff] }
 0x1e3   :  { %2270 = vmatpush.msra.mxu2 %v1025_v0  ;;  %2289 = vmatpush.msra.mxu3 %v1042_v1  ;;  %v1012_v0 = vld [vmem:[%s5718_s1 + $0x1d00] sm:$0xff]  ;;  %v1029_v1 = vld [vmem:[%s5718_s1 + $0x1d88] sm:$0xff] }
 0x1e4   :  { %2231 = vmatpush.msra.mxu0 %v992_v2  ;;  %2250 = vmatpush.msra.mxu1 %v1009_v3  ;;  %v76_v2 = vld [vmem:[%s5719_s0 + $0x1c0] sm:$0xff]  ;;  %v78_v3 = vld [vmem:[%s5719_s0 + $0x1d0] sm:$0xff] }
 0x1e5   :  { %2271 = vmatpush.msra.mxu2 %v1024_v4  ;;  %2290 = vmatpush.msra.mxu3 %v1041_v5  ;;  %v1246_v4 = vadd.f32 %v1245_v61, %v1226_v58  ;;  %v1059_v5 = vld [vmem:[%s5718_s1 + $0x1e78] sm:$0xff]  ;;  %v1082_v58 = vld [vmem:[%s5718_s1 + $0x1f30] sm:$0xff]  ;;  %v1049_v61 = vld [vmem:[%s5718_s1 + $0x1e28] sm:$0xff] }
 0x1e6   :  { %2232 = vmatpush.msra.mxu0 %v991_v6  ;;  %2251 = vmatpush.msra.mxu1 %v1008_v7  ;;  %v1091_v6 = vld [vmem:[%s5718_s1 + $0x1f78] sm:$0xff]  ;;  %v1265_v7 = vpop.f32.mrf.mxu3 }
 0x1e7   :  { %2272 = vmatpush.msra.mxu2 %v1023_v8  ;;  %2291 = vmatpush.msra.mxu3 %v1040_v9  ;;  %v996_v8 = vld [vmem:[%s5718_s1 + $0x1c80] sm:$0xff]  ;;  %v1266_v15 = vadd.f32 %v1265_v7, %v1246_v4 }
 0x1e8   :  { %2233 = vmatpush.msra.mxu0 %v990_v11  ;;  %2252 = vmatpush.msra.mxu1 %v1007_v12  ;;  %v1028_v9 = vld [vmem:[%s5718_s1 + $0x1d80] sm:$0xff]  ;;  %v79_v11 = vld [vmem:[%s5719_s0 + $0x1d8] sm:$0xff]  ;;  %v1285_v12 = vpop.f32.mrf.mxu0 }
 0x1e9   :  { %2273 = vmatpush.msra.mxu2 %v1022_v13  ;;  %2292 = vmatpush.msra.mxu3 %v1039_v14  ;;  %v1058_v13 = vld [vmem:[%s5718_s1 + $0x1e70] sm:$0xff]  ;;  %v1075_v14 = vld [vmem:[%s5718_s1 + $0x1ef8] sm:$0xff]  ;;  %v1325_v28 = vpop.f32.mrf.mxu2 }
 0x1ea   :  { %2234 = vmatpush.msra.mxu0 %v989_v16  ;;  %2253 = vmatpush.msra.mxu1 %v1006_v17  ;;  %v1090_v16 = vld [vmem:[%s5718_s1 + $0x1f70] sm:$0xff]  ;;  %v1107_v17 = vld [vmem:[%s5718_s1 + $0x1ff8] sm:$0xff] }
 0x1eb   :  { %2274 = vmatpush.msra.mxu2 %v1021_v19  ;;  %2293 = vmatpush.msra.mxu3 %v1038_v20  ;;  %v1074_v19 = vld [vmem:[%s5718_s1 + $0x1ef0] sm:$0xff]  ;;  %v1286_v20 = vadd.f32 %v1285_v12, %v1266_v15 }
 0x1ec   :  { %2235 = vmatpush.msra.mxu0 %v988_v22  ;;  %2254 = vmatpush.msra.mxu1 %v1005_v23  ;;  %v1106_v22 = vld [vmem:[%s5718_s1 + $0x1ff0] sm:$0xff]  ;;  %v1305_v23 = vpop.f32.mrf.mxu1 }
 0x1ed   :  { %2275 = vmatpush.msra.mxu2 %v1020_v24  ;;  %2294 = vmatpush.msra.mxu3 %v1037_v25  ;;  %v1056_v24 = vld [vmem:[%s5718_s1 + $0x1e60] sm:$0xff]  ;;  %v1073_v25 = vld [vmem:[%s5718_s1 + $0x1ee8] sm:$0xff]  ;;  %v1306_v31 = vadd.f32 %v1305_v23, %v1286_v20 }
 0x1ee   :  { %2236 = vmatpush.msra.mxu0 %v987_v26  ;;  %2255 = vmatpush.msra.mxu1 %v1004_v27  ;;  %v1088_v26 = vld [vmem:[%s5718_s1 + $0x1f60] sm:$0xff]  ;;  %v1105_v27 = vld [vmem:[%s5718_s1 + $0x1fe8] sm:$0xff] }
 0x1ef   :  { %2276 = vmatpush.msra.mxu2 %v1019_v29  ;;  %2295 = vmatpush.msra.mxu3 %v1036_v30  ;;  %v1055_v29 = vld [vmem:[%s5718_s1 + $0x1e58] sm:$0xff]  ;;  %v1072_v30 = vld [vmem:[%s5718_s1 + $0x1ee0] sm:$0xff] }
 0x1f0   :  { %2237 = vmatpush.msra.mxu0 %v986_v32  ;;  %2256 = vmatpush.msra.mxu1 %v1003_v33  ;;  %v1087_v32 = vld [vmem:[%s5718_s1 + $0x1f58] sm:$0xff]  ;;  %v1104_v33 = vld [vmem:[%s5718_s1 + $0x1fe0] sm:$0xff] }
 0x1f1   :  { %2277 = vmatpush.msra.mxu2 %v1018_v34  ;;  %2296 = vmatpush.msra.mxu3 %v1035_v35  ;;  %v1054_v34 = vld [vmem:[%s5718_s1 + $0x1e50] sm:$0xff]  ;;  %v1071_v35 = vld [vmem:[%s5718_s1 + $0x1ed8] sm:$0xff] }
 0x1f2   :  { %2238 = vmatpush.msra.mxu0 %v985_v36  ;;  %2257 = vmatpush.msra.mxu1 %v1002_v37  ;;  %v1326_v36 = vadd.f32 %v1325_v28, %v1306_v31  ;;  %v1086_v37 = vld [vmem:[%s5718_s1 + $0x1f50] sm:$0xff] }
 0x1f3   :  { %2278 = vmatpush.msra.mxu2 %v1017_v39  ;;  %2297 = vmatpush.msra.mxu3 %v1034_v40  ;;  %v1345_v39 = vpop.f32.mrf.mxu3  ;;  %v1053_v40 = vld [vmem:[%s5718_s1 + $0x1e48] sm:$0xff] }
 0x1f4   :  { %2239 = vmatpush.msra.mxu0 %v984_v42  ;;  %2258 = vmatpush.msra.mxu1 %v1001_v43  ;;  %v1085_v42 = vld [vmem:[%s5718_s1 + $0x1f48] sm:$0xff]  ;;  %v1102_v43 = vld [vmem:[%s5718_s1 + $0x1fd0] sm:$0xff] }
 0x1f5   :  { %2279 = vmatpush.msra.mxu2 %v1016_v44  ;;  %2298 = vmatpush.msra.mxu3 %v1033_v45  ;;  %v1365_v44 = vpop.f32.mrf.mxu0  ;;  %v1052_v45 = vld [vmem:[%s5718_s1 + $0x1e40] sm:$0xff] }
 0x1f6   :  { %2240 = vmatpush.msra.mxu0 %v983_v46  ;;  %2259 = vmatpush.msra.mxu1 %v1000_v47  ;;  %v1069_v46 = vld [vmem:[%s5718_s1 + $0x1ec8] sm:$0xff]  ;;  %v1346_v47 = vadd.f32 %v1345_v39, %v1326_v36 }
 0x1f7   :  { %2280 = vmatpush.msra.mxu2 %v1015_v49  ;;  %2299 = vmatpush.msra.mxu3 %v1032_v50  ;;  %v1101_v49 = vld [vmem:[%s5718_s1 + $0x1fc8] sm:$0xff]  ;;  %v1051_v50 = vld [vmem:[%s5718_s1 + $0x1e38] sm:$0xff] }
 0x1f8   :  { %2241 = vmatpush.msra.mxu0 %v982_v52  ;;  %2260 = vmatpush.msra.mxu1 %v999_v53  ;;  %v1366_v52 = vadd.f32 %v1365_v44, %v1346_v47  ;;  %v1083_v53 = vld [vmem:[%s5718_s1 + $0x1f38] sm:$0xff] }
 0x1f9   :  { %2281 = vmatpush.msra.mxu2 %v1014_v54  ;;  %2300 = vmatpush.msra.mxu3 %v1031_v55  ;;  %v1100_v54 = vld [vmem:[%s5718_s1 + $0x1fc0] sm:$0xff]  ;;  %v1385_v55 = vpop.f32.mrf.mxu1 }
 0x1fa   :  { %2242 = vmatpush.msra.mxu0 %v981_v56  ;;  %2261 = vmatpush.msra.mxu1 %v998_v57  ;;  %v1050_v56 = vld [vmem:[%s5718_s1 + $0x1e30] sm:$0xff]  ;;  %v1067_v57 = vld [vmem:[%s5718_s1 + $0x1eb8] sm:$0xff] }
 0x1fb   :  { %2282 = vmatpush.msra.mxu2 %v1013_v59  ;;  %2301 = vmatpush.msra.mxu3 %v1030_v60  ;;  %v1099_v59 = vld [vmem:[%s5718_s1 + $0x1fb8] sm:$0xff]  ;;  %v1405_v60 = vpop.f32.mrf.mxu2  ;;  %v1425_v7 = vpop.f32.mrf.mxu3 }
 0x1fc   :  { %2243 = vmatpush.msra.mxu0 %v980_v62  ;;  %2262 = vmatpush.msra.mxu1 %v997_v63  ;;  %v1066_v62 = vld [vmem:[%s5718_s1 + $0x1eb0] sm:$0xff]  ;;  %v1386_v63 = vadd.f32 %v1385_v55, %v1366_v52 }
 0x1fd   :  { %2283 = vmatpush.msra.mxu2 %v1012_v0  ;;  %2302 = vmatpush.msra.mxu3 %v1029_v1  ;;  %v1081_v0 = vld [vmem:[%s5718_s1 + $0x1f28] sm:$0xff]  ;;  %v1098_v1 = vld [vmem:[%s5718_s1 + $0x1fb0] sm:$0xff]  ;;  %v1445_v12 = vpop.f32.mrf.mxu0 }
 0x1fe   :  { %2244 = vmatmul.f32.vlgmr.msra.gmra.mxu0 %v76_v2  ;;  %2284 = vmatmul.f32.vlgmr.msra.gmra.mxu2 %v78_v3  ;;  %v1048_v2 = vld [vmem:[%s5718_s1 + $0x1e20] sm:$0xff]  ;;  %v1065_v3 = vld [vmem:[%s5718_s1 + $0x1ea8] sm:$0xff]  ;;  %v1406_v4 = vadd.f32 %v1405_v60, %v1386_v63 }
 0x1ff   :  { %2308 = vmatpush.msrb.mxu0 %v1059_v5  ;;  %2348 = vmatpush.msrb.mxu2 %v1091_v6  ;;  %v1080_v5 = vld [vmem:[%s5718_s1 + $0x1f20] sm:$0xff]  ;;  %v1097_v6 = vld [vmem:[%s5718_s1 + $0x1fa8] sm:$0xff] }
 0x200   :  { %2263 = vmatpush.msra.mxu1 %v996_v8  ;;  %2303 = vmatpush.msra.mxu3 %v1028_v9  ;;  %v1047_v8 = vld [vmem:[%s5718_s1 + $0x1e18] sm:$0xff]  ;;  %v1064_v9 = vld [vmem:[%s5718_s1 + $0x1ea0] sm:$0xff]  ;;  %v1426_v15 = vadd.f32 %v1425_v7, %v1406_v4 }
 0x201   :  { %2264 = vmatmul.f32.vlgmr.msra.gmra.mxu1 %v77_v10  ;;  %2304 = vmatmul.f32.vlgmr.msra.gmra.mxu3 %v79_v11  ;;  %v1079_v10 = vld [vmem:[%s5718_s1 + $0x1f18] sm:$0xff]  ;;  %v1096_v11 = vld [vmem:[%s5718_s1 + $0x1fa0] sm:$0xff]  ;;  %v1465_v23 = vpop.f32.mrf.mxu1 }
 0x202   :  { %2309 = vmatpush.msrb.mxu0 %v1058_v13  ;;  %2328 = vmatpush.msrb.mxu1 %v1075_v14  ;;  %v1046_v13 = vld [vmem:[%s5718_s1 + $0x1e10] sm:$0xff]  ;;  %v1063_v14 = vld [vmem:[%s5718_s1 + $0x1e98] sm:$0xff]  ;;  %v1446_v20 = vadd.f32 %v1445_v12, %v1426_v15 }
 0x203   :  { %2349 = vmatpush.msrb.mxu2 %v1090_v16  ;;  %2368 = vmatpush.msrb.mxu3 %v1107_v17  ;;  %v1078_v16 = vld [vmem:[%s5718_s1 + $0x1f10] sm:$0xff]  ;;  %v1095_v17 = vld [vmem:[%s5718_s1 + $0x1f98] sm:$0xff]  ;;  %v1485_v28 = vpop.f32.mrf.mxu2 }
 0x204   :  { %2310 = vmatpush.msrb.mxu0 %v1057_v18  ;;  %2329 = vmatpush.msrb.mxu1 %v1074_v19  ;;  %v1045_v18 = vld [vmem:[%s5718_s1 + $0x1e08] sm:$0xff]  ;;  %v1062_v19 = vld [vmem:[%s5718_s1 + $0x1e90] sm:$0xff]  ;;  %v1466_v31 = vadd.f32 %v1465_v23, %v1446_v20 }
 0x205   :  { %2350 = vmatpush.msrb.mxu2 %v1089_v21  ;;  %2369 = vmatpush.msrb.mxu3 %v1106_v22  ;;  %v1077_v21 = vld [vmem:[%s5718_s1 + $0x1f08] sm:$0xff]  ;;  %v1094_v22 = vld [vmem:[%s5718_s1 + $0x1f90] sm:$0xff] }
 0x206   :  { %2311 = vmatpush.msrb.mxu0 %v1056_v24  ;;  %2330 = vmatpush.msrb.mxu1 %v1073_v25  ;;  %v1044_v24 = vld [vmem:[%s5718_s1 + $0x1e00] sm:$0xff]  ;;  %v1061_v25 = vld [vmem:[%s5718_s1 + $0x1e88] sm:$0xff]  ;;  %v1486_v36 = vadd.f32 %v1485_v28, %v1466_v31 }
 0x207   :  { %2351 = vmatpush.msrb.mxu2 %v1088_v26  ;;  %2370 = vmatpush.msrb.mxu3 %v1105_v27  ;;  %v1076_v26 = vld [vmem:[%s5718_s1 + $0x1f00] sm:$0xff]  ;;  %v1093_v27 = vld [vmem:[%s5718_s1 + $0x1f88] sm:$0xff] }
 0x208   :  { %2312 = vmatpush.msrb.mxu0 %v1055_v29  ;;  %2331 = vmatpush.msrb.mxu1 %v1072_v30  ;;  %v80_v29 = vld [vmem:[%s5719_s0 + $0x1e0] sm:$0xff]  ;;  %v82_v30 = vld [vmem:[%s5719_s0 + $0x1f0] sm:$0xff] }
 0x209   :  { %2352 = vmatpush.msrb.mxu2 %v1087_v32  ;;  %2371 = vmatpush.msrb.mxu3 %v1104_v33  ;;  %v1060_v32 = vld [vmem:[%s5718_s1 + $0x1e80] sm:$0xff] }
 0x20a   :  { %2313 = vmatpush.msrb.mxu0 %v1054_v34  ;;  %2332 = vmatpush.msrb.mxu1 %v1071_v35  ;;  %v1092_v33 = vld [vmem:[%s5718_s1 + $0x1f80] sm:$0xff]  ;;  %v81_v34 = vld [vmem:[%s5719_s0 + $0x1e8] sm:$0xff]  ;;  %v83_v35 = vld [vmem:[%s5719_s0 + $0x1f8] sm:$0xff] }
 0x20b   :  { %2353 = vmatpush.msrb.mxu2 %v1086_v37  ;;  %2372 = vmatpush.msrb.mxu3 %v1103_v38  ;;  %v1505_v37 = vpop.f32.mrf.mxu3  ;;  %v1525_v38 = vpop.f32.mrf.mxu0 }
 0x20c   :  { %2314 = vmatpush.msrb.mxu0 %v1053_v40  ;;  %2333 = vmatpush.msrb.mxu1 %v1070_v41  ;;  %v1506_v39 = vadd.f32 %v1505_v37, %v1486_v36  ;;  %v1545_v41 = vpop.f32.mrf.mxu1 }
 0x20d   :  { %2354 = vmatpush.msrb.mxu2 %v1085_v42  ;;  %2373 = vmatpush.msrb.mxu3 %v1102_v43  ;;  %v1565_v42 = vpop.f32.mrf.mxu2 }
 0x20e   :  { %2315 = vmatpush.msrb.mxu0 %v1052_v45  ;;  %2334 = vmatpush.msrb.mxu1 %v1069_v46  ;;  %v1526_v40 = vadd.f32 %v1525_v38, %v1506_v39 }
 0x20f   :  { %2355 = vmatpush.msrb.mxu2 %v1084_v48  ;;  %2374 = vmatpush.msrb.mxu3 %v1101_v49 }
 0x210   :  { %2316 = vmatpush.msrb.mxu0 %v1051_v50  ;;  %2335 = vmatpush.msrb.mxu1 %v1068_v51  ;;  %v1546_v43 = vadd.f32 %v1545_v41, %v1526_v40 }
 0x211   :  { %2356 = vmatpush.msrb.mxu2 %v1083_v53  ;;  %2375 = vmatpush.msrb.mxu3 %v1100_v54 }
 0x212   :  { %2317 = vmatpush.msrb.mxu0 %v1050_v56  ;;  %2336 = vmatpush.msrb.mxu1 %v1067_v57  ;;  %v1566_v44 = vadd.f32 %v1565_v42, %v1546_v43 }
 0x213   :  { %2357 = vmatpush.msrb.mxu2 %v1082_v58  ;;  %2376 = vmatpush.msrb.mxu3 %v1099_v59  ;;  %v1585_v45 = vpop.f32.mrf.mxu3  ;;  %v1605_v46 = vpop.f32.mrf.mxu0 }
 0x214   :  { %2318 = vmatpush.msrb.mxu0 %v1049_v61  ;;  %2337 = vmatpush.msrb.mxu1 %v1066_v62  ;;  %v1586_v47 = vadd.f32 %v1585_v45, %v1566_v44  ;;  %v1625_v49 = vpop.f32.mrf.mxu1 }
 0x215   :  { %2358 = vmatpush.msrb.mxu2 %v1081_v0  ;;  %2377 = vmatpush.msrb.mxu3 %v1098_v1  ;;  %v1645_v50 = vpop.f32.mrf.mxu2 }
 0x216   :  { %2319 = vmatpush.msrb.mxu0 %v1048_v2  ;;  %2338 = vmatpush.msrb.mxu1 %v1065_v3  ;;  %v1606_v48 = vadd.f32 %v1605_v46, %v1586_v47 }
 0x217   :  { %2359 = vmatpush.msrb.mxu2 %v1080_v5  ;;  %2378 = vmatpush.msrb.mxu3 %v1097_v6 }
 0x218   :  { %2320 = vmatpush.msrb.mxu0 %v1047_v8  ;;  %2339 = vmatpush.msrb.mxu1 %v1064_v9  ;;  %v1626_v51 = vadd.f32 %v1625_v49, %v1606_v48 }
 0x219   :  { %2360 = vmatpush.msrb.mxu2 %v1079_v10  ;;  %2379 = vmatpush.msrb.mxu3 %v1096_v11 }
 0x21a   :  { %2321 = vmatpush.msrb.mxu0 %v1046_v13  ;;  %2340 = vmatpush.msrb.mxu1 %v1063_v14  ;;  %v1646_v52 = vadd.f32 %v1645_v50, %v1626_v51 }
 0x21b   :  { %2361 = vmatpush.msrb.mxu2 %v1078_v16  ;;  %2380 = vmatpush.msrb.mxu3 %v1095_v17  ;;  %v1665_v53 = vpop.f32.mrf.mxu3  ;;  %v1685_v54 = vpop.f32.mrf.mxu0 }
 0x21c   :  { %2322 = vmatpush.msrb.mxu0 %v1045_v18  ;;  %2341 = vmatpush.msrb.mxu1 %v1062_v19  ;;  %v1666_v55 = vadd.f32 %v1665_v53, %v1646_v52  ;;  %v1705_v57 = vpop.f32.mrf.mxu1 }
 0x21d   :  { %2362 = vmatpush.msrb.mxu2 %v1077_v21  ;;  %2381 = vmatpush.msrb.mxu3 %v1094_v22  ;;  %v1725_v58 = vpop.f32.mrf.mxu2 }
 0x21e   :  { %2323 = vmatpush.msrb.mxu0 %v1044_v24  ;;  %2342 = vmatpush.msrb.mxu1 %v1061_v25  ;;  %v1686_v56 = vadd.f32 %v1685_v54, %v1666_v55 }
 0x21f   :  { %2363 = vmatpush.msrb.mxu2 %v1076_v26  ;;  %2382 = vmatpush.msrb.mxu3 %v1093_v27 }
 0x220   :  { %2324 = vmatmul.f32.vlgmr.msrb.gmra.mxu0 %v80_v29  ;;  %2364 = vmatmul.f32.vlgmr.msrb.gmra.mxu2 %v82_v30  ;;  %v1706_v59 = vadd.f32 %v1705_v57, %v1686_v56 }
 0x221   :  { %2343 = vmatpush.msrb.mxu1 %v1060_v32  ;;  %2383 = vmatpush.msrb.mxu3 %v1092_v33 }
 0x222   :  { %2344 = vmatmul.f32.vlgmr.msrb.gmra.mxu1 %v81_v34  ;;  %2384 = vmatmul.f32.vlgmr.msrb.gmra.mxu3 %v83_v35  ;;  %v1726_v60 = vadd.f32 %v1725_v58, %v1706_v59 }
 0x223   :  { %v1745_v61 = vpop.f32.mrf.mxu3  ;;  %v1765_v62 = vpop.f32.mrf.mxu0 }
 0x224   :  { %v1746_v63 = vadd.f32 %v1745_v61, %v1726_v60  ;;  %v1785_v1 = vpop.f32.mrf.mxu1 }
 0x225   :  { %v1805_v2 = vpop.f32.mrf.mxu2 }
 0x226   :  { %v1766_v0 = vadd.f32 %v1765_v62, %v1746_v63  ;;  %v2423_v63 = vld [vmem:[%s5720_s2] ss:$0 sm:$0xff] }
 0x228   :  { %v1786_v3 = vadd.f32 %v1785_v1, %v1766_v0 }
 0x22a   :  { %v1806_v4 = vadd.f32 %v1805_v2, %v1786_v3 }
 0x22b   :  { %v1825_v5 = vpop.f32.mrf.mxu3  ;;  %v1845_v6 = vpop.f32.mrf.mxu0 }
 0x22c   :  { %v1826_v7 = vadd.f32 %v1825_v5, %v1806_v4  ;;  %v1865_v9 = vpop.f32.mrf.mxu1 }
 0x22d   :  { %v1885_v10 = vpop.f32.mrf.mxu2 }
 0x22e   :  { %v1846_v8 = vadd.f32 %v1845_v6, %v1826_v7  ;;  %v2399_v6 = vlaneseq }
 0x230   :  { %v1866_v11 = vadd.f32 %v1865_v9, %v1846_v8  ;;  %v2400_v8 = vand.u32 127, %v2399_v6 }
 0x232   :  { %v1886_v12 = vadd.f32 %v1885_v10, %v1866_v11  ;;  %vm2401_vm0 = vcmp.lt.s32.totalorder %v2400_v8, 3 }
 0x233   :  { %v1905_v13 = vpop.f32.mrf.mxu3  ;;  %v1925_v14 = vpop.f32.mrf.mxu0 }
 0x234   :  { %v1906_v15 = vadd.f32 %v1905_v13, %v1886_v12  ;;  %v1945_v17 = vpop.f32.mrf.mxu1 }
 0x235   :  { %v1965_v18 = vpop.f32.mrf.mxu2 }
 0x236   :  { %v1926_v16 = vadd.f32 %v1925_v14, %v1906_v15 }
 0x238   :  { %v1946_v19 = vadd.f32 %v1945_v17, %v1926_v16 }
 0x23a   :  { %v1966_v20 = vadd.f32 %v1965_v18, %v1946_v19 }
 0x23b   :  { %v1985_v21 = vpop.f32.mrf.mxu3  ;;  %v2005_v22 = vpop.f32.mrf.mxu0 }
 0x23c   :  { %v1986_v23 = vadd.f32 %v1985_v21, %v1966_v20  ;;  %v2025_v25 = vpop.f32.mrf.mxu1 }
 0x23d   :  { %v2045_v26 = vpop.f32.mrf.mxu2 }
 0x23e   :  { %v2006_v24 = vadd.f32 %v2005_v22, %v1986_v23 }
 0x240   :  { %v2026_v27 = vadd.f32 %v2025_v25, %v2006_v24 }
 0x242   :  { %v2046_v28 = vadd.f32 %v2045_v26, %v2026_v27 }
 0x243   :  { %v2065_v29 = vpop.f32.mrf.mxu3  ;;  %v2085_v30 = vpop.f32.mrf.mxu0 }
 0x244   :  { %v2066_v31 = vadd.f32 %v2065_v29, %v2046_v28  ;;  %v2105_v33 = vpop.f32.mrf.mxu1 }
 0x245   :  { %v2125_v34 = vpop.f32.mrf.mxu2 }
 0x246   :  { %v2086_v32 = vadd.f32 %v2085_v30, %v2066_v31 }
 0x248   :  { %v2106_v35 = vadd.f32 %v2105_v33, %v2086_v32 }
 0x24a   :  { %v2126_v36 = vadd.f32 %v2125_v34, %v2106_v35 }
 0x24b   :  { %v2145_v37 = vpop.f32.mrf.mxu3 }
 0x24c   :  { %v2146_v39 = vadd.f32 %v2145_v37, %v2126_v36 }
 0x259   :  { %v2165_v38 = vpop.f32.mrf.mxu0 }
 0x25a   :  { %v2166_v40 = vadd.f32 %v2165_v38, %v2146_v39 }
 0x25c   :  { %v2185_v41 = vpop.f32.mrf.mxu1 }
 0x25d   :  { %v2186_v43 = vadd.f32 %v2185_v41, %v2166_v40 }
 0x25f   :  { %v2205_v42 = vpop.f32.mrf.mxu2 }
 0x260   :  { %v2206_v44 = vadd.f32 %v2205_v42, %v2186_v43 }
 0x262   :  { %v2225_v45 = vpop.f32.mrf.mxu3 }
 0x263   :  { %v2226_v47 = vadd.f32 %v2225_v45, %v2206_v44 }
 0x27b   :  { %v2245_v46 = vpop.f32.mrf.mxu0 }
 0x27c   :  { %v2246_v48 = vadd.f32 %v2245_v46, %v2226_v47 }
 0x27e   :  { %v2265_v49 = vpop.f32.mrf.mxu1 }
 0x27f   :  { %v2266_v51 = vadd.f32 %v2265_v49, %v2246_v48 }
 0x281   :  { %v2285_v50 = vpop.f32.mrf.mxu2 }
 0x282   :  { %v2286_v52 = vadd.f32 %v2285_v50, %v2266_v51 }
 0x284   :  { %v2305_v53 = vpop.f32.mrf.mxu3 }
 0x285   :  { %v2306_v54 = vadd.f32 %v2305_v53, %v2286_v52 }
 0x29d   :  { %v2325_v55 = vpop.f32.mrf.mxu0 }
 0x29e   :  { %v2326_v56 = vadd.f32 %v2325_v55, %v2306_v54 }
 0x29f   :  { %v2345_v57 = vpop.f32.mrf.mxu1 }
 0x2a0   :  { %v2346_v58 = vadd.f32 %v2345_v57, %v2326_v56 }
 0x2a3   :  { %v2365_v59 = vpop.f32.mrf.mxu2 }
 0x2a4   :  { %v2366_v60 = vadd.f32 %v2365_v59, %v2346_v58 }
 0x2a5   :  { %v2385_v61 = vpop.f32.mrf.mxu3 }
 0x2a6   :  { %v2386_v62 = vadd.f32 %v2385_v61, %v2366_v60 }
 0x2a8   :  { %v2398_v0 = vadd.f32 %v2423_v63, %v2386_v62 }
 0x2aa   :  { %v2403_v1 = vmin.f32 %v2398_v0, 20.0  ;;  %vm2402_vm2 = vcmp.gt.f32.partialorder %v2398_v0, 20.0 }
 0x2ac   :  { %v2404_v2 = vmul.f32 1.442695, %v2403_v1 }
 0x2ae   :  { %2424 = vpow2.f32 %v2404_v2 }
 0x2b4   :  { %v2425_v3 = vpop.eup %2424 }
 0x2b5   :  { %v2406_v4 = vadd.f32 1.0, %v2425_v3  ;;  %v2409_v5 = vmul.f32 -0.5, %v2425_v3  ;;  %v2412_v9 = vand.u32 2147483647, %v2425_v3 }
 0x2b7   :  { %2426 = vlog2.f32 %v2406_v4  ;;  %v2410_v7 = vadd.f32 1.0, %v2409_v5  ;;  %vm2413_vm1 = vcmp.lt.f32.partialorder %v2412_v9, 0.0004427343 }
 0x2b9   :  { %v2411_v12 = vmul.f32 %v2425_v3, %v2410_v7 }
 0x2bd   :  { %v2427_v10 = vpop.eup %2426 }
 0x2be   :  { %v2408_v11 = vmul.f32 0.6931472, %v2427_v10 }
 0x2c0   :  { %v2414_v13 = vsel %vm2413_vm1, %v2411_v12, %v2408_v11 }
 0x2c1   :  { %v2415_v14 = vsel %vm2402_vm2, %v2398_v0, %v2414_v13 }
 0x2c2   :  { %v2416_v15 = vsel %vm2401_vm0, %v2415_v14, %v2398_v0 }
 0x2c3   :  { %2417 = vst [vmem:[%s5721_s3] sm:$0xff] %v2416_v15 }

</bundles_post_ra>
